<compile_context>
chip_gen: v7x
topology: tpu7x:2x2x1
jax: 0.10.0
libtpu: 0.0.40
codegen_flags: <defaults>
</compile_context>

<pallas_src>
import functools

import jax
import jax.numpy as jnp
import numpy as np
from jax.experimental import pallas as pl
from jax.experimental.pallas import tpu as pltpu

# ---------------------------------------------------------------------------
# Model hyper-parameters (mirrors Model.__init__ args)
# ---------------------------------------------------------------------------
IN_CHANNELS = 4
OUT_CHANNELS = 8
KERNEL_SIZE = 4
STRIDE = 2
PADDING = 1
MAXPOOL_K = 2
MAXPOOL_S = 2
HARDTANH_MIN = -1.0
HARDTANH_MAX = 1.0

# Parity/shift tap table for stride=2, padding=1, kernel=4:
#   conv-transpose output row oh = 2*i + a reads padded input row (i + r0)
#   through kernel row _TAPS[a][r0]; (a, r0) pairs not in the table contribute
#   nothing.  Same table applies to the width axis.
_TAPS = {0: {0: 3, 1: 1}, 1: {1: 2, 2: 0}}
_NSHIFT = 3          # r0, c0 in {0, 1, 2}
_NPAR = 2 * 2        # the 4 output parities covered by one 2x2 pool window


# ---------------------------------------------------------------------------
# Pallas kernel: per batch element the whole hot path is fused:
#   conv-transpose (9 shifted rank-Cin updates) -> parity max (== maxpool)
#   -> +bias -> hardtanh -> masked spatial mean -> tanh
# ---------------------------------------------------------------------------
def _fused_kernel(x_ref, w_ref, b_ref, m_ref, o_ref, *, cin, cout, wp,
                  acc_cols, n_valid, hmin, hmax):
    xv = x_ref[0]                                   # (cin, hp*wp), lane-dense
    acc = jnp.zeros((_NPAR * cout, acc_cols), jnp.float32)

    # Conv-transpose accumulated as 9 shifted views x rank-Cin weight columns.
    # Exact f32 on the VPU (contraction is only Cin=4 wide -> MXU pointless).
    for r0 in range(_NSHIFT):
        for c0 in range(_NSHIFT):
            s = r0 * _NSHIFT + c0
            off = r0 * wp + c0                      # static lane offset
            xs = xv[:, off:off + acc_cols]          # (cin, acc_cols)
            for ci in range(cin):
                # (32, 1) weight column  x  (1, acc_cols) input row
                acc = acc + w_ref[s * cin + ci] * xs[ci:ci + 1, :]

    # MaxPool2d == max over the 4 parity sub-convolutions; slices are
    # sublane-group aligned (multiples of 8 rows) -> free.
    pooled = acc[0:cout, :]
    for p in range(1, _NPAR):
        pooled = jnp.maximum(pooled, acc[p * cout:(p + 1) * cout, :])
    pooled = pooled + b_ref[...]                    # bias (cout, 1)

    # Hardtanh, mask the row-wrap garbage lanes, spatial mean, tanh.
    clamped = jnp.clip(pooled, hmin, hmax) * m_ref[...]
    mean = jnp.sum(clamped, axis=1, keepdims=True) * (1.0 / n_valid)
    o_ref[...] = jnp.tanh(mean).reshape(o_ref.shape)


# ---------------------------------------------------------------------------
# Host-side constant tables (pure numpy, folded at trace time)
# ---------------------------------------------------------------------------
def _parity_tables():
    n_s = _NSHIFT * _NSHIFT
    kh = np.zeros((n_s, _NPAR), np.int32)
    kw = np.zeros((n_s, _NPAR), np.int32)
    val = np.zeros((n_s, _NPAR), np.float32)
    for a in range(2):
        for b in range(2):
            p = a * 2 + b
            for r0, tkh in _TAPS[a].items():
                for c0, tkw in _TAPS[b].items():
                    s = r0 * _NSHIFT + c0
                    kh[s, p] = tkh
                    kw[s, p] = tkw
                    val[s, p] = 1.0
    return kh, kw, val


# ---------------------------------------------------------------------------
# Wrapper: only pad + flatten the input and gather the per-shift weight table;
# everything else runs inside the single Pallas kernel.
# ---------------------------------------------------------------------------
@jax.jit
def model_forward(x_nchw, weight, bias):
    N, Cin, H, W = x_nchw.shape
    Cout = weight.shape[1]
    K, S, P = KERNEL_SIZE, STRIDE, PADDING
    assert (K, S, P, MAXPOOL_K, MAXPOOL_S) == (4, 2, 1, 2, 2)

    HP, WP = H + 2 * P, W + 2 * P        # zero-padded input spatial dims (18)
    PH, PW = H, W                        # pooled output spatial dims (16)
    ACC = (PH - 1) * WP + PW             # flattened accumulator lanes (286)
    n_valid = PH * PW                    # real pooled pixels (256)

    # --- tiny input prep: pad by 1 and flatten spatial (no dilation/im2col) --
    xp = jnp.pad(x_nchw.astype(jnp.float32),
                 ((0, 0), (0, 0), (P, P), (P, P)))
    x_flat = xp.reshape(N, Cin, HP * WP)                      # (N, 4, 324)

    # --- per-(shift, cin) weight columns via a constant gather --------------
    kh_t, kw_t, val_t = _parity_tables()
    wt = jnp.transpose(weight.astype(jnp.float32), (2, 3, 0, 1))  # (K,K,Ci,Co)
    a_tab = wt[kh_t, kw_t] * jnp.asarray(val_t)[:, :, None, None]  # (9,4,Ci,Co)
    w_kern = jnp.transpose(a_tab, (0, 2, 1, 3)).reshape(
        _NSHIFT * _NSHIFT * Cin, _NPAR * Cout, 1)             # (36, 32, 1)

    b2d = bias.astype(jnp.float32).reshape(Cout, 1)
    mask = jnp.asarray(((np.arange(ACC) % WP) < PW)
                       .astype(np.float32).reshape(1, ACC))   # (1, 286)

    kernel = functools.partial(
        _fused_kernel, cin=Cin, cout=Cout, wp=WP, acc_cols=ACC,
        n_valid=n_valid, hmin=HARDTANH_MIN, hmax=HARDTANH_MAX)

    out = pl.pallas_call(
        kernel,
        out_shape=jax.ShapeDtypeStruct((N, Cout, 1), jnp.float32),
        grid=(N,),
        in_specs=[
            pl.BlockSpec((1, Cin, HP * WP), lambda n: (n, 0, 0)),
            pl.BlockSpec((_NSHIFT * _NSHIFT * Cin, _NPAR * Cout, 1),
                         lambda n: (0, 0, 0)),
            pl.BlockSpec((Cout, 1), lambda n: (0, 0)),
            pl.BlockSpec((1, ACC), lambda n: (0, 0)),
        ],
        out_specs=pl.BlockSpec((1, Cout, 1), lambda n: (n, 0, 0)),
        compiler_params=pltpu.CompilerParams(
            dimension_semantics=("parallel",)),
    )(x_flat, w_kern, b2d, mask)

    return out.reshape(N, Cout, 1, 1)                 # matches torch (N,C,1,1)


# ---------------------------------------------------------------------------
# Pure-JAX reference (independent formulation: scatter-style conv_transpose)
# ---------------------------------------------------------------------------
def reference_forward(x, weight, bias):
    N, Cin, H, W = x.shape
    Cout = weight.shape[1]
    K, S, P = KERNEL_SIZE, STRIDE, PADDING
    Hf, Wf = (H - 1) * S + K, (W - 1) * S + K
    full = jnp.zeros((N, Cout, Hf, Wf), jnp.float32)
    for kh in range(K):
        for kw in range(K):
            contrib = jnp.einsum('nihw,io->nohw', x, weight[:, :, kh, kw],
                                 precision=jax.lax.Precision.HIGHEST)
            full = full.at[:, :, kh:kh + (H - 1) * S + 1:S,
                                 kw:kw + (W - 1) * S + 1:S].add(contrib)
    H_out, W_out = Hf - 2 * P, Wf - 2 * P
    conv = full[:, :, P:P + H_out, P:P + W_out] + bias[None, :, None, None]
    pooled = jax.lax.reduce_window(conv, -jnp.inf, jax.lax.max,
                                   (1, 1, MAXPOOL_K, MAXPOOL_K),
                                   (1, 1, MAXPOOL_S, MAXPOOL_S), 'VALID')
    clamped = jnp.clip(pooled, HARDTANH_MIN, HARDTANH_MAX)
    return jnp.tanh(jnp.mean(clamped, axis=(2, 3), keepdims=True))


if __name__ == "__main__":
    key = jax.random.PRNGKey(0)
    kx, kw, kb = jax.random.split(key, 3)

    x = jax.random.normal(kx, (2, IN_CHANNELS, 16, 16), jnp.float32)
    fan = IN_CHANNELS * KERNEL_SIZE * KERNEL_SIZE
    bound = 1.0 / np.sqrt(fan)
    weight = jax.random.uniform(
        kw, (IN_CHANNELS, OUT_CHANNELS, KERNEL_SIZE, KERNEL_SIZE),
        jnp.float32, -bound, bound)
    bias = jax.random.uniform(kb, (OUT_CHANNELS,), jnp.float32, -bound, bound)

    out = jax.block_until_ready(model_forward(x, weight, bias))
    ref = jax.block_until_ready(reference_forward(x, weight, bias))
    np.testing.assert_allclose(np.asarray(out), np.asarray(ref),
                               rtol=1e-3, atol=1e-4)
    print("KERNEL_OK")
</pallas_src>

<mosaic_0001>
module attributes {stable_mosaic.version = 11 : i64} {
  func.func @_fused_kernel(%arg0: i32, %arg1: memref<1x4x324xf32, #tpu.memory_space<vmem>>, %arg2: memref<36x32x1xf32, #tpu.memory_space<vmem>>, %arg3: memref<8x1xf32, #tpu.memory_space<vmem>>, %arg4: memref<1x286xf32, #tpu.memory_space<vmem>>, %arg5: memref<1x8x1xf32, #tpu.memory_space<vmem>>) attributes {dimension_semantics = [#tpu.dimension_semantics<parallel>], iteration_bounds = array<i64: 2>, scalar_prefetch = 0 : i64, scratch_operands = 0 : i64, tpu.core_type = #tpu.core_type<tc>, window_params = [{transform_indices = @transform_0, window_bounds = array<i64: 1, 4, 324>}, {pipeline_mode = #tpu.pipeline_mode<synchronous>, transform_indices = @transform_1, window_bounds = array<i64: 36, 32, 1>}, {pipeline_mode = #tpu.pipeline_mode<synchronous>, transform_indices = @transform_2, window_bounds = array<i64: 8, 1>}, {pipeline_mode = #tpu.pipeline_mode<synchronous>, transform_indices = @transform_3, window_bounds = array<i64: 1, 286>}, {transform_indices = @transform_4, window_bounds = array<i64: 1, 8, 1>}]} {
    %c0 = arith.constant 0 : index
    %c0_0 = arith.constant 0 : index
    %c0_1 = arith.constant 0 : index
    %0 = vector.load %arg1[%c0, %c0_0, %c0_1] : memref<1x4x324xf32, #tpu.memory_space<vmem>>, vector<1x4x324xf32>
    %1 = vector.shape_cast %0 : vector<1x4x324xf32> to vector<4x324xf32>
    %cst = arith.constant 0.000000e+00 : f32
    %2 = vector.broadcast %cst : f32 to vector<32x286xf32>
    %3 = vector.extract_strided_slice %1 {offsets = [0, 0], sizes = [4, 286], strides = [1, 1]} : vector<4x324xf32> to vector<4x286xf32>
    %c0_2 = arith.constant 0 : index
    %c0_3 = arith.constant 0 : index
    %c0_4 = arith.constant 0 : index
    %4 = vector.load %arg2[%c0_2, %c0_3, %c0_4] : memref<36x32x1xf32, #tpu.memory_space<vmem>>, vector<1x32x1xf32>
    %5 = vector.shape_cast %4 : vector<1x32x1xf32> to vector<32x1xf32>
    %6 = vector.extract_strided_slice %3 {offsets = [0, 0], sizes = [1, 286], strides = [1, 1]} : vector<4x286xf32> to vector<1x286xf32>
    %7 = vector.broadcast %5 : vector<32x1xf32> to vector<32x286xf32>
    %8 = vector.broadcast %6 : vector<1x286xf32> to vector<32x286xf32>
    %9 = arith.mulf %7, %8 : vector<32x286xf32>
    %10 = arith.addf %2, %9 : vector<32x286xf32>
    %c1 = arith.constant 1 : index
    %c0_5 = arith.constant 0 : index
    %c0_6 = arith.constant 0 : index
    %11 = vector.load %arg2[%c1, %c0_5, %c0_6] : memref<36x32x1xf32, #tpu.memory_space<vmem>>, vector<1x32x1xf32>
    %12 = vector.shape_cast %11 : vector<1x32x1xf32> to vector<32x1xf32>
    %13 = vector.extract_strided_slice %3 {offsets = [1, 0], sizes = [1, 286], strides = [1, 1]} : vector<4x286xf32> to vector<1x286xf32>
    %14 = vector.broadcast %12 : vector<32x1xf32> to vector<32x286xf32>
    %15 = vector.broadcast %13 : vector<1x286xf32> to vector<32x286xf32>
    %16 = arith.mulf %14, %15 : vector<32x286xf32>
    %17 = arith.addf %10, %16 : vector<32x286xf32>
    %c2 = arith.constant 2 : index
    %c0_7 = arith.constant 0 : index
    %c0_8 = arith.constant 0 : index
    %18 = vector.load %arg2[%c2, %c0_7, %c0_8] : memref<36x32x1xf32, #tpu.memory_space<vmem>>, vector<1x32x1xf32>
    %19 = vector.shape_cast %18 : vector<1x32x1xf32> to vector<32x1xf32>
    %20 = vector.extract_strided_slice %3 {offsets = [2, 0], sizes = [1, 286], strides = [1, 1]} : vector<4x286xf32> to vector<1x286xf32>
    %21 = vector.broadcast %19 : vector<32x1xf32> to vector<32x286xf32>
    %22 = vector.broadcast %20 : vector<1x286xf32> to vector<32x286xf32>
    %23 = arith.mulf %21, %22 : vector<32x286xf32>
    %24 = arith.addf %17, %23 : vector<32x286xf32>
    %c3 = arith.constant 3 : index
    %c0_9 = arith.constant 0 : index
    %c0_10 = arith.constant 0 : index
    %25 = vector.load %arg2[%c3, %c0_9, %c0_10] : memref<36x32x1xf32, #tpu.memory_space<vmem>>, vector<1x32x1xf32>
    %26 = vector.shape_cast %25 : vector<1x32x1xf32> to vector<32x1xf32>
    %27 = vector.extract_strided_slice %3 {offsets = [3, 0], sizes = [1, 286], strides = [1, 1]} : vector<4x286xf32> to vector<1x286xf32>
    %28 = vector.broadcast %26 : vector<32x1xf32> to vector<32x286xf32>
    %29 = vector.broadcast %27 : vector<1x286xf32> to vector<32x286xf32>
    %30 = arith.mulf %28, %29 : vector<32x286xf32>
    %31 = arith.addf %24, %30 : vector<32x286xf32>
    %32 = vector.extract_strided_slice %1 {offsets = [0, 1], sizes = [4, 286], strides = [1, 1]} : vector<4x324xf32> to vector<4x286xf32>
    %c4 = arith.constant 4 : index
    %c0_11 = arith.constant 0 : index
    %c0_12 = arith.constant 0 : index
    %33 = vector.load %arg2[%c4, %c0_11, %c0_12] : memref<36x32x1xf32, #tpu.memory_space<vmem>>, vector<1x32x1xf32>
    %34 = vector.shape_cast %33 : vector<1x32x1xf32> to vector<32x1xf32>
    %35 = vector.extract_strided_slice %32 {offsets = [0, 0], sizes = [1, 286], strides = [1, 1]} : vector<4x286xf32> to vector<1x286xf32>
    %36 = vector.broadcast %34 : vector<32x1xf32> to vector<32x286xf32>
    %37 = vector.broadcast %35 : vector<1x286xf32> to vector<32x286xf32>
    %38 = arith.mulf %36, %37 : vector<32x286xf32>
    %39 = arith.addf %31, %38 : vector<32x286xf32>
    %c5 = arith.constant 5 : index
    %c0_13 = arith.constant 0 : index
    %c0_14 = arith.constant 0 : index
    %40 = vector.load %arg2[%c5, %c0_13, %c0_14] : memref<36x32x1xf32, #tpu.memory_space<vmem>>, vector<1x32x1xf32>
    %41 = vector.shape_cast %40 : vector<1x32x1xf32> to vector<32x1xf32>
    %42 = vector.extract_strided_slice %32 {offsets = [1, 0], sizes = [1, 286], strides = [1, 1]} : vector<4x286xf32> to vector<1x286xf32>
    %43 = vector.broadcast %41 : vector<32x1xf32> to vector<32x286xf32>
    %44 = vector.broadcast %42 : vector<1x286xf32> to vector<32x286xf32>
    %45 = arith.mulf %43, %44 : vector<32x286xf32>
    %46 = arith.addf %39, %45 : vector<32x286xf32>
    %c6 = arith.constant 6 : index
    %c0_15 = arith.constant 0 : index
    %c0_16 = arith.constant 0 : index
    %47 = vector.load %arg2[%c6, %c0_15, %c0_16] : memref<36x32x1xf32, #tpu.memory_space<vmem>>, vector<1x32x1xf32>
    %48 = vector.shape_cast %47 : vector<1x32x1xf32> to vector<32x1xf32>
    %49 = vector.extract_strided_slice %32 {offsets = [2, 0], sizes = [1, 286], strides = [1, 1]} : vector<4x286xf32> to vector<1x286xf32>
    %50 = vector.broadcast %48 : vector<32x1xf32> to vector<32x286xf32>
    %51 = vector.broadcast %49 : vector<1x286xf32> to vector<32x286xf32>
    %52 = arith.mulf %50, %51 : vector<32x286xf32>
    %53 = arith.addf %46, %52 : vector<32x286xf32>
    %c7 = arith.constant 7 : index
    %c0_17 = arith.constant 0 : index
    %c0_18 = arith.constant 0 : index
    %54 = vector.load %arg2[%c7, %c0_17, %c0_18] : memref<36x32x1xf32, #tpu.memory_space<vmem>>, vector<1x32x1xf32>
    %55 = vector.shape_cast %54 : vector<1x32x1xf32> to vector<32x1xf32>
    %56 = vector.extract_strided_slice %32 {offsets = [3, 0], sizes = [1, 286], strides = [1, 1]} : vector<4x286xf32> to vector<1x286xf32>
    %57 = vector.broadcast %55 : vector<32x1xf32> to vector<32x286xf32>
    %58 = vector.broadcast %56 : vector<1x286xf32> to vector<32x286xf32>
    %59 = arith.mulf %57, %58 : vector<32x286xf32>
    %60 = arith.addf %53, %59 : vector<32x286xf32>
    %61 = vector.extract_strided_slice %1 {offsets = [0, 2], sizes = [4, 286], strides = [1, 1]} : vector<4x324xf32> to vector<4x286xf32>
    %c8 = arith.constant 8 : index
    %c0_19 = arith.constant 0 : index
    %c0_20 = arith.constant 0 : index
    %62 = vector.load %arg2[%c8, %c0_19, %c0_20] : memref<36x32x1xf32, #tpu.memory_space<vmem>>, vector<1x32x1xf32>
    %63 = vector.shape_cast %62 : vector<1x32x1xf32> to vector<32x1xf32>
    %64 = vector.extract_strided_slice %61 {offsets = [0, 0], sizes = [1, 286], strides = [1, 1]} : vector<4x286xf32> to vector<1x286xf32>
    %65 = vector.broadcast %63 : vector<32x1xf32> to vector<32x286xf32>
    %66 = vector.broadcast %64 : vector<1x286xf32> to vector<32x286xf32>
    %67 = arith.mulf %65, %66 : vector<32x286xf32>
    %68 = arith.addf %60, %67 : vector<32x286xf32>
    %c9 = arith.constant 9 : index
    %c0_21 = arith.constant 0 : index
    %c0_22 = arith.constant 0 : index
    %69 = vector.load %arg2[%c9, %c0_21, %c0_22] : memref<36x32x1xf32, #tpu.memory_space<vmem>>, vector<1x32x1xf32>
    %70 = vector.shape_cast %69 : vector<1x32x1xf32> to vector<32x1xf32>
    %71 = vector.extract_strided_slice %61 {offsets = [1, 0], sizes = [1, 286], strides = [1, 1]} : vector<4x286xf32> to vector<1x286xf32>
    %72 = vector.broadcast %70 : vector<32x1xf32> to vector<32x286xf32>
    %73 = vector.broadcast %71 : vector<1x286xf32> to vector<32x286xf32>
    %74 = arith.mulf %72, %73 : vector<32x286xf32>
    %75 = arith.addf %68, %74 : vector<32x286xf32>
    %c10 = arith.constant 10 : index
    %c0_23 = arith.constant 0 : index
    %c0_24 = arith.constant 0 : index
    %76 = vector.load %arg2[%c10, %c0_23, %c0_24] : memref<36x32x1xf32, #tpu.memory_space<vmem>>, vector<1x32x1xf32>
    %77 = vector.shape_cast %76 : vector<1x32x1xf32> to vector<32x1xf32>
    %78 = vector.extract_strided_slice %61 {offsets = [2, 0], sizes = [1, 286], strides = [1, 1]} : vector<4x286xf32> to vector<1x286xf32>
    %79 = vector.broadcast %77 : vector<32x1xf32> to vector<32x286xf32>
    %80 = vector.broadcast %78 : vector<1x286xf32> to vector<32x286xf32>
    %81 = arith.mulf %79, %80 : vector<32x286xf32>
    %82 = arith.addf %75, %81 : vector<32x286xf32>
    %c11 = arith.constant 11 : index
    %c0_25 = arith.constant 0 : index
    %c0_26 = arith.constant 0 : index
    %83 = vector.load %arg2[%c11, %c0_25, %c0_26] : memref<36x32x1xf32, #tpu.memory_space<vmem>>, vector<1x32x1xf32>
    %84 = vector.shape_cast %83 : vector<1x32x1xf32> to vector<32x1xf32>
    %85 = vector.extract_strided_slice %61 {offsets = [3, 0], sizes = [1, 286], strides = [1, 1]} : vector<4x286xf32> to vector<1x286xf32>
    %86 = vector.broadcast %84 : vector<32x1xf32> to vector<32x286xf32>
    %87 = vector.broadcast %85 : vector<1x286xf32> to vector<32x286xf32>
    %88 = arith.mulf %86, %87 : vector<32x286xf32>
    %89 = arith.addf %82, %88 : vector<32x286xf32>
    %90 = vector.extract_strided_slice %1 {offsets = [0, 18], sizes = [4, 286], strides = [1, 1]} : vector<4x324xf32> to vector<4x286xf32>
    %c12 = arith.constant 12 : index
    %c0_27 = arith.constant 0 : index
    %c0_28 = arith.constant 0 : index
    %91 = vector.load %arg2[%c12, %c0_27, %c0_28] : memref<36x32x1xf32, #tpu.memory_space<vmem>>, vector<1x32x1xf32>
    %92 = vector.shape_cast %91 : vector<1x32x1xf32> to vector<32x1xf32>
    %93 = vector.extract_strided_slice %90 {offsets = [0, 0], sizes = [1, 286], strides = [1, 1]} : vector<4x286xf32> to vector<1x286xf32>
    %94 = vector.broadcast %92 : vector<32x1xf32> to vector<32x286xf32>
    %95 = vector.broadcast %93 : vector<1x286xf32> to vector<32x286xf32>
    %96 = arith.mulf %94, %95 : vector<32x286xf32>
    %97 = arith.addf %89, %96 : vector<32x286xf32>
    %c13 = arith.constant 13 : index
    %c0_29 = arith.constant 0 : index
    %c0_30 = arith.constant 0 : index
    %98 = vector.load %arg2[%c13, %c0_29, %c0_30] : memref<36x32x1xf32, #tpu.memory_space<vmem>>, vector<1x32x1xf32>
    %99 = vector.shape_cast %98 : vector<1x32x1xf32> to vector<32x1xf32>
    %100 = vector.extract_strided_slice %90 {offsets = [1, 0], sizes = [1, 286], strides = [1, 1]} : vector<4x286xf32> to vector<1x286xf32>
    %101 = vector.broadcast %99 : vector<32x1xf32> to vector<32x286xf32>
    %102 = vector.broadcast %100 : vector<1x286xf32> to vector<32x286xf32>
    %103 = arith.mulf %101, %102 : vector<32x286xf32>
    %104 = arith.addf %97, %103 : vector<32x286xf32>
    %c14 = arith.constant 14 : index
    %c0_31 = arith.constant 0 : index
    %c0_32 = arith.constant 0 : index
    %105 = vector.load %arg2[%c14, %c0_31, %c0_32] : memref<36x32x1xf32, #tpu.memory_space<vmem>>, vector<1x32x1xf32>
    %106 = vector.shape_cast %105 : vector<1x32x1xf32> to vector<32x1xf32>
    %107 = vector.extract_strided_slice %90 {offsets = [2, 0], sizes = [1, 286], strides = [1, 1]} : vector<4x286xf32> to vector<1x286xf32>
    %108 = vector.broadcast %106 : vector<32x1xf32> to vector<32x286xf32>
    %109 = vector.broadcast %107 : vector<1x286xf32> to vector<32x286xf32>
    %110 = arith.mulf %108, %109 : vector<32x286xf32>
    %111 = arith.addf %104, %110 : vector<32x286xf32>
    %c15 = arith.constant 15 : index
    %c0_33 = arith.constant 0 : index
    %c0_34 = arith.constant 0 : index
    %112 = vector.load %arg2[%c15, %c0_33, %c0_34] : memref<36x32x1xf32, #tpu.memory_space<vmem>>, vector<1x32x1xf32>
    %113 = vector.shape_cast %112 : vector<1x32x1xf32> to vector<32x1xf32>
    %114 = vector.extract_strided_slice %90 {offsets = [3, 0], sizes = [1, 286], strides = [1, 1]} : vector<4x286xf32> to vector<1x286xf32>
    %115 = vector.broadcast %113 : vector<32x1xf32> to vector<32x286xf32>
    %116 = vector.broadcast %114 : vector<1x286xf32> to vector<32x286xf32>
    %117 = arith.mulf %115, %116 : vector<32x286xf32>
    %118 = arith.addf %111, %117 : vector<32x286xf32>
    %119 = vector.extract_strided_slice %1 {offsets = [0, 19], sizes = [4, 286], strides = [1, 1]} : vector<4x324xf32> to vector<4x286xf32>
    %c16 = arith.constant 16 : index
    %c0_35 = arith.constant 0 : index
    %c0_36 = arith.constant 0 : index
    %120 = vector.load %arg2[%c16, %c0_35, %c0_36] : memref<36x32x1xf32, #tpu.memory_space<vmem>>, vector<1x32x1xf32>
    %121 = vector.shape_cast %120 : vector<1x32x1xf32> to vector<32x1xf32>
    %122 = vector.extract_strided_slice %119 {offsets = [0, 0], sizes = [1, 286], strides = [1, 1]} : vector<4x286xf32> to vector<1x286xf32>
    %123 = vector.broadcast %121 : vector<32x1xf32> to vector<32x286xf32>
    %124 = vector.broadcast %122 : vector<1x286xf32> to vector<32x286xf32>
    %125 = arith.mulf %123, %124 : vector<32x286xf32>
    %126 = arith.addf %118, %125 : vector<32x286xf32>
    %c17 = arith.constant 17 : index
    %c0_37 = arith.constant 0 : index
    %c0_38 = arith.constant 0 : index
    %127 = vector.load %arg2[%c17, %c0_37, %c0_38] : memref<36x32x1xf32, #tpu.memory_space<vmem>>, vector<1x32x1xf32>
    %128 = vector.shape_cast %127 : vector<1x32x1xf32> to vector<32x1xf32>
    %129 = vector.extract_strided_slice %119 {offsets = [1, 0], sizes = [1, 286], strides = [1, 1]} : vector<4x286xf32> to vector<1x286xf32>
    %130 = vector.broadcast %128 : vector<32x1xf32> to vector<32x286xf32>
    %131 = vector.broadcast %129 : vector<1x286xf32> to vector<32x286xf32>
    %132 = arith.mulf %130, %131 : vector<32x286xf32>
    %133 = arith.addf %126, %132 : vector<32x286xf32>
    %c18 = arith.constant 18 : index
    %c0_39 = arith.constant 0 : index
    %c0_40 = arith.constant 0 : index
    %134 = vector.load %arg2[%c18, %c0_39, %c0_40] : memref<36x32x1xf32, #tpu.memory_space<vmem>>, vector<1x32x1xf32>
    %135 = vector.shape_cast %134 : vector<1x32x1xf32> to vector<32x1xf32>
    %136 = vector.extract_strided_slice %119 {offsets = [2, 0], sizes = [1, 286], strides = [1, 1]} : vector<4x286xf32> to vector<1x286xf32>
    %137 = vector.broadcast %135 : vector<32x1xf32> to vector<32x286xf32>
    %138 = vector.broadcast %136 : vector<1x286xf32> to vector<32x286xf32>
    %139 = arith.mulf %137, %138 : vector<32x286xf32>
    %140 = arith.addf %133, %139 : vector<32x286xf32>
    %c19 = arith.constant 19 : index
    %c0_41 = arith.constant 0 : index
    %c0_42 = arith.constant 0 : index
    %141 = vector.load %arg2[%c19, %c0_41, %c0_42] : memref<36x32x1xf32, #tpu.memory_space<vmem>>, vector<1x32x1xf32>
    %142 = vector.shape_cast %141 : vector<1x32x1xf32> to vector<32x1xf32>
    %143 = vector.extract_strided_slice %119 {offsets = [3, 0], sizes = [1, 286], strides = [1, 1]} : vector<4x286xf32> to vector<1x286xf32>
    %144 = vector.broadcast %142 : vector<32x1xf32> to vector<32x286xf32>
    %145 = vector.broadcast %143 : vector<1x286xf32> to vector<32x286xf32>
    %146 = arith.mulf %144, %145 : vector<32x286xf32>
    %147 = arith.addf %140, %146 : vector<32x286xf32>
    %148 = vector.extract_strided_slice %1 {offsets = [0, 20], sizes = [4, 286], strides = [1, 1]} : vector<4x324xf32> to vector<4x286xf32>
    %c20 = arith.constant 20 : index
    %c0_43 = arith.constant 0 : index
    %c0_44 = arith.constant 0 : index
    %149 = vector.load %arg2[%c20, %c0_43, %c0_44] : memref<36x32x1xf32, #tpu.memory_space<vmem>>, vector<1x32x1xf32>
    %150 = vector.shape_cast %149 : vector<1x32x1xf32> to vector<32x1xf32>
    %151 = vector.extract_strided_slice %148 {offsets = [0, 0], sizes = [1, 286], strides = [1, 1]} : vector<4x286xf32> to vector<1x286xf32>
    %152 = vector.broadcast %150 : vector<32x1xf32> to vector<32x286xf32>
    %153 = vector.broadcast %151 : vector<1x286xf32> to vector<32x286xf32>
    %154 = arith.mulf %152, %153 : vector<32x286xf32>
    %155 = arith.addf %147, %154 : vector<32x286xf32>
    %c21 = arith.constant 21 : index
    %c0_45 = arith.constant 0 : index
    %c0_46 = arith.constant 0 : index
    %156 = vector.load %arg2[%c21, %c0_45, %c0_46] : memref<36x32x1xf32, #tpu.memory_space<vmem>>, vector<1x32x1xf32>
    %157 = vector.shape_cast %156 : vector<1x32x1xf32> to vector<32x1xf32>
    %158 = vector.extract_strided_slice %148 {offsets = [1, 0], sizes = [1, 286], strides = [1, 1]} : vector<4x286xf32> to vector<1x286xf32>
    %159 = vector.broadcast %157 : vector<32x1xf32> to vector<32x286xf32>
    %160 = vector.broadcast %158 : vector<1x286xf32> to vector<32x286xf32>
    %161 = arith.mulf %159, %160 : vector<32x286xf32>
    %162 = arith.addf %155, %161 : vector<32x286xf32>
    %c22 = arith.constant 22 : index
    %c0_47 = arith.constant 0 : index
    %c0_48 = arith.constant 0 : index
    %163 = vector.load %arg2[%c22, %c0_47, %c0_48] : memref<36x32x1xf32, #tpu.memory_space<vmem>>, vector<1x32x1xf32>
    %164 = vector.shape_cast %163 : vector<1x32x1xf32> to vector<32x1xf32>
    %165 = vector.extract_strided_slice %148 {offsets = [2, 0], sizes = [1, 286], strides = [1, 1]} : vector<4x286xf32> to vector<1x286xf32>
    %166 = vector.broadcast %164 : vector<32x1xf32> to vector<32x286xf32>
    %167 = vector.broadcast %165 : vector<1x286xf32> to vector<32x286xf32>
    %168 = arith.mulf %166, %167 : vector<32x286xf32>
    %169 = arith.addf %162, %168 : vector<32x286xf32>
    %c23 = arith.constant 23 : index
    %c0_49 = arith.constant 0 : index
    %c0_50 = arith.constant 0 : index
    %170 = vector.load %arg2[%c23, %c0_49, %c0_50] : memref<36x32x1xf32, #tpu.memory_space<vmem>>, vector<1x32x1xf32>
    %171 = vector.shape_cast %170 : vector<1x32x1xf32> to vector<32x1xf32>
    %172 = vector.extract_strided_slice %148 {offsets = [3, 0], sizes = [1, 286], strides = [1, 1]} : vector<4x286xf32> to vector<1x286xf32>
    %173 = vector.broadcast %171 : vector<32x1xf32> to vector<32x286xf32>
    %174 = vector.broadcast %172 : vector<1x286xf32> to vector<32x286xf32>
    %175 = arith.mulf %173, %174 : vector<32x286xf32>
    %176 = arith.addf %169, %175 : vector<32x286xf32>
    %177 = vector.extract_strided_slice %1 {offsets = [0, 36], sizes = [4, 286], strides = [1, 1]} : vector<4x324xf32> to vector<4x286xf32>
    %c24 = arith.constant 24 : index
    %c0_51 = arith.constant 0 : index
    %c0_52 = arith.constant 0 : index
    %178 = vector.load %arg2[%c24, %c0_51, %c0_52] : memref<36x32x1xf32, #tpu.memory_space<vmem>>, vector<1x32x1xf32>
    %179 = vector.shape_cast %178 : vector<1x32x1xf32> to vector<32x1xf32>
    %180 = vector.extract_strided_slice %177 {offsets = [0, 0], sizes = [1, 286], strides = [1, 1]} : vector<4x286xf32> to vector<1x286xf32>
    %181 = vector.broadcast %179 : vector<32x1xf32> to vector<32x286xf32>
    %182 = vector.broadcast %180 : vector<1x286xf32> to vector<32x286xf32>
    %183 = arith.mulf %181, %182 : vector<32x286xf32>
    %184 = arith.addf %176, %183 : vector<32x286xf32>
    %c25 = arith.constant 25 : index
    %c0_53 = arith.constant 0 : index
    %c0_54 = arith.constant 0 : index
    %185 = vector.load %arg2[%c25, %c0_53, %c0_54] : memref<36x32x1xf32, #tpu.memory_space<vmem>>, vector<1x32x1xf32>
    %186 = vector.shape_cast %185 : vector<1x32x1xf32> to vector<32x1xf32>
    %187 = vector.extract_strided_slice %177 {offsets = [1, 0], sizes = [1, 286], strides = [1, 1]} : vector<4x286xf32> to vector<1x286xf32>
    %188 = vector.broadcast %186 : vector<32x1xf32> to vector<32x286xf32>
    %189 = vector.broadcast %187 : vector<1x286xf32> to vector<32x286xf32>
    %190 = arith.mulf %188, %189 : vector<32x286xf32>
    %191 = arith.addf %184, %190 : vector<32x286xf32>
    %c26 = arith.constant 26 : index
    %c0_55 = arith.constant 0 : index
    %c0_56 = arith.constant 0 : index
    %192 = vector.load %arg2[%c26, %c0_55, %c0_56] : memref<36x32x1xf32, #tpu.memory_space<vmem>>, vector<1x32x1xf32>
    %193 = vector.shape_cast %192 : vector<1x32x1xf32> to vector<32x1xf32>
    %194 = vector.extract_strided_slice %177 {offsets = [2, 0], sizes = [1, 286], strides = [1, 1]} : vector<4x286xf32> to vector<1x286xf32>
    %195 = vector.broadcast %193 : vector<32x1xf32> to vector<32x286xf32>
    %196 = vector.broadcast %194 : vector<1x286xf32> to vector<32x286xf32>
    %197 = arith.mulf %195, %196 : vector<32x286xf32>
    %198 = arith.addf %191, %197 : vector<32x286xf32>
    %c27 = arith.constant 27 : index
    %c0_57 = arith.constant 0 : index
    %c0_58 = arith.constant 0 : index
    %199 = vector.load %arg2[%c27, %c0_57, %c0_58] : memref<36x32x1xf32, #tpu.memory_space<vmem>>, vector<1x32x1xf32>
    %200 = vector.shape_cast %199 : vector<1x32x1xf32> to vector<32x1xf32>
    %201 = vector.extract_strided_slice %177 {offsets = [3, 0], sizes = [1, 286], strides = [1, 1]} : vector<4x286xf32> to vector<1x286xf32>
    %202 = vector.broadcast %200 : vector<32x1xf32> to vector<32x286xf32>
    %203 = vector.broadcast %201 : vector<1x286xf32> to vector<32x286xf32>
    %204 = arith.mulf %202, %203 : vector<32x286xf32>
    %205 = arith.addf %198, %204 : vector<32x286xf32>
    %206 = vector.extract_strided_slice %1 {offsets = [0, 37], sizes = [4, 286], strides = [1, 1]} : vector<4x324xf32> to vector<4x286xf32>
    %c28 = arith.constant 28 : index
    %c0_59 = arith.constant 0 : index
    %c0_60 = arith.constant 0 : index
    %207 = vector.load %arg2[%c28, %c0_59, %c0_60] : memref<36x32x1xf32, #tpu.memory_space<vmem>>, vector<1x32x1xf32>
    %208 = vector.shape_cast %207 : vector<1x32x1xf32> to vector<32x1xf32>
    %209 = vector.extract_strided_slice %206 {offsets = [0, 0], sizes = [1, 286], strides = [1, 1]} : vector<4x286xf32> to vector<1x286xf32>
    %210 = vector.broadcast %208 : vector<32x1xf32> to vector<32x286xf32>
    %211 = vector.broadcast %209 : vector<1x286xf32> to vector<32x286xf32>
    %212 = arith.mulf %210, %211 : vector<32x286xf32>
    %213 = arith.addf %205, %212 : vector<32x286xf32>
    %c29 = arith.constant 29 : index
    %c0_61 = arith.constant 0 : index
    %c0_62 = arith.constant 0 : index
    %214 = vector.load %arg2[%c29, %c0_61, %c0_62] : memref<36x32x1xf32, #tpu.memory_space<vmem>>, vector<1x32x1xf32>
    %215 = vector.shape_cast %214 : vector<1x32x1xf32> to vector<32x1xf32>
    %216 = vector.extract_strided_slice %206 {offsets = [1, 0], sizes = [1, 286], strides = [1, 1]} : vector<4x286xf32> to vector<1x286xf32>
    %217 = vector.broadcast %215 : vector<32x1xf32> to vector<32x286xf32>
    %218 = vector.broadcast %216 : vector<1x286xf32> to vector<32x286xf32>
    %219 = arith.mulf %217, %218 : vector<32x286xf32>
    %220 = arith.addf %213, %219 : vector<32x286xf32>
    %c30 = arith.constant 30 : index
    %c0_63 = arith.constant 0 : index
    %c0_64 = arith.constant 0 : index
    %221 = vector.load %arg2[%c30, %c0_63, %c0_64] : memref<36x32x1xf32, #tpu.memory_space<vmem>>, vector<1x32x1xf32>
    %222 = vector.shape_cast %221 : vector<1x32x1xf32> to vector<32x1xf32>
    %223 = vector.extract_strided_slice %206 {offsets = [2, 0], sizes = [1, 286], strides = [1, 1]} : vector<4x286xf32> to vector<1x286xf32>
    %224 = vector.broadcast %222 : vector<32x1xf32> to vector<32x286xf32>
    %225 = vector.broadcast %223 : vector<1x286xf32> to vector<32x286xf32>
    %226 = arith.mulf %224, %225 : vector<32x286xf32>
    %227 = arith.addf %220, %226 : vector<32x286xf32>
    %c31 = arith.constant 31 : index
    %c0_65 = arith.constant 0 : index
    %c0_66 = arith.constant 0 : index
    %228 = vector.load %arg2[%c31, %c0_65, %c0_66] : memref<36x32x1xf32, #tpu.memory_space<vmem>>, vector<1x32x1xf32>
    %229 = vector.shape_cast %228 : vector<1x32x1xf32> to vector<32x1xf32>
    %230 = vector.extract_strided_slice %206 {offsets = [3, 0], sizes = [1, 286], strides = [1, 1]} : vector<4x286xf32> to vector<1x286xf32>
    %231 = vector.broadcast %229 : vector<32x1xf32> to vector<32x286xf32>
    %232 = vector.broadcast %230 : vector<1x286xf32> to vector<32x286xf32>
    %233 = arith.mulf %231, %232 : vector<32x286xf32>
    %234 = arith.addf %227, %233 : vector<32x286xf32>
    %235 = vector.extract_strided_slice %1 {offsets = [0, 38], sizes = [4, 286], strides = [1, 1]} : vector<4x324xf32> to vector<4x286xf32>
    %c32 = arith.constant 32 : index
    %c0_67 = arith.constant 0 : index
    %c0_68 = arith.constant 0 : index
    %236 = vector.load %arg2[%c32, %c0_67, %c0_68] : memref<36x32x1xf32, #tpu.memory_space<vmem>>, vector<1x32x1xf32>
    %237 = vector.shape_cast %236 : vector<1x32x1xf32> to vector<32x1xf32>
    %238 = vector.extract_strided_slice %235 {offsets = [0, 0], sizes = [1, 286], strides = [1, 1]} : vector<4x286xf32> to vector<1x286xf32>
    %239 = vector.broadcast %237 : vector<32x1xf32> to vector<32x286xf32>
    %240 = vector.broadcast %238 : vector<1x286xf32> to vector<32x286xf32>
    %241 = arith.mulf %239, %240 : vector<32x286xf32>
    %242 = arith.addf %234, %241 : vector<32x286xf32>
    %c33 = arith.constant 33 : index
    %c0_69 = arith.constant 0 : index
    %c0_70 = arith.constant 0 : index
    %243 = vector.load %arg2[%c33, %c0_69, %c0_70] : memref<36x32x1xf32, #tpu.memory_space<vmem>>, vector<1x32x1xf32>
    %244 = vector.shape_cast %243 : vector<1x32x1xf32> to vector<32x1xf32>
    %245 = vector.extract_strided_slice %235 {offsets = [1, 0], sizes = [1, 286], strides = [1, 1]} : vector<4x286xf32> to vector<1x286xf32>
    %246 = vector.broadcast %244 : vector<32x1xf32> to vector<32x286xf32>
    %247 = vector.broadcast %245 : vector<1x286xf32> to vector<32x286xf32>
    %248 = arith.mulf %246, %247 : vector<32x286xf32>
    %249 = arith.addf %242, %248 : vector<32x286xf32>
    %c34 = arith.constant 34 : index
    %c0_71 = arith.constant 0 : index
    %c0_72 = arith.constant 0 : index
    %250 = vector.load %arg2[%c34, %c0_71, %c0_72] : memref<36x32x1xf32, #tpu.memory_space<vmem>>, vector<1x32x1xf32>
    %251 = vector.shape_cast %250 : vector<1x32x1xf32> to vector<32x1xf32>
    %252 = vector.extract_strided_slice %235 {offsets = [2, 0], sizes = [1, 286], strides = [1, 1]} : vector<4x286xf32> to vector<1x286xf32>
    %253 = vector.broadcast %251 : vector<32x1xf32> to vector<32x286xf32>
    %254 = vector.broadcast %252 : vector<1x286xf32> to vector<32x286xf32>
    %255 = arith.mulf %253, %254 : vector<32x286xf32>
    %256 = arith.addf %249, %255 : vector<32x286xf32>
    %c35 = arith.constant 35 : index
    %c0_73 = arith.constant 0 : index
    %c0_74 = arith.constant 0 : index
    %257 = vector.load %arg2[%c35, %c0_73, %c0_74] : memref<36x32x1xf32, #tpu.memory_space<vmem>>, vector<1x32x1xf32>
    %258 = vector.shape_cast %257 : vector<1x32x1xf32> to vector<32x1xf32>
    %259 = vector.extract_strided_slice %235 {offsets = [3, 0], sizes = [1, 286], strides = [1, 1]} : vector<4x286xf32> to vector<1x286xf32>
    %260 = vector.broadcast %258 : vector<32x1xf32> to vector<32x286xf32>
    %261 = vector.broadcast %259 : vector<1x286xf32> to vector<32x286xf32>
    %262 = arith.mulf %260, %261 : vector<32x286xf32>
    %263 = arith.addf %256, %262 : vector<32x286xf32>
    %264 = vector.extract_strided_slice %263 {offsets = [0, 0], sizes = [8, 286], strides = [1, 1]} : vector<32x286xf32> to vector<8x286xf32>
    %265 = vector.extract_strided_slice %263 {offsets = [8, 0], sizes = [8, 286], strides = [1, 1]} : vector<32x286xf32> to vector<8x286xf32>
    %266 = arith.maximumf %264, %265 : vector<8x286xf32>
    %267 = vector.extract_strided_slice %263 {offsets = [16, 0], sizes = [8, 286], strides = [1, 1]} : vector<32x286xf32> to vector<8x286xf32>
    %268 = arith.maximumf %266, %267 : vector<8x286xf32>
    %269 = vector.extract_strided_slice %263 {offsets = [24, 0], sizes = [8, 286], strides = [1, 1]} : vector<32x286xf32> to vector<8x286xf32>
    %270 = arith.maximumf %268, %269 : vector<8x286xf32>
    %c0_75 = arith.constant 0 : index
    %c0_76 = arith.constant 0 : index
    %271 = vector.load %arg3[%c0_75, %c0_76] : memref<8x1xf32, #tpu.memory_space<vmem>>, vector<8x1xf32>
    %272 = vector.broadcast %271 : vector<8x1xf32> to vector<8x286xf32>
    %273 = arith.addf %270, %272 : vector<8x286xf32>
    %cst_77 = arith.constant -1.000000e+00 : f32
    %cst_78 = arith.constant 1.000000e+00 : f32
    %274 = vector.broadcast %cst_77 : f32 to vector<8x286xf32>
    %275 = arith.maximumf %274, %273 : vector<8x286xf32>
    %276 = vector.broadcast %cst_78 : f32 to vector<8x286xf32>
    %277 = arith.minimumf %276, %275 : vector<8x286xf32>
    %c0_79 = arith.constant 0 : index
    %c0_80 = arith.constant 0 : index
    %278 = vector.load %arg4[%c0_79, %c0_80] : memref<1x286xf32, #tpu.memory_space<vmem>>, vector<1x286xf32>
    %279 = vector.broadcast %278 : vector<1x286xf32> to vector<8x286xf32>
    %280 = arith.mulf %277, %279 : vector<8x286xf32>
    %cst_81 = arith.constant dense<0.000000e+00> : vector<8xf32>
    %281 = vector.multi_reduction <add>, %280, %cst_81 [1] : vector<8x286xf32> to vector<8xf32>
    %282 = vector.shape_cast %281 : vector<8xf32> to vector<8x1xf32>
    %cst_82 = arith.constant 3.906250e-03 : f32
    %283 = vector.broadcast %cst_82 : f32 to vector<8x1xf32>
    %284 = arith.mulf %282, %283 : vector<8x1xf32>
    %285 = math.tanh %284 : vector<8x1xf32>
    %286 = vector.shape_cast %285 : vector<8x1xf32> to vector<1x8x1xf32>
    %c0_83 = arith.constant 0 : index
    %c0_84 = arith.constant 0 : index
    %c0_85 = arith.constant 0 : index
    %287 = vector.load %arg5[%c0_83, %c0_84, %c0_85] : memref<1x8x1xf32, #tpu.memory_space<vmem>>, vector<1x8x1xf32>
    tpu.vector_store %arg5[%c0_83, %c0_84, %c0_85], %286 {strides = array<i32>} : memref<1x8x1xf32, #tpu.memory_space<vmem>>, vector<1x8x1xf32>,
    return
  }
  func.func @transform_0(%arg0: i32) -> (i32, i32, i32) {
    %c0_i32 = arith.constant 0 : i32
    %c0_i32_0 = arith.constant 0 : i32
    %c0_i32_1 = arith.constant 0 : i32
    return %arg0, %c0_i32, %c0_i32_0 : i32, i32, i32
  }
  func.func @transform_1(%arg0: i32) -> (i32, i32, i32) {
    %c0_i32 = arith.constant 0 : i32
    %c0_i32_0 = arith.constant 0 : i32
    %c0_i32_1 = arith.constant 0 : i32
    %c0_i32_2 = arith.constant 0 : i32
    return %c0_i32, %c0_i32_0, %c0_i32_1 : i32, i32, i32
  }
  func.func @transform_2(%arg0: i32) -> (i32, i32) {
    %c0_i32 = arith.constant 0 : i32
    %c0_i32_0 = arith.constant 0 : i32
    %c0_i32_1 = arith.constant 0 : i32
    return %c0_i32, %c0_i32_0 : i32, i32
  }
  func.func @transform_3(%arg0: i32) -> (i32, i32) {
    %c0_i32 = arith.constant 0 : i32
    %c0_i32_0 = arith.constant 0 : i32
    %c0_i32_1 = arith.constant 0 : i32
    return %c0_i32, %c0_i32_0 : i32, i32
  }
  func.func @transform_4(%arg0: i32) -> (i32, i32, i32) {
    %c0_i32 = arith.constant 0 : i32
    %c0_i32_0 = arith.constant 0 : i32
    %c0_i32_1 = arith.constant 0 : i32
    return %arg0, %c0_i32, %c0_i32_0 : i32, i32, i32
  }
}

</mosaic_0001>

<bundles_post_ra>
// kernel: model_forward.1
= control target key start
LH: loop header
LB: loop body
LE: loop exit
PB: predicated region body
PF: predicated region fallthrough
CT: control target
= control target key end

     0   :  { %s4194_s15 = smov 0   ;;  %s7272_s0 = inlined_call_operand.vmem [shape: f32[2,4,324], index: 0, kind: input, shape index: {}]   ;;  %s7273_s1 = inlined_call_operand.vmem [shape: f32[36,32,1], index: 1, kind: input, shape index: {}]   ;;  %s7274_s2 = inlined_call_operand.vmem [shape: f32[8,1], index: 2, kind: input, shape index: {}]   ;;  %s7275_s3 = inlined_call_operand.vmem [shape: f32[1,286], index: 3, kind: input, shape index: {}]   ;;  %s7276_s4 = inlined_call_operand.vmem [shape: f32[2,8,1], index: 4, kind: output, shape index: {}]  }
   0x1 LB: > { %s3978_s16 = sadd.s32 4294967295, %s4158_s15   ;;  %p3982_p0 = scmp.ge.s32.totalorder %s4158_s15, 1  ;;  %s4158_s15 = sphi %s4194_s15, %s14_s15  }
   0x2   : > { %p162_p1 = scmp.lt.s32.totalorder %s4158_s15, 3 }
   0x4   : > { %p163_p2 = pnand %p3982_p0, %p162_p1 }
   0x6   : > { %166 = sbr.rel (%p163_p2) target bundleno = 4352 (0x1100), region = 36 }
   0xd   : > { %v200_v0 = vld [vmem:[%s7273_s1 + $0x10] sm:$0xff]  ;;  %v198_v1 = vld [vmem:[%s7273_s1] sm:$0xff]  ;;  %v4160_v2 = vmov 0   ;;  %v201_v3 = vld [vmem:[%s7273_s1 + $0x18] sm:$0xff]  ;;  %p187_p3 = scmp.lt.s32.totalorder %s3978_s16, 1  ;;  %v224_v11 = vlaneseq  ;;  %s4162_s22 = smov 126  }
   0xe   : > { %4149 = vset.pattern.permute.xlu1 %v4160_v2  ;;  %4148 = vset.pattern.permute.xlu0 %v4160_v2  ;;  %v199_v4 = vld [vmem:[%s7273_s1 + $0x8] sm:$0xff]  ;;  %v3985_v6 = vld [vmem:[%s7273_s1 + $0x20] sm:$0xff]  ;;  %v3988_v7 = vld [vmem:[%s7273_s1 + $0x38] sm:$0xff]  ;;  %vm3102_vm0 = vcmask 744448   ;;  %vm576_vm1 = vcmask 1039360   ;;  %vm997_vm2 = vcmask 1031168  }
   0xf   : > { %214 = vperm.xlu1 %4149, %v200_v0   ;;  %204 = vperm.xlu0 %4148, %v198_v1   ;;  %v3986_v5 = vld [vmem:[%s7273_s1 + $0x28] sm:$0xff]  ;;  %v3987_v8 = vld [vmem:[%s7273_s1 + $0x30] sm:$0xff]  ;;  %s8113_s16 = smov (!%p187_p3, %s3978_s16), 1  ;;  %v3989_v10 = vld [vmem:[%s7273_s1 + $0x40] sm:$0xff]  ;;  %v4241_v14 = vshrl.u32 %v224_v11, 7  ;;  %s4168_s6 = smov 90  }
  0x10   : > { %v3990_v9 = vld [vmem:[%s7273_s1 + $0x48] sm:$0xff]  ;;  %s4130_s11 = smul.u32 12, %s8113_s16  ;;  %v3992_v12 = vld [vmem:[%s7273_s1 + $0x58] sm:$0xff]  ;;  %v3991_v13 = vld [vmem:[%s7273_s1 + $0x50] sm:$0xff]  ;;  %vm1418_vm3 = vcmask 900096   ;;  %vm1839_vm4 = vcmask 891904  }
  0x11   : > { %v454_v15 = vsub.s32 3, %v4241_v14  ;;  %v458_v16 = vsub.s32 7, %v4241_v14  ;;  %v3994_v19 = vld [vmem:[%s7273_s1 + $0x68] sm:$0xff]  ;;  %v3993_v20 = vld [vmem:[%s7273_s1 + $0x60] sm:$0xff]  ;;  %v3996_v27 = vld [vmem:[%s7273_s1 + $0x78] sm:$0xff]  ;;  %v4346_v57 = vsub.s32 0, %v4241_v14 }
  0x12   : > { %s191_s20 = scalar_lea.vmem %s7272_s0, %s4130_s11  ;;  %v3995_v28 = vld [vmem:[%s7273_s1 + $0x70] sm:$0xff]  ;;  %v3998_v29 = vld [vmem:[%s7273_s1 + $0x88] sm:$0xff]  ;;  %v3997_v30 = vld [vmem:[%s7273_s1 + $0x80] sm:$0xff]  ;;  %v230_v58 = vsub.s32 4, %v4241_v14  ;;  %s4161_s11 = smov 127   ;;  %vm2260_vm5 = vcmask 883712  }
  0x13   : > { %219 = vperm.xlu1 %4149, %v201_v3   ;;  %209 = vperm.xlu0 %4148, %v199_v4   ;;  %v4248_v17 = vld [vmem:[%s191_s20] sm:$0xff]  ;;  %v4250_v18 = vld [vmem:[%s191_s20 + $0x8] sm:$0xf]  ;;  %v4000_v31 = vld [vmem:[%s7273_s1 + $0x98] sm:$0xff]  ;;  %7492 = vst [vmem:[#allocation2_spill] sm:$0xff] %v4346_v57  ;;  %vm2681_vm6 = vcmask 752640  }
  0x14   : > { %v455_v21 = vrot.slane %v4248_v17, %v454_v15  ;;  %v459_v22 = vrot.slane %v4248_v17, %v458_v16  ;;  %v463_v23 = vrot.slane %v4250_v18, %v454_v15  ;;  %v3999_v32 = vld [vmem:[%s7273_s1 + $0x90] sm:$0xff]  ;;  %v4002_v33 = vld [vmem:[%s7273_s1 + $0xa8] sm:$0xff]  ;;  %v4001_v34 = vld [vmem:[%s7273_s1 + $0xa0] sm:$0xff]  ;;  %v227_v61 = vrot.slane %v4248_v17, %v4346_v57  ;;  %s3984_s10 = sshll.u32 %s8113_s16, 3 }
  0x15   : > { %v4004_v35 = vld [vmem:[%s7273_s1 + $0xb8] sm:$0xff]  ;;  %v4003_v36 = vld [vmem:[%s7273_s1 + $0xb0] sm:$0xff]  ;;  %v4006_v37 = vld [vmem:[%s7273_s1 + $0xc8] sm:$0xff]  ;;  %v231_v62 = vrot.slane %v4248_v17, %v230_v58  ;;  %v235_v1 = vrot.slane %v4250_v18, %v4346_v57  ;;  %vm3523_vm7 = vcmask 736256   ;;  %vm3916_vm8 = vcmask 244736   ;;  %s195_s13 = scalar_lea.vmem %s7276_s4, %s3984_s10 }
  0x16   : > { %v4261_v24 = vrot.slane %v455_v21, %v454_v15  ;;  %v4263_v25 = vrot.slane %v459_v22, %v454_v15  ;;  %v4265_v26 = vrot.slane %v463_v23, %v454_v15  ;;  %v4005_v38 = vld [vmem:[%s7273_s1 + $0xc0] sm:$0xff]  ;;  %v4008_v39 = vld [vmem:[%s7273_s1 + $0xd8] sm:$0xff]  ;;  %v4007_v40 = vld [vmem:[%s7273_s1 + $0xd0] sm:$0xff]  ;;  %v4363_v2 = vrot.slane %v227_v61, %v4346_v57 }
  0x17   : > { %287 = vperm.xlu1 %4149, %v3986_v5   ;;  %282 = vperm.xlu0 %4148, %v3985_v6   ;;  %v4010_v41 = vld [vmem:[%s7273_s1 + $0xe8] sm:$0xff]  ;;  %v4009_v42 = vld [vmem:[%s7273_s1 + $0xe0] sm:$0xff]  ;;  %v4012_v43 = vld [vmem:[%s7273_s1 + $0xf8] sm:$0xff]  ;;  %v4366_v3 = vrot.slane %v231_v62, %v4346_v57  ;;  %v306_v21 = vsub.s32 5, %v4241_v14  ;;  %v4428_v62 = vsub.s32 2, %v4241_v14  ;;  %vm3923_vm9 = vcmask 7168  }
  0x18   : > { %v4011_v44 = vld [vmem:[%s7273_s1 + $0xf0] sm:$0xff]  ;;  %7493 = vst [vmem:[#allocation3_spill] sm:$0xff] %v4363_v2 }
  0x19   : > { %7494 = vst [vmem:[#allocation4_spill] sm:$0xff] %v4366_v3  ;;  %7500 = vst [vmem:[#allocation10_spill] sm:$0xff] %v4428_v62 }
  0x1b   : > { %297 = vperm.xlu1 %4149, %v3988_v7   ;;  %292 = vperm.xlu0 %4148, %v3987_v8   ;;  %v4371_v8 = vrot.slane %v235_v1, %v4346_v57  ;;  %v382_v1 = vsub.s32 6, %v4241_v14 }
  0x1d   : > { %7495 = vst [vmem:[#allocation5_spill] sm:$0xff] %v4371_v8 }
  0x1f   : > { %363 = vperm.xlu1 %4149, %v3990_v9   ;;  %358 = vperm.xlu0 %4148, %v3989_v10  }
  0x23   : > { %373 = vperm.xlu1 %4149, %v3992_v12   ;;  %368 = vperm.xlu0 %4148, %v3991_v13  }
  0x27   : > { %439 = vperm.xlu1 %4149, %v3994_v19   ;;  %434 = vperm.xlu0 %4148, %v3993_v20   ;;  %v4386_v20 = vsub.s32 1, %v4241_v14 }
  0x29   : > { %7496 = vst [vmem:[#allocation6_spill] sm:$0xff] %v4386_v20 }
  0x2b   : > { %449 = vperm.xlu1 %4149, %v3996_v27   ;;  %444 = vperm.xlu0 %4148, %v3995_v28   ;;  %v303_v27 = vrot.slane %v4248_v17, %v4386_v20  ;;  %v307_v28 = vrot.slane %v4248_v17, %v306_v21 }
  0x2f   : > { %515 = vperm.xlu1 %4149, %v3998_v29   ;;  %510 = vperm.xlu0 %4148, %v3997_v30  }
  0x33   : > { %525 = vperm.xlu1 %4149, %v4000_v31   ;;  %520 = vperm.xlu0 %4148, %v3999_v32   ;;  %v311_v32 = vrot.slane %v4250_v18, %v4386_v20 }
  0x37   : > { %621 = vperm.xlu1 %4149, %v4002_v33   ;;  %616 = vperm.xlu0 %4148, %v4001_v34   ;;  %v4403_v33 = vrot.slane %v303_v27, %v4386_v20  ;;  %v4406_v34 = vrot.slane %v307_v28, %v4386_v20 }
  0x39   : > { %7497 = vst [vmem:[#allocation7_spill] sm:$0xff] %v4403_v33  ;;  %7498 = vst [vmem:[#allocation8_spill] sm:$0xff] %v4406_v34 }
  0x3b   : > { %631 = vperm.xlu1 %4149, %v4004_v35   ;;  %626 = vperm.xlu0 %4148, %v4003_v36  }
  0x3f   : > { %726 = vperm.xlu1 %4149, %v4006_v37   ;;  %721 = vperm.xlu0 %4148, %v4005_v38   ;;  %v4413_v38 = vrot.slane %v311_v32, %v4386_v20 }
  0x41   : > { %7499 = vst [vmem:[#allocation9_spill] sm:$0xff] %v4413_v38 }
  0x43   : > { %736 = vperm.xlu1 %4149, %v4008_v39   ;;  %731 = vperm.xlu0 %4148, %v4007_v40  }
  0x47   : > { %831 = vperm.xlu1 %4149, %v4010_v41   ;;  %826 = vperm.xlu0 %4148, %v4009_v42  }
  0x4b   : > { %841 = vperm.xlu1 %4149, %v4012_v43   ;;  %836 = vperm.xlu0 %4148, %v4011_v44  }
  0x8e   : > { %v4321_v45 = vpop.permute.xlu1 %214  ;;  %v4323_v46 = vpop.permute.xlu0 %204 }
  0x92   : > { %v4325_v47 = vpop.permute.xlu1 %219  ;;  %v4327_v48 = vpop.permute.xlu0 %209 }
  0x96   : > { %v4329_v49 = vpop.permute.xlu1 %287  ;;  %v4331_v50 = vpop.permute.xlu0 %282 }
  0x9a   : > { %v4333_v51 = vpop.permute.xlu1 %297  ;;  %v4335_v52 = vpop.permute.xlu0 %292 }
  0x9e   : > { %v4337_v53 = vpop.permute.xlu1 %363  ;;  %v4339_v54 = vpop.permute.xlu0 %358 }
  0xa2   : > { %v4341_v55 = vpop.permute.xlu1 %373  ;;  %v4343_v56 = vpop.permute.xlu0 %368 }
  0xa6   : > { %v4349_v59 = vpop.permute.xlu1 %439  ;;  %v4351_v60 = vpop.permute.xlu0 %434 }
  0xaa   : > { %v4356_v63 = vpop.permute.xlu1 %449  ;;  %v4358_v0 = vpop.permute.xlu0 %444 }
  0xae   : > { %v511_v4 = vpop.permute.xlu0 %510  ;;  %v516_v7 = vpop.permute.xlu1 %515 }
  0xaf   : > { %v529_v5 = vmul.f32 %v511_v4, %v4366_v3  ;;  %v528_v6 = vmul.f32 %v511_v4, %v4363_v2  ;;  %v531_v9 = vmul.f32 %v516_v7, %v4363_v2  ;;  %v530_v10 = vmul.f32 %v511_v4, %v4371_v8 }
  0xb0   : > { %v533_v11 = vmul.f32 %v516_v7, %v4371_v8  ;;  %v532_v12 = vmul.f32 %v516_v7, %v4366_v3  ;;  %v383_v7 = vrot.slane %v4248_v17, %v382_v1 }
  0xb1   : > { %554 = vrot.lane.b32.xlu1 %v529_v5, %s4161_s11  ;;  %552 = vrot.lane.b32.xlu0 %v528_v6, %s4161_s11  ;;  %v379_v6 = vrot.slane %v4248_v17, %v4428_v62 }
  0xb2   : > { %v521_v13 = vpop.permute.xlu0 %520  ;;  %v526_v19 = vpop.permute.xlu1 %525 }
  0xb3   : > { %v535_v15 = vmul.f32 %v521_v13, %v4366_v3  ;;  %v534_v16 = vmul.f32 %v521_v13, %v4363_v2  ;;  %v537_v22 = vmul.f32 %v526_v19, %v4363_v2  ;;  %v536_v23 = vmul.f32 %v521_v13, %v4371_v8 }
  0xb4   : > { %v539_v29 = vmul.f32 %v526_v19, %v4371_v8  ;;  %v538_v30 = vmul.f32 %v526_v19, %v4366_v3  ;;  %v4448_v13 = vrot.slane %v383_v7, %v4428_v62 }
  0xb5   : > { %558 = vrot.lane.b32.xlu1 %v531_v9, %s4161_s11  ;;  %556 = vrot.lane.b32.xlu0 %v530_v10, %s4161_s11 }
  0xb6   : > { %v617_v31 = vpop.permute.xlu0 %616  ;;  %v622_v37 = vpop.permute.xlu1 %621 }
  0xb7   : > { %v635_v35 = vmul.f32 %v617_v31, %v4406_v34  ;;  %v634_v36 = vmul.f32 %v617_v31, %v4403_v33  ;;  %v637_v39 = vmul.f32 %v622_v37, %v4403_v33  ;;  %v636_v40 = vmul.f32 %v617_v31, %v4413_v38 }
  0xb8   : > { %v639_v41 = vmul.f32 %v622_v37, %v4413_v38  ;;  %v638_v42 = vmul.f32 %v622_v37, %v4406_v34 }
  0xb9   : > { %562 = vrot.lane.b32.xlu1 %v533_v11, %s4161_s11  ;;  %560 = vrot.lane.b32.xlu0 %v532_v12, %s4161_s11  ;;  %v387_v11 = vrot.slane %v4250_v18, %v4428_v62  ;;  %v4445_v12 = vrot.slane %v379_v6, %v4428_v62 }
  0xba   : > { %v627_v43 = vpop.permute.xlu0 %626  ;;  %v632_v61 = vpop.permute.xlu1 %631 }
  0xbb   : > { %v641_v44 = vmul.f32 %v627_v43, %v4406_v34  ;;  %v640_v58 = vmul.f32 %v627_v43, %v4403_v33  ;;  %v643_v4 = vmul.f32 %v632_v61, %v4403_v33  ;;  %v642_v5 = vmul.f32 %v627_v43, %v4413_v38 }
  0xbc   : > { %v645_v9 = vmul.f32 %v632_v61, %v4413_v38  ;;  %v644_v14 = vmul.f32 %v632_v61, %v4406_v34  ;;  %v4455_v19 = vrot.slane %v387_v11, %v4428_v62  ;;  %v4013_v11 = vld [vmem:[%s7273_s1 + $0x100] sm:$0xff] }
  0xbd   : > { %566 = vrot.lane.b32.xlu1 %v535_v15, %s4161_s11  ;;  %564 = vrot.lane.b32.xlu0 %v534_v16, %s4161_s11 }
  0xbe   : > { %v722_v10 = vpop.permute.xlu0 %721  ;;  %v727_v16 = vpop.permute.xlu1 %726 }
  0xbf   : > { %v740_v17 = vmul.f32 %v722_v10, %v4448_v13  ;;  %v739_v15 = vmul.f32 %v722_v10, %v4445_v12  ;;  %v742_v18 = vmul.f32 %v727_v16, %v4445_v12  ;;  %v741_v21 = vmul.f32 %v722_v10, %v4455_v19  ;;  %v4014_v10 = vld [vmem:[%s7273_s1 + $0x108] sm:$0xff] }
  0xc1   : > { %570 = vrot.lane.b32.xlu1 %v537_v22, %s4161_s11  ;;  %568 = vrot.lane.b32.xlu0 %v536_v23, %s4161_s11  ;;  %v744_v22 = vmul.f32 %v727_v16, %v4455_v19  ;;  %v743_v23 = vmul.f32 %v727_v16, %v4448_v13 }
  0xc2   : > { %v732_v27 = vpop.permute.xlu0 %731 }
  0xc3   : > { %v746_v28 = vmul.f32 %v732_v27, %v4448_v13  ;;  %v747_v32 = vmul.f32 %v732_v27, %v4455_v19 }
  0xc5   : > { %574 = vrot.lane.b32.xlu1 %v539_v29, %s4161_s11  ;;  %572 = vrot.lane.b32.xlu0 %v538_v30, %s4161_s11  ;;  %v745_v29 = vmul.f32 %v732_v27, %v4445_v12  ;;  %v737_v30 = vpop.permute.xlu1 %736 }
  0xc6   : > { %v748_v31 = vmul.f32 %v737_v30, %v4445_v12  ;;  %v827_v37 = vpop.permute.xlu0 %826 }
  0xc7   : > { %v846_v43 = vmul.f32 %v827_v37, %v4265_v26 }
  0xc9   : > { %660 = vrot.lane.b32.xlu1 %v635_v35, %s4161_s11  ;;  %658 = vrot.lane.b32.xlu0 %v634_v36, %s4161_s11  ;;  %v750_v35 = vmul.f32 %v737_v30, %v4455_v19  ;;  %v749_v36 = vmul.f32 %v737_v30, %v4448_v13 }
  0xca   : > { %v837_v61 = vpop.permute.xlu0 %836 }
  0xcb   : > { %v851_v1 = vmul.f32 %v837_v61, %v4263_v25  ;;  %v852_v7 = vmul.f32 %v837_v61, %v4265_v26 }
  0xcd   : > { %664 = vrot.lane.b32.xlu1 %v637_v39, %s4161_s11  ;;  %662 = vrot.lane.b32.xlu0 %v636_v40, %s4161_s11  ;;  %v845_v39 = vmul.f32 %v827_v37, %v4263_v25  ;;  %v844_v40 = vmul.f32 %v827_v37, %v4261_v24 }
  0xd1   : > { %668 = vrot.lane.b32.xlu1 %v639_v41, %s4161_s11  ;;  %666 = vrot.lane.b32.xlu0 %v638_v42, %s4161_s11  ;;  %v832_v41 = vpop.permute.xlu1 %831 }
  0xd2   : > { %v847_v42 = vmul.f32 %v832_v41, %v4261_v24 }
  0xd5   : > { %672 = vrot.lane.b32.xlu1 %v641_v44, %s4161_s11  ;;  %670 = vrot.lane.b32.xlu0 %v640_v58, %s4161_s11  ;;  %v849_v44 = vmul.f32 %v832_v41, %v4265_v26  ;;  %v848_v58 = vmul.f32 %v832_v41, %v4263_v25 }
  0xd9   : > { %676 = vrot.lane.b32.xlu1 %v643_v4, %s4161_s11  ;;  %674 = vrot.lane.b32.xlu0 %v642_v5, %s4161_s11  ;;  %v850_v4 = vmul.f32 %v837_v61, %v4261_v24  ;;  %v842_v5 = vpop.permute.xlu1 %841 }
  0xda   : > { %v853_v6 = vmul.f32 %v842_v5, %v4261_v24 }
  0xdd   : > { %680 = vrot.lane.b32.xlu1 %v645_v9, %s4161_s11  ;;  %678 = vrot.lane.b32.xlu0 %v644_v14, %s4161_s11  ;;  %v855_v9 = vmul.f32 %v842_v5, %v4265_v26  ;;  %v854_v14 = vmul.f32 %v842_v5, %v4263_v25 }
  0xe1   : > { %765 = vrot.lane.b32.xlu1 %v740_v17, %s4161_s11  ;;  %763 = vrot.lane.b32.xlu0 %v739_v15, %s4161_s11  ;;  %v4016_v17 = vld [vmem:[%s7273_s1 + $0x118] sm:$0xff]  ;;  %v4015_v15 = vld [vmem:[%s7273_s1 + $0x110] sm:$0xff] }
  0xe5   : > { %769 = vrot.lane.b32.xlu1 %v742_v18, %s4161_s11  ;;  %767 = vrot.lane.b32.xlu0 %v741_v21, %s4161_s11 }
  0xe9   : > { %773 = vrot.lane.b32.xlu1 %v744_v22, %s4161_s11  ;;  %771 = vrot.lane.b32.xlu0 %v743_v23, %s4161_s11 }
  0xed   : > { %777 = vrot.lane.b32.xlu1 %v746_v28, %s4161_s11  ;;  %775 = vrot.lane.b32.xlu0 %v745_v29, %s4161_s11 }
  0xf1   : > { %781 = vrot.lane.b32.xlu1 %v748_v31, %s4161_s11  ;;  %779 = vrot.lane.b32.xlu0 %v747_v32, %s4161_s11 }
  0xf5   : > { %785 = vrot.lane.b32.xlu1 %v750_v35, %s4161_s11  ;;  %783 = vrot.lane.b32.xlu0 %v749_v36, %s4161_s11 }
  0xf9   : > { %870 = vrot.lane.b32.xlu1 %v845_v39, %s4161_s11  ;;  %868 = vrot.lane.b32.xlu0 %v844_v40, %s4161_s11 }
  0xfd   : > { %874 = vrot.lane.b32.xlu1 %v847_v42, %s4161_s11  ;;  %872 = vrot.lane.b32.xlu0 %v846_v43, %s4161_s11 }
 0x101   : > { %878 = vrot.lane.b32.xlu1 %v849_v44, %s4161_s11  ;;  %876 = vrot.lane.b32.xlu0 %v848_v58, %s4161_s11 }
 0x105   : > { %882 = vrot.lane.b32.xlu1 %v851_v1, %s4161_s11  ;;  %880 = vrot.lane.b32.xlu0 %v850_v4, %s4161_s11 }
 0x109   : > { %886 = vrot.lane.b32.xlu1 %v853_v6, %s4161_s11  ;;  %884 = vrot.lane.b32.xlu0 %v852_v7, %s4161_s11 }
 0x10d   : > { %890 = vrot.lane.b32.xlu1 %v855_v9, %s4161_s11  ;;  %888 = vrot.lane.b32.xlu0 %v854_v14, %s4161_s11 }
 0x111   : > { %936 = vperm.xlu1 %4149, %v4014_v10   ;;  %931 = vperm.xlu0 %4148, %v4013_v11  }
 0x115   : > { %946 = vperm.xlu1 %4149, %v4016_v17   ;;  %941 = vperm.xlu0 %4148, %v4015_v15  }
 0x123   : > { %v4515_v16 = vpop.permute.xlu1 %554  ;;  %v4517_v18 = vpop.permute.xlu0 %552 }
 0x127   : > { %v4519_v21 = vpop.permute.xlu1 %558  ;;  %v4521_v22 = vpop.permute.xlu0 %556 }
 0x12b   : > { %v4523_v23 = vpop.permute.xlu1 %562  ;;  %v4525_v27 = vpop.permute.xlu0 %560 }
 0x12f   : > { %v4527_v28 = vpop.permute.xlu1 %566  ;;  %v4529_v29 = vpop.permute.xlu0 %564 }
 0x133   : > { %v4531_v30 = vpop.permute.xlu1 %570  ;;  %v4533_v31 = vpop.permute.xlu0 %568 }
 0x137   : > { %v4535_v32 = vpop.permute.xlu1 %574  ;;  %v4537_v35 = vpop.permute.xlu0 %572 }
 0x13b   : > { %v4539_v36 = vpop.permute.xlu1 %660  ;;  %v4541_v37 = vpop.permute.xlu0 %658 }
 0x13f   : > { %v4543_v39 = vpop.permute.xlu1 %664  ;;  %v4545_v40 = vpop.permute.xlu0 %662 }
 0x140   : > { %7501 = vst [vmem:[#allocation11_spill] sm:$0xff] %v4543_v39 }
 0x143   : > { %v4547_v41 = vpop.permute.xlu1 %668  ;;  %v4549_v42 = vpop.permute.xlu0 %666 }
 0x144   : > { %7502 = vst [vmem:[#allocation12_spill] sm:$0xff] %v4547_v41  ;;  %7503 = vst [vmem:[#allocation13_spill] sm:$0xff] %v4549_v42 }
 0x147   : > { %v4551_v43 = vpop.permute.xlu1 %672  ;;  %v4553_v44 = vpop.permute.xlu0 %670 }
 0x148   : > { %7504 = vst [vmem:[#allocation14_spill] sm:$0xff] %v4551_v43  ;;  %7505 = vst [vmem:[#allocation15_spill] sm:$0xff] %v4553_v44  ;;  %v328_v44 = vmul.f32 %v4406_v34, %v4331_v50 }
 0x14b   : > { %v4555_v58 = vpop.permute.xlu1 %676  ;;  %v4557_v61 = vpop.permute.xlu0 %674 }
 0x14c   : > { %7506 = vst [vmem:[#allocation16_spill] sm:$0xff] %v4555_v58  ;;  %7507 = vst [vmem:[#allocation17_spill] sm:$0xff] %v4557_v61  ;;  %v255_v58 = vmul.f32 %v4366_v3, %v4327_v48  ;;  %v262_v61 = vmul.f32 %v4371_v8, %v4325_v47 }
 0x14f   : > { %v4559_v1 = vpop.permute.xlu1 %680  ;;  %v4561_v4 = vpop.permute.xlu0 %678 }
 0x150   : > { %7508 = vst [vmem:[#allocation18_spill] sm:$0xff] %v4559_v1  ;;  %7509 = vst [vmem:[#allocation19_spill] sm:$0xff] %v4561_v4  ;;  %v254_v1 = vmul.f32 %v4363_v2, %v4327_v48  ;;  %v261_v4 = vmul.f32 %v4366_v3, %v4325_v47 }
 0x153   : > { %v4563_v5 = vpop.permute.xlu1 %765  ;;  %v4565_v6 = vpop.permute.xlu0 %763 }
 0x154   : > { %7510 = vst [vmem:[#allocation20_spill] sm:$0xff] %v4563_v5  ;;  %7511 = vst [vmem:[#allocation21_spill] sm:$0xff] %v4565_v6 }
 0x157   : > { %v4567_v7 = vpop.permute.xlu1 %769  ;;  %v4569_v9 = vpop.permute.xlu0 %767 }
 0x158   : > { %7512 = vst [vmem:[#allocation22_spill] sm:$0xff] %v4567_v7  ;;  %7513 = vst [vmem:[#allocation23_spill] sm:$0xff] %v4569_v9 }
 0x15b   : > { %v4571_v14 = vpop.permute.xlu1 %773  ;;  %v4573_v10 = vpop.permute.xlu0 %771 }
 0x15c   : > { %7514 = vst [vmem:[#allocation24_spill] sm:$0xff] %v4571_v14  ;;  %7515 = vst [vmem:[#allocation25_spill] sm:$0xff] %v4573_v10 }
 0x15f   : > { %v4575_v11 = vpop.permute.xlu1 %777  ;;  %v4577_v17 = vpop.permute.xlu0 %775 }
 0x160   : > { %7516 = vst [vmem:[#allocation26_spill] sm:$0xff] %v4575_v11  ;;  %7517 = vst [vmem:[#allocation27_spill] sm:$0xff] %v4577_v17 }
 0x163   : > { %v4579_v15 = vpop.permute.xlu0 %779  ;;  %v4581_v20 = vpop.permute.xlu1 %781 }
 0x164   : > { %7518 = vst [vmem:[#allocation28_spill] sm:$0xff] %v4579_v15  ;;  %7519 = vst [vmem:[#allocation29_spill] sm:$0xff] %v4581_v20 }
 0x167   : > { %v4583_v57 = vpop.permute.xlu0 %783  ;;  %v4585_v62 = vpop.permute.xlu1 %785 }
 0x168   : > { %7520 = vst [vmem:[#allocation30_spill] sm:$0xff] %v4583_v57  ;;  %7521 = vst [vmem:[#allocation31_spill] sm:$0xff] %v4585_v62 }
 0x16b   : > { %v4587_v6 = vpop.permute.xlu0 %868  ;;  %v4589_v7 = vpop.permute.xlu1 %870 }
 0x16c   : > { %7522 = vst [vmem:[#allocation32_spill] sm:$0xff] %v4587_v6  ;;  %7523 = vst [vmem:[#allocation33_spill] sm:$0xff] %v4589_v7 }
 0x16f   : > { %v4591_v9 = vpop.permute.xlu0 %872  ;;  %v4593_v14 = vpop.permute.xlu1 %874 }
 0x170   : > { %7524 = vst [vmem:[#allocation34_spill] sm:$0xff] %v4591_v9  ;;  %7525 = vst [vmem:[#allocation35_spill] sm:$0xff] %v4593_v14 }
 0x173   : > { %v4595_v10 = vpop.permute.xlu0 %876  ;;  %v4597_v11 = vpop.permute.xlu1 %878 }
 0x174   : > { %7526 = vst [vmem:[#allocation36_spill] sm:$0xff] %v4595_v10  ;;  %7527 = vst [vmem:[#allocation37_spill] sm:$0xff] %v4597_v11 }
 0x177   : > { %v4599_v17 = vpop.permute.xlu0 %880  ;;  %v4601_v15 = vpop.permute.xlu1 %882 }
 0x178   : > { %7528 = vst [vmem:[#allocation38_spill] sm:$0xff] %v4599_v17  ;;  %7529 = vst [vmem:[#allocation39_spill] sm:$0xff] %v4601_v15 }
 0x17b   : > { %v4603_v20 = vpop.permute.xlu0 %884  ;;  %v4605_v57 = vpop.permute.xlu1 %886 }
 0x17c   : > { %7530 = vst [vmem:[#allocation40_spill] sm:$0xff] %v4603_v20  ;;  %7531 = vst [vmem:[#allocation41_spill] sm:$0xff] %v4605_v57 }
 0x17f   : > { %v4607_v62 = vpop.permute.xlu0 %888  ;;  %v4609_v6 = vpop.permute.xlu1 %890 }
 0x180   : > { %7532 = vst [vmem:[#allocation42_spill] sm:$0xff] %v4607_v62  ;;  %7533 = vst [vmem:[#allocation43_spill] sm:$0xff] %v4609_v6 }
 0x190   : > { %v932_v7 = vpop.permute.xlu0 %931  ;;  %v937_v10 = vpop.permute.xlu1 %936 }
 0x191   : > { %v950_v9 = vmul.f32 %v932_v7, %v4366_v3  ;;  %v949_v14 = vmul.f32 %v932_v7, %v4363_v2  ;;  %v952_v17 = vmul.f32 %v937_v10, %v4363_v2  ;;  %v951_v20 = vmul.f32 %v932_v7, %v4371_v8 }
 0x192   : > { %v954_v6 = vmul.f32 %v937_v10, %v4371_v8  ;;  %v953_v57 = vmul.f32 %v937_v10, %v4366_v3  ;;  %v4018_v10 = vld [vmem:[%s7273_s1 + $0x128] sm:$0xff] }
 0x193   : > { %975 = vrot.lane.b32.xlu1 %v950_v9, %s4162_s22  ;;  %973 = vrot.lane.b32.xlu0 %v949_v14, %s4162_s22 }
 0x194   : > { %v942_v62 = vpop.permute.xlu0 %941  ;;  %v947_v15 = vpop.permute.xlu1 %946 }
 0x195   : > { %v956_v9 = vmul.f32 %v942_v62, %v4366_v3  ;;  %v955_v14 = vmul.f32 %v942_v62, %v4363_v2  ;;  %v957_v7 = vmul.f32 %v942_v62, %v4371_v8  ;;  %v4017_v62 = vld [vmem:[%s7273_s1 + $0x120] sm:$0xff] }
 0x197   : > { %979 = vrot.lane.b32.xlu1 %v952_v17, %s4162_s22  ;;  %977 = vrot.lane.b32.xlu0 %v951_v20, %s4162_s22  ;;  %v958_v20 = vmul.f32 %v947_v15, %v4363_v2  ;;  %v4020_v17 = vld [vmem:[%s7273_s1 + $0x138] sm:$0xff] }
 0x19b   : > { %983 = vrot.lane.b32.xlu1 %v954_v6, %s4162_s22  ;;  %981 = vrot.lane.b32.xlu0 %v953_v57, %s4162_s22  ;;  %v960_v6 = vmul.f32 %v947_v15, %v4371_v8  ;;  %v959_v57 = vmul.f32 %v947_v15, %v4366_v3  ;;  %v4019_v15 = vld [vmem:[%s7273_s1 + $0x130] sm:$0xff] }
 0x19f   : > { %987 = vrot.lane.b32.xlu1 %v956_v9, %s4162_s22  ;;  %985 = vrot.lane.b32.xlu0 %v955_v14, %s4162_s22 }
 0x1a3   : > { %991 = vrot.lane.b32.xlu1 %v958_v20, %s4162_s22  ;;  %989 = vrot.lane.b32.xlu0 %v957_v7, %s4162_s22 }
 0x1a7   : > { %995 = vrot.lane.b32.xlu1 %v960_v6, %s4162_s22  ;;  %993 = vrot.lane.b32.xlu0 %v959_v57, %s4162_s22 }
 0x1ab   : > { %1042 = vperm.xlu1 %4149, %v4018_v10   ;;  %1037 = vperm.xlu0 %4148, %v4017_v62  }
 0x1af   : > { %1052 = vperm.xlu1 %4149, %v4020_v17   ;;  %1047 = vperm.xlu0 %4148, %v4019_v15  }
 0x205   : > { %v4647_v9 = vpop.permute.xlu0 %973  ;;  %v4649_v14 = vpop.permute.xlu1 %975 }
 0x206   : > { %7534 = vst [vmem:[#allocation44_spill] sm:$0xff] %v4647_v9  ;;  %7535 = vst [vmem:[#allocation45_spill] sm:$0xff] %v4649_v14 }
 0x209   : > { %v4651_v20 = vpop.permute.xlu0 %977  ;;  %v4653_v7 = vpop.permute.xlu1 %979 }
 0x20a   : > { %7536 = vst [vmem:[#allocation46_spill] sm:$0xff] %v4651_v20  ;;  %7537 = vst [vmem:[#allocation47_spill] sm:$0xff] %v4653_v7 }
 0x20d   : > { %v4655_v6 = vpop.permute.xlu0 %981  ;;  %v4657_v57 = vpop.permute.xlu1 %983 }
 0x20e   : > { %7538 = vst [vmem:[#allocation48_spill] sm:$0xff] %v4655_v6  ;;  %7539 = vst [vmem:[#allocation49_spill] sm:$0xff] %v4657_v57 }
 0x211   : > { %v4659_v10 = vpop.permute.xlu0 %985  ;;  %v4661_v62 = vpop.permute.xlu1 %987 }
 0x212   : > { %7540 = vst [vmem:[#allocation50_spill] sm:$0xff] %v4659_v10  ;;  %7541 = vst [vmem:[#allocation51_spill] sm:$0xff] %v4661_v62 }
 0x215   : > { %v4663_v11 = vpop.permute.xlu0 %989  ;;  %v4665_v17 = vpop.permute.xlu1 %991 }
 0x216   : > { %7542 = vst [vmem:[#allocation52_spill] sm:$0xff] %v4663_v11  ;;  %7543 = vst [vmem:[#allocation53_spill] sm:$0xff] %v4665_v17 }
 0x219   : > { %v4667_v15 = vpop.permute.xlu0 %993  ;;  %v4669_v9 = vpop.permute.xlu1 %995 }
 0x21a   : > { %7544 = vst [vmem:[#allocation54_spill] sm:$0xff] %v4667_v15  ;;  %7545 = vst [vmem:[#allocation55_spill] sm:$0xff] %v4669_v9 }
 0x22a   : > { %v1038_v14 = vpop.permute.xlu0 %1037  ;;  %v1043_v6 = vpop.permute.xlu1 %1042 }
 0x22b   : > { %v1055_v20 = vmul.f32 %v1038_v14, %v4403_v33  ;;  %v1056_v7 = vmul.f32 %v1038_v14, %v4406_v34  ;;  %v1057_v10 = vmul.f32 %v1038_v14, %v4413_v38  ;;  %v1058_v11 = vmul.f32 %v1043_v6, %v4403_v33 }
 0x22c   : > { %v1059_v9 = vmul.f32 %v1043_v6, %v4406_v34  ;;  %v1060_v17 = vmul.f32 %v1043_v6, %v4413_v38 }
 0x22d   : > { %1079 = vrot.lane.b32.xlu0 %v1055_v20, %s4162_s22  ;;  %1081 = vrot.lane.b32.xlu1 %v1056_v7, %s4162_s22 }
 0x22e   : > { %v1048_v15 = vpop.permute.xlu0 %1047  ;;  %v1053_v14 = vpop.permute.xlu1 %1052 }
 0x22f   : > { %v1061_v20 = vmul.f32 %v1048_v15, %v4403_v33  ;;  %v1062_v7 = vmul.f32 %v1048_v15, %v4406_v34  ;;  %v1066_v6 = vmul.f32 %v1053_v14, %v4413_v38 }
 0x231   : > { %1083 = vrot.lane.b32.xlu0 %v1057_v10, %s4162_s22  ;;  %1085 = vrot.lane.b32.xlu1 %v1058_v11, %s4162_s22  ;;  %v1063_v11 = vmul.f32 %v1048_v15, %v4413_v38  ;;  %v1064_v10 = vmul.f32 %v1053_v14, %v4403_v33  ;;  %v4022_v15 = vld [vmem:[%s7273_s1 + $0x148] sm:$0xff] }
 0x235   : > { %1087 = vrot.lane.b32.xlu0 %v1059_v9, %s4162_s22  ;;  %1089 = vrot.lane.b32.xlu1 %v1060_v17, %s4162_s22  ;;  %v1065_v9 = vmul.f32 %v1053_v14, %v4406_v34  ;;  %v4021_v17 = vld [vmem:[%s7273_s1 + $0x140] sm:$0xff] }
 0x239   : > { %1091 = vrot.lane.b32.xlu0 %v1061_v20, %s4162_s22  ;;  %1093 = vrot.lane.b32.xlu1 %v1062_v7, %s4162_s22  ;;  %v4023_v20 = vld [vmem:[%s7273_s1 + $0x150] sm:$0xff]  ;;  %v4024_v7 = vld [vmem:[%s7273_s1 + $0x158] sm:$0xff] }
 0x23d   : > { %1095 = vrot.lane.b32.xlu0 %v1063_v11, %s4162_s22  ;;  %1097 = vrot.lane.b32.xlu1 %v1064_v10, %s4162_s22 }
 0x241   : > { %1099 = vrot.lane.b32.xlu0 %v1065_v9, %s4162_s22  ;;  %1101 = vrot.lane.b32.xlu1 %v1066_v6, %s4162_s22 }
 0x245   : > { %1142 = vperm.xlu0 %4148, %v4021_v17   ;;  %1147 = vperm.xlu1 %4149, %v4022_v15  }
 0x249   : > { %1152 = vperm.xlu0 %4148, %v4023_v20   ;;  %1157 = vperm.xlu1 %4149, %v4024_v7  }
 0x29f   : > { %v4707_v14 = vpop.permute.xlu0 %1079  ;;  %v4709_v11 = vpop.permute.xlu1 %1081 }
 0x2a0   : > { %7546 = vst [vmem:[#allocation56_spill] sm:$0xff] %v4707_v14  ;;  %7547 = vst [vmem:[#allocation57_spill] sm:$0xff] %v4709_v11 }
 0x2a3   : > { %v4711_v10 = vpop.permute.xlu0 %1083  ;;  %v4713_v9 = vpop.permute.xlu1 %1085 }
 0x2a4   : > { %7548 = vst [vmem:[#allocation58_spill] sm:$0xff] %v4711_v10  ;;  %7549 = vst [vmem:[#allocation59_spill] sm:$0xff] %v4713_v9 }
 0x2a7   : > { %v4715_v6 = vpop.permute.xlu0 %1087  ;;  %v4717_v17 = vpop.permute.xlu1 %1089 }
 0x2a8   : > { %7550 = vst [vmem:[#allocation60_spill] sm:$0xff] %v4715_v6  ;;  %7551 = vst [vmem:[#allocation61_spill] sm:$0xff] %v4717_v17 }
 0x2ab   : > { %v4719_v15 = vpop.permute.xlu0 %1091  ;;  %v4721_v62 = vpop.permute.xlu1 %1093 }
 0x2ac   : > { %7552 = vst [vmem:[#allocation62_spill] sm:$0xff] %v4719_v15  ;;  %7553 = vst [vmem:[#allocation63_spill] sm:$0xff] %v4721_v62 }
 0x2af   : > { %v4723_v57 = vpop.permute.xlu0 %1095  ;;  %v4725_v20 = vpop.permute.xlu1 %1097 }
 0x2b0   : > { %7554 = vst [vmem:[#allocation64_spill] sm:$0xff] %v4723_v57  ;;  %7555 = vst [vmem:[#allocation65_spill] sm:$0xff] %v4725_v20 }
 0x2b3   : > { %v4727_v7 = vpop.permute.xlu0 %1099  ;;  %v4729_v14 = vpop.permute.xlu1 %1101 }
 0x2b4   : > { %7556 = vst [vmem:[#allocation66_spill] sm:$0xff] %v4727_v7  ;;  %7557 = vst [vmem:[#allocation67_spill] sm:$0xff] %v4729_v14 }
 0x2c4   : > { %v1143_v11 = vpop.permute.xlu0 %1142  ;;  %v1148_v6 = vpop.permute.xlu1 %1147 }
 0x2c5   : > { %v1160_v10 = vmul.f32 %v1143_v11, %v4445_v12  ;;  %v1161_v9 = vmul.f32 %v1143_v11, %v4448_v13  ;;  %v1163_v15 = vmul.f32 %v1148_v6, %v4445_v12  ;;  %v1162_v57 = vmul.f32 %v1143_v11, %v4455_v19 }
 0x2c6   : > { %v1164_v14 = vmul.f32 %v1148_v6, %v4448_v13  ;;  %v1165_v20 = vmul.f32 %v1148_v6, %v4455_v19 }
 0x2c7   : > { %1186 = vrot.lane.b32.xlu1 %v1161_v9, %s4162_s22  ;;  %1184 = vrot.lane.b32.xlu0 %v1160_v10, %s4162_s22 }
 0x2c8   : > { %v1153_v7 = vpop.permute.xlu0 %1152  ;;  %v1158_v62 = vpop.permute.xlu1 %1157 }
 0x2c9   : > { %v1166_v9 = vmul.f32 %v1153_v7, %v4445_v12  ;;  %v1167_v10 = vmul.f32 %v1153_v7, %v4448_v13  ;;  %v1168_v11 = vmul.f32 %v1153_v7, %v4455_v19  ;;  %v1170_v6 = vmul.f32 %v1158_v62, %v4448_v13  ;;  %v4028_v7 = vld [vmem:[%s7273_s1 + $0x178] sm:$0xff] }
 0x2cb   : > { %1190 = vrot.lane.b32.xlu1 %v1163_v15, %s4162_s22  ;;  %1188 = vrot.lane.b32.xlu0 %v1162_v57, %s4162_s22  ;;  %v1169_v57 = vmul.f32 %v1158_v62, %v4445_v12  ;;  %v4026_v15 = vld [vmem:[%s7273_s1 + $0x168] sm:$0xff] }
 0x2cf   : > { %1194 = vrot.lane.b32.xlu1 %v1165_v20, %s4162_s22  ;;  %1192 = vrot.lane.b32.xlu0 %v1164_v14, %s4162_s22  ;;  %v1171_v14 = vmul.f32 %v1158_v62, %v4455_v19  ;;  %v4025_v20 = vld [vmem:[%s7273_s1 + $0x160] sm:$0xff]  ;;  %v4027_v62 = vld [vmem:[%s7273_s1 + $0x170] sm:$0xff] }
 0x2d3   : > { %1198 = vrot.lane.b32.xlu1 %v1167_v10, %s4162_s22  ;;  %1196 = vrot.lane.b32.xlu0 %v1166_v9, %s4162_s22 }
 0x2d7   : > { %1202 = vrot.lane.b32.xlu1 %v1169_v57, %s4162_s22  ;;  %1200 = vrot.lane.b32.xlu0 %v1168_v11, %s4162_s22 }
 0x2db   : > { %1206 = vrot.lane.b32.xlu1 %v1171_v14, %s4162_s22  ;;  %1204 = vrot.lane.b32.xlu0 %v1170_v6, %s4162_s22 }
 0x2df   : > { %1252 = vperm.xlu1 %4149, %v4026_v15   ;;  %1247 = vperm.xlu0 %4148, %v4025_v20  }
 0x2e3   : > { %1262 = vperm.xlu1 %4149, %v4028_v7   ;;  %1257 = vperm.xlu0 %4148, %v4027_v62  }
 0x339   : > { %v4767_v9 = vpop.permute.xlu0 %1184  ;;  %v4769_v10 = vpop.permute.xlu1 %1186 }
 0x33a   : > { %7558 = vst [vmem:[#allocation68_spill] sm:$0xff] %v4767_v9  ;;  %7559 = vst [vmem:[#allocation69_spill] sm:$0xff] %v4769_v10 }
 0x33d   : > { %v4771_v57 = vpop.permute.xlu0 %1188  ;;  %v4773_v11 = vpop.permute.xlu1 %1190 }
 0x33e   : > { %7560 = vst [vmem:[#allocation70_spill] sm:$0xff] %v4771_v57  ;;  %7561 = vst [vmem:[#allocation71_spill] sm:$0xff] %v4773_v11 }
 0x341   : > { %v4775_v6 = vpop.permute.xlu0 %1192  ;;  %v4777_v14 = vpop.permute.xlu1 %1194 }
 0x342   : > { %7562 = vst [vmem:[#allocation72_spill] sm:$0xff] %v4775_v6  ;;  %7563 = vst [vmem:[#allocation73_spill] sm:$0xff] %v4777_v14 }
 0x345   : > { %v4779_v15 = vpop.permute.xlu0 %1196  ;;  %v4781_v20 = vpop.permute.xlu1 %1198 }
 0x346   : > { %7564 = vst [vmem:[#allocation74_spill] sm:$0xff] %v4779_v15  ;;  %7565 = vst [vmem:[#allocation75_spill] sm:$0xff] %v4781_v20 }
 0x349   : > { %v4783_v17 = vpop.permute.xlu0 %1200  ;;  %v4785_v7 = vpop.permute.xlu1 %1202 }
 0x34a   : > { %7566 = vst [vmem:[#allocation76_spill] sm:$0xff] %v4783_v17  ;;  %7567 = vst [vmem:[#allocation77_spill] sm:$0xff] %v4785_v7 }
 0x34d   : > { %v4787_v62 = vpop.permute.xlu0 %1204  ;;  %v4789_v9 = vpop.permute.xlu1 %1206 }
 0x34e   : > { %7568 = vst [vmem:[#allocation78_spill] sm:$0xff] %v4787_v62  ;;  %7569 = vst [vmem:[#allocation79_spill] sm:$0xff] %v4789_v9 }
 0x35e   : > { %v1248_v10 = vpop.permute.xlu0 %1247  ;;  %v1253_v6 = vpop.permute.xlu1 %1252 }
 0x35f   : > { %v1265_v57 = vmul.f32 %v1248_v10, %v4261_v24  ;;  %v1266_v11 = vmul.f32 %v1248_v10, %v4263_v25  ;;  %v1267_v15 = vmul.f32 %v1248_v10, %v4265_v26  ;;  %v1268_v17 = vmul.f32 %v1253_v6, %v4261_v24 }
 0x360   : > { %v1269_v9 = vmul.f32 %v1253_v6, %v4263_v25  ;;  %v1270_v7 = vmul.f32 %v1253_v6, %v4265_v26 }
 0x361   : > { %1289 = vrot.lane.b32.xlu0 %v1265_v57, %s4162_s22  ;;  %1291 = vrot.lane.b32.xlu1 %v1266_v11, %s4162_s22 }
 0x362   : > { %v1258_v62 = vpop.permute.xlu0 %1257  ;;  %v1263_v10 = vpop.permute.xlu1 %1262 }
 0x363   : > { %v1271_v57 = vmul.f32 %v1258_v62, %v4261_v24  ;;  %v1272_v11 = vmul.f32 %v1258_v62, %v4263_v25  ;;  %v1276_v6 = vmul.f32 %v1263_v10, %v4265_v26 }
 0x365   : > { %1293 = vrot.lane.b32.xlu0 %v1267_v15, %s4162_s22  ;;  %1295 = vrot.lane.b32.xlu1 %v1268_v17, %s4162_s22  ;;  %v1273_v17 = vmul.f32 %v1258_v62, %v4265_v26  ;;  %v1274_v15 = vmul.f32 %v1263_v10, %v4261_v24  ;;  %v4030_v62 = vld [vmem:[%s7273_s1 + $0x188] sm:$0xff] }
 0x369   : > { %1297 = vrot.lane.b32.xlu0 %v1269_v9, %s4162_s22  ;;  %1299 = vrot.lane.b32.xlu1 %v1270_v7, %s4162_s22  ;;  %v1275_v9 = vmul.f32 %v1263_v10, %v4263_v25  ;;  %v4029_v7 = vld [vmem:[%s7273_s1 + $0x180] sm:$0xff] }
 0x36d   : > { %1301 = vrot.lane.b32.xlu0 %v1271_v57, %s4162_s22  ;;  %1303 = vrot.lane.b32.xlu1 %v1272_v11, %s4162_s22  ;;  %v4031_v57 = vld [vmem:[%s7273_s1 + $0x190] sm:$0xff]  ;;  %v4032_v11 = vld [vmem:[%s7273_s1 + $0x198] sm:$0xff] }
 0x371   : > { %1305 = vrot.lane.b32.xlu0 %v1273_v17, %s4162_s22  ;;  %1307 = vrot.lane.b32.xlu1 %v1274_v15, %s4162_s22 }
 0x375   : > { %1309 = vrot.lane.b32.xlu0 %v1275_v9, %s4162_s22  ;;  %1311 = vrot.lane.b32.xlu1 %v1276_v6, %s4162_s22  ;;  %s4163_s22 = smov 110  }
 0x379   : > { %1352 = vperm.xlu0 %4148, %v4029_v7   ;;  %1357 = vperm.xlu1 %4149, %v4030_v62  }
 0x37d   : > { %1362 = vperm.xlu0 %4148, %v4031_v57   ;;  %1367 = vperm.xlu1 %4149, %v4032_v11  }
 0x3d3   : > { %v4827_v10 = vpop.permute.xlu0 %1289  ;;  %v4829_v17 = vpop.permute.xlu1 %1291 }
 0x3d4   : > { %7570 = vst [vmem:[#allocation80_spill] sm:$0xff] %v4827_v10  ;;  %7571 = vst [vmem:[#allocation81_spill] sm:$0xff] %v4829_v17 }
 0x3d7   : > { %v4831_v15 = vpop.permute.xlu0 %1293  ;;  %v4833_v9 = vpop.permute.xlu1 %1295 }
 0x3d8   : > { %7572 = vst [vmem:[#allocation82_spill] sm:$0xff] %v4831_v15  ;;  %7573 = vst [vmem:[#allocation83_spill] sm:$0xff] %v4833_v9 }
 0x3db   : > { %v4835_v6 = vpop.permute.xlu0 %1297  ;;  %v4837_v7 = vpop.permute.xlu1 %1299 }
 0x3dc   : > { %7574 = vst [vmem:[#allocation84_spill] sm:$0xff] %v4835_v6  ;;  %7575 = vst [vmem:[#allocation85_spill] sm:$0xff] %v4837_v7 }
 0x3df   : > { %v4839_v62 = vpop.permute.xlu0 %1301  ;;  %v4841_v20 = vpop.permute.xlu1 %1303 }
 0x3e0   : > { %7576 = vst [vmem:[#allocation86_spill] sm:$0xff] %v4839_v62  ;;  %7577 = vst [vmem:[#allocation87_spill] sm:$0xff] %v4841_v20 }
 0x3e3   : > { %v4843_v14 = vpop.permute.xlu0 %1305  ;;  %v4845_v57 = vpop.permute.xlu1 %1307 }
 0x3e4   : > { %7578 = vst [vmem:[#allocation88_spill] sm:$0xff] %v4843_v14  ;;  %7579 = vst [vmem:[#allocation89_spill] sm:$0xff] %v4845_v57 }
 0x3e7   : > { %v4847_v11 = vpop.permute.xlu0 %1309  ;;  %v4849_v10 = vpop.permute.xlu1 %1311 }
 0x3e8   : > { %7580 = vst [vmem:[#allocation90_spill] sm:$0xff] %v4847_v11  ;;  %7581 = vst [vmem:[#allocation91_spill] sm:$0xff] %v4849_v10 }
 0x3f8   : > { %v1353_v17 = vpop.permute.xlu0 %1352  ;;  %v1358_v6 = vpop.permute.xlu1 %1357 }
 0x3f9   : > { %v1370_v15 = vmul.f32 %v1353_v17, %v4363_v2  ;;  %v1371_v9 = vmul.f32 %v1353_v17, %v4366_v3  ;;  %v1373_v62 = vmul.f32 %v1358_v6, %v4363_v2  ;;  %v1372_v14 = vmul.f32 %v1353_v17, %v4371_v8 }
 0x3fa   : > { %v1374_v10 = vmul.f32 %v1358_v6, %v4366_v3  ;;  %v1375_v57 = vmul.f32 %v1358_v6, %v4371_v8 }
 0x3fb   : > { %1396 = vrot.lane.b32.xlu1 %v1371_v9, %s4163_s22  ;;  %1394 = vrot.lane.b32.xlu0 %v1370_v15, %s4163_s22 }
 0x3fc   : > { %v1363_v11 = vpop.permute.xlu0 %1362  ;;  %v1368_v20 = vpop.permute.xlu1 %1367 }
 0x3fd   : > { %v1376_v9 = vmul.f32 %v1363_v11, %v4363_v2  ;;  %v1377_v15 = vmul.f32 %v1363_v11, %v4366_v3  ;;  %v1378_v17 = vmul.f32 %v1363_v11, %v4371_v8  ;;  %v1380_v6 = vmul.f32 %v1368_v20, %v4366_v3  ;;  %v4036_v11 = vld [vmem:[%s7273_s1 + $0x1b8] sm:$0xff] }
 0x3ff   : > { %1400 = vrot.lane.b32.xlu1 %v1373_v62, %s4163_s22  ;;  %1398 = vrot.lane.b32.xlu0 %v1372_v14, %s4163_s22  ;;  %v1379_v14 = vmul.f32 %v1368_v20, %v4363_v2  ;;  %v4034_v62 = vld [vmem:[%s7273_s1 + $0x1a8] sm:$0xff] }
 0x403   : > { %1404 = vrot.lane.b32.xlu1 %v1375_v57, %s4163_s22  ;;  %1402 = vrot.lane.b32.xlu0 %v1374_v10, %s4163_s22  ;;  %v1381_v10 = vmul.f32 %v1368_v20, %v4371_v8  ;;  %v4033_v57 = vld [vmem:[%s7273_s1 + $0x1a0] sm:$0xff]  ;;  %v4035_v20 = vld [vmem:[%s7273_s1 + $0x1b0] sm:$0xff] }
 0x407   : > { %1408 = vrot.lane.b32.xlu1 %v1377_v15, %s4163_s22  ;;  %1406 = vrot.lane.b32.xlu0 %v1376_v9, %s4163_s22 }
 0x40b   : > { %1412 = vrot.lane.b32.xlu1 %v1379_v14, %s4163_s22  ;;  %1410 = vrot.lane.b32.xlu0 %v1378_v17, %s4163_s22 }
 0x40f   : > { %1416 = vrot.lane.b32.xlu1 %v1381_v10, %s4163_s22  ;;  %1414 = vrot.lane.b32.xlu0 %v1380_v6, %s4163_s22 }
 0x413   : > { %1463 = vperm.xlu1 %4149, %v4034_v62   ;;  %1458 = vperm.xlu0 %4148, %v4033_v57  }
 0x417   : > { %1473 = vperm.xlu1 %4149, %v4036_v11   ;;  %1468 = vperm.xlu0 %4148, %v4035_v20  }
 0x46d   : > { %v4887_v9 = vpop.permute.xlu0 %1394  ;;  %v4889_v15 = vpop.permute.xlu1 %1396 }
 0x46e   : > { %7582 = vst [vmem:[#allocation92_spill] sm:$0xff] %v4887_v9  ;;  %7583 = vst [vmem:[#allocation93_spill] sm:$0xff] %v4889_v15 }
 0x471   : > { %v4891_v14 = vpop.permute.xlu0 %1398  ;;  %v4893_v17 = vpop.permute.xlu1 %1400 }
 0x472   : > { %7584 = vst [vmem:[#allocation94_spill] sm:$0xff] %v4891_v14  ;;  %7585 = vst [vmem:[#allocation95_spill] sm:$0xff] %v4893_v17 }
 0x475   : > { %v4895_v6 = vpop.permute.xlu0 %1402  ;;  %v4897_v10 = vpop.permute.xlu1 %1404 }
 0x476   : > { %7586 = vst [vmem:[#allocation96_spill] sm:$0xff] %v4895_v6  ;;  %7587 = vst [vmem:[#allocation97_spill] sm:$0xff] %v4897_v10 }
 0x479   : > { %v4899_v62 = vpop.permute.xlu0 %1406  ;;  %v4901_v57 = vpop.permute.xlu1 %1408 }
 0x47a   : > { %7588 = vst [vmem:[#allocation98_spill] sm:$0xff] %v4899_v62  ;;  %7589 = vst [vmem:[#allocation99_spill] sm:$0xff] %v4901_v57 }
 0x47d   : > { %v4903_v7 = vpop.permute.xlu0 %1410  ;;  %v4905_v11 = vpop.permute.xlu1 %1412 }
 0x47e   : > { %7590 = vst [vmem:[#allocation100_spill] sm:$0xff] %v4903_v7  ;;  %7591 = vst [vmem:[#allocation101_spill] sm:$0xff] %v4905_v11 }
 0x481   : > { %v4907_v20 = vpop.permute.xlu0 %1414  ;;  %v4909_v9 = vpop.permute.xlu1 %1416 }
 0x482   : > { %7592 = vst [vmem:[#allocation102_spill] sm:$0xff] %v4907_v20  ;;  %7593 = vst [vmem:[#allocation103_spill] sm:$0xff] %v4909_v9 }
 0x492   : > { %v1459_v15 = vpop.permute.xlu0 %1458  ;;  %v1464_v6 = vpop.permute.xlu1 %1463 }
 0x493   : > { %v1476_v14 = vmul.f32 %v1459_v15, %v4403_v33  ;;  %v1477_v17 = vmul.f32 %v1459_v15, %v4406_v34  ;;  %v1478_v62 = vmul.f32 %v1459_v15, %v4413_v38  ;;  %v1479_v7 = vmul.f32 %v1464_v6, %v4403_v33 }
 0x494   : > { %v1480_v9 = vmul.f32 %v1464_v6, %v4406_v34  ;;  %v1481_v11 = vmul.f32 %v1464_v6, %v4413_v38 }
 0x495   : > { %1500 = vrot.lane.b32.xlu0 %v1476_v14, %s4163_s22  ;;  %1502 = vrot.lane.b32.xlu1 %v1477_v17, %s4163_s22 }
 0x496   : > { %v1469_v20 = vpop.permute.xlu0 %1468  ;;  %v1474_v15 = vpop.permute.xlu1 %1473 }
 0x497   : > { %v1482_v14 = vmul.f32 %v1469_v20, %v4403_v33  ;;  %v1483_v17 = vmul.f32 %v1469_v20, %v4406_v34  ;;  %v1487_v6 = vmul.f32 %v1474_v15, %v4413_v38 }
 0x499   : > { %1504 = vrot.lane.b32.xlu0 %v1478_v62, %s4163_s22  ;;  %1506 = vrot.lane.b32.xlu1 %v1479_v7, %s4163_s22  ;;  %v1484_v7 = vmul.f32 %v1469_v20, %v4413_v38  ;;  %v1485_v62 = vmul.f32 %v1474_v15, %v4403_v33  ;;  %v4038_v20 = vld [vmem:[%s7273_s1 + $0x1c8] sm:$0xff] }
 0x49d   : > { %1508 = vrot.lane.b32.xlu0 %v1480_v9, %s4163_s22  ;;  %1510 = vrot.lane.b32.xlu1 %v1481_v11, %s4163_s22  ;;  %v1486_v9 = vmul.f32 %v1474_v15, %v4406_v34  ;;  %v4037_v11 = vld [vmem:[%s7273_s1 + $0x1c0] sm:$0xff] }
 0x4a1   : > { %1512 = vrot.lane.b32.xlu0 %v1482_v14, %s4163_s22  ;;  %1514 = vrot.lane.b32.xlu1 %v1483_v17, %s4163_s22  ;;  %v4039_v14 = vld [vmem:[%s7273_s1 + $0x1d0] sm:$0xff]  ;;  %v4040_v17 = vld [vmem:[%s7273_s1 + $0x1d8] sm:$0xff] }
 0x4a5   : > { %1516 = vrot.lane.b32.xlu0 %v1484_v7, %s4163_s22  ;;  %1518 = vrot.lane.b32.xlu1 %v1485_v62, %s4163_s22 }
 0x4a9   : > { %1520 = vrot.lane.b32.xlu0 %v1486_v9, %s4163_s22  ;;  %1522 = vrot.lane.b32.xlu1 %v1487_v6, %s4163_s22 }
 0x4ad   : > { %1563 = vperm.xlu0 %4148, %v4037_v11   ;;  %1568 = vperm.xlu1 %4149, %v4038_v20  }
 0x4b1   : > { %1573 = vperm.xlu0 %4148, %v4039_v14   ;;  %1578 = vperm.xlu1 %4149, %v4040_v17  }
 0x507   : > { %v4947_v15 = vpop.permute.xlu0 %1500  ;;  %v4949_v7 = vpop.permute.xlu1 %1502 }
 0x508   : > { %7594 = vst [vmem:[#allocation104_spill] sm:$0xff] %v4947_v15  ;;  %7595 = vst [vmem:[#allocation105_spill] sm:$0xff] %v4949_v7 }
 0x50b   : > { %v4951_v62 = vpop.permute.xlu0 %1504  ;;  %v4953_v9 = vpop.permute.xlu1 %1506 }
 0x50c   : > { %7596 = vst [vmem:[#allocation106_spill] sm:$0xff] %v4951_v62  ;;  %7597 = vst [vmem:[#allocation107_spill] sm:$0xff] %v4953_v9 }
 0x50f   : > { %v4955_v6 = vpop.permute.xlu0 %1508  ;;  %v4957_v11 = vpop.permute.xlu1 %1510 }
 0x510   : > { %7598 = vst [vmem:[#allocation108_spill] sm:$0xff] %v4955_v6  ;;  %7599 = vst [vmem:[#allocation109_spill] sm:$0xff] %v4957_v11 }
 0x513   : > { %v4959_v20 = vpop.permute.xlu0 %1512  ;;  %v4961_v57 = vpop.permute.xlu1 %1514 }
 0x514   : > { %7600 = vst [vmem:[#allocation110_spill] sm:$0xff] %v4959_v20  ;;  %7601 = vst [vmem:[#allocation111_spill] sm:$0xff] %v4961_v57 }
 0x517   : > { %v4963_v10 = vpop.permute.xlu0 %1516  ;;  %v4965_v14 = vpop.permute.xlu1 %1518 }
 0x518   : > { %7602 = vst [vmem:[#allocation112_spill] sm:$0xff] %v4963_v10  ;;  %7603 = vst [vmem:[#allocation113_spill] sm:$0xff] %v4965_v14 }
 0x51b   : > { %v4967_v17 = vpop.permute.xlu0 %1520  ;;  %v4969_v15 = vpop.permute.xlu1 %1522 }
 0x51c   : > { %7604 = vst [vmem:[#allocation114_spill] sm:$0xff] %v4967_v17  ;;  %7605 = vst [vmem:[#allocation115_spill] sm:$0xff] %v4969_v15 }
 0x52c   : > { %v1564_v7 = vpop.permute.xlu0 %1563  ;;  %v1569_v6 = vpop.permute.xlu1 %1568 }
 0x52d   : > { %v1581_v62 = vmul.f32 %v1564_v7, %v4445_v12  ;;  %v1582_v9 = vmul.f32 %v1564_v7, %v4448_v13  ;;  %v1584_v20 = vmul.f32 %v1569_v6, %v4445_v12  ;;  %v1583_v10 = vmul.f32 %v1564_v7, %v4455_v19 }
 0x52e   : > { %v1585_v15 = vmul.f32 %v1569_v6, %v4448_v13  ;;  %v1586_v14 = vmul.f32 %v1569_v6, %v4455_v19 }
 0x52f   : > { %1607 = vrot.lane.b32.xlu1 %v1582_v9, %s4163_s22  ;;  %1605 = vrot.lane.b32.xlu0 %v1581_v62, %s4163_s22 }
 0x530   : > { %v1574_v17 = vpop.permute.xlu0 %1573  ;;  %v1579_v57 = vpop.permute.xlu1 %1578 }
 0x531   : > { %v1587_v9 = vmul.f32 %v1574_v17, %v4445_v12  ;;  %v1588_v62 = vmul.f32 %v1574_v17, %v4448_v13  ;;  %v1589_v7 = vmul.f32 %v1574_v17, %v4455_v19  ;;  %v1591_v6 = vmul.f32 %v1579_v57, %v4448_v13  ;;  %v4044_v17 = vld [vmem:[%s7273_s1 + $0x1f8] sm:$0xff] }
 0x533   : > { %1611 = vrot.lane.b32.xlu1 %v1584_v20, %s4163_s22  ;;  %1609 = vrot.lane.b32.xlu0 %v1583_v10, %s4163_s22  ;;  %v1590_v10 = vmul.f32 %v1579_v57, %v4445_v12  ;;  %v4042_v20 = vld [vmem:[%s7273_s1 + $0x1e8] sm:$0xff] }
 0x537   : > { %1615 = vrot.lane.b32.xlu1 %v1586_v14, %s4163_s22  ;;  %1613 = vrot.lane.b32.xlu0 %v1585_v15, %s4163_s22  ;;  %v1592_v15 = vmul.f32 %v1579_v57, %v4455_v19  ;;  %v4041_v14 = vld [vmem:[%s7273_s1 + $0x1e0] sm:$0xff]  ;;  %v4043_v57 = vld [vmem:[%s7273_s1 + $0x1f0] sm:$0xff] }
 0x53b   : > { %1619 = vrot.lane.b32.xlu1 %v1588_v62, %s4163_s22  ;;  %1617 = vrot.lane.b32.xlu0 %v1587_v9, %s4163_s22 }
 0x53f   : > { %1623 = vrot.lane.b32.xlu1 %v1590_v10, %s4163_s22  ;;  %1621 = vrot.lane.b32.xlu0 %v1589_v7, %s4163_s22 }
 0x543   : > { %1627 = vrot.lane.b32.xlu1 %v1592_v15, %s4163_s22  ;;  %1625 = vrot.lane.b32.xlu0 %v1591_v6, %s4163_s22 }
 0x547   : > { %1673 = vperm.xlu1 %4149, %v4042_v20   ;;  %1668 = vperm.xlu0 %4148, %v4041_v14  }
 0x54b   : > { %1683 = vperm.xlu1 %4149, %v4044_v17   ;;  %1678 = vperm.xlu0 %4148, %v4043_v57  }
 0x5a1   : > { %v5007_v9 = vpop.permute.xlu0 %1605  ;;  %v5009_v62 = vpop.permute.xlu1 %1607 }
 0x5a2   : > { %7606 = vst [vmem:[#allocation116_spill] sm:$0xff] %v5007_v9  ;;  %7607 = vst [vmem:[#allocation117_spill] sm:$0xff] %v5009_v62 }
 0x5a5   : > { %v5011_v10 = vpop.permute.xlu0 %1609  ;;  %v5013_v7 = vpop.permute.xlu1 %1611 }
 0x5a6   : > { %7608 = vst [vmem:[#allocation118_spill] sm:$0xff] %v5011_v10  ;;  %7609 = vst [vmem:[#allocation119_spill] sm:$0xff] %v5013_v7 }
 0x5a9   : > { %v5015_v6 = vpop.permute.xlu0 %1613  ;;  %v5017_v15 = vpop.permute.xlu1 %1615 }
 0x5aa   : > { %7610 = vst [vmem:[#allocation120_spill] sm:$0xff] %v5015_v6  ;;  %7611 = vst [vmem:[#allocation121_spill] sm:$0xff] %v5017_v15 }
 0x5ad   : > { %v5019_v20 = vpop.permute.xlu0 %1617  ;;  %v5021_v14 = vpop.permute.xlu1 %1619 }
 0x5ae   : > { %7612 = vst [vmem:[#allocation122_spill] sm:$0xff] %v5019_v20  ;;  %7613 = vst [vmem:[#allocation123_spill] sm:$0xff] %v5021_v14 }
 0x5b1   : > { %v5023_v11 = vpop.permute.xlu0 %1621  ;;  %v5025_v17 = vpop.permute.xlu1 %1623 }
 0x5b2   : > { %7614 = vst [vmem:[#allocation124_spill] sm:$0xff] %v5023_v11  ;;  %7615 = vst [vmem:[#allocation125_spill] sm:$0xff] %v5025_v17 }
 0x5b5   : > { %v5027_v57 = vpop.permute.xlu0 %1625  ;;  %v5029_v9 = vpop.permute.xlu1 %1627 }
 0x5b6   : > { %7616 = vst [vmem:[#allocation126_spill] sm:$0xff] %v5027_v57  ;;  %7617 = vst [vmem:[#allocation127_spill] sm:$0xff] %v5029_v9 }
 0x5c6   : > { %v1669_v62 = vpop.permute.xlu0 %1668  ;;  %v1674_v6 = vpop.permute.xlu1 %1673 }
 0x5c7   : > { %v1686_v10 = vmul.f32 %v1669_v62, %v4261_v24  ;;  %v1687_v7 = vmul.f32 %v1669_v62, %v4263_v25  ;;  %v1688_v20 = vmul.f32 %v1669_v62, %v4265_v26  ;;  %v1689_v11 = vmul.f32 %v1674_v6, %v4261_v24 }
 0x5c8   : > { %v1690_v9 = vmul.f32 %v1674_v6, %v4263_v25  ;;  %v1691_v17 = vmul.f32 %v1674_v6, %v4265_v26 }
 0x5c9   : > { %1710 = vrot.lane.b32.xlu0 %v1686_v10, %s4163_s22  ;;  %1712 = vrot.lane.b32.xlu1 %v1687_v7, %s4163_s22 }
 0x5ca   : > { %v1679_v57 = vpop.permute.xlu0 %1678  ;;  %v1684_v62 = vpop.permute.xlu1 %1683 }
 0x5cb   : > { %v1692_v10 = vmul.f32 %v1679_v57, %v4261_v24  ;;  %v1693_v7 = vmul.f32 %v1679_v57, %v4263_v25  ;;  %v1697_v6 = vmul.f32 %v1684_v62, %v4265_v26 }
 0x5cd   : > { %1714 = vrot.lane.b32.xlu0 %v1688_v20, %s4163_s22  ;;  %1716 = vrot.lane.b32.xlu1 %v1689_v11, %s4163_s22  ;;  %v1694_v11 = vmul.f32 %v1679_v57, %v4265_v26  ;;  %v1695_v20 = vmul.f32 %v1684_v62, %v4261_v24  ;;  %v4046_v57 = vld [vmem:[%s7273_s1 + $0x208] sm:$0xff] }
 0x5d1   : > { %1718 = vrot.lane.b32.xlu0 %v1690_v9, %s4163_s22  ;;  %1720 = vrot.lane.b32.xlu1 %v1691_v17, %s4163_s22  ;;  %v1696_v9 = vmul.f32 %v1684_v62, %v4263_v25  ;;  %v4045_v17 = vld [vmem:[%s7273_s1 + $0x200] sm:$0xff] }
 0x5d5   : > { %1722 = vrot.lane.b32.xlu0 %v1692_v10, %s4163_s22  ;;  %1724 = vrot.lane.b32.xlu1 %v1693_v7, %s4163_s22  ;;  %v4047_v10 = vld [vmem:[%s7273_s1 + $0x210] sm:$0xff]  ;;  %v4048_v7 = vld [vmem:[%s7273_s1 + $0x218] sm:$0xff] }
 0x5d9   : > { %1726 = vrot.lane.b32.xlu0 %v1694_v11, %s4163_s22  ;;  %1728 = vrot.lane.b32.xlu1 %v1695_v20, %s4163_s22 }
 0x5dd   : > { %1730 = vrot.lane.b32.xlu0 %v1696_v9, %s4163_s22  ;;  %1732 = vrot.lane.b32.xlu1 %v1697_v6, %s4163_s22  ;;  %s4164_s22 = smov 109  }
 0x5e1   : > { %1773 = vperm.xlu0 %4148, %v4045_v17   ;;  %1778 = vperm.xlu1 %4149, %v4046_v57  }
 0x5e5   : > { %1783 = vperm.xlu0 %4148, %v4047_v10   ;;  %1788 = vperm.xlu1 %4149, %v4048_v7  }
 0x63b   : > { %v5067_v62 = vpop.permute.xlu0 %1710  ;;  %v5069_v11 = vpop.permute.xlu1 %1712 }
 0x63c   : > { %7618 = vst [vmem:[#allocation128_spill] sm:$0xff] %v5067_v62  ;;  %7619 = vst [vmem:[#allocation129_spill] sm:$0xff] %v5069_v11 }
 0x63f   : > { %v5071_v20 = vpop.permute.xlu0 %1714  ;;  %v5073_v9 = vpop.permute.xlu1 %1716 }
 0x640   : > { %7620 = vst [vmem:[#allocation130_spill] sm:$0xff] %v5071_v20  ;;  %7621 = vst [vmem:[#allocation131_spill] sm:$0xff] %v5073_v9 }
 0x643   : > { %v5075_v6 = vpop.permute.xlu0 %1718  ;;  %v5077_v17 = vpop.permute.xlu1 %1720 }
 0x644   : > { %7622 = vst [vmem:[#allocation132_spill] sm:$0xff] %v5075_v6  ;;  %7623 = vst [vmem:[#allocation133_spill] sm:$0xff] %v5077_v17 }
 0x647   : > { %v5079_v57 = vpop.permute.xlu0 %1722  ;;  %v5081_v14 = vpop.permute.xlu1 %1724 }
 0x648   : > { %7624 = vst [vmem:[#allocation134_spill] sm:$0xff] %v5079_v57  ;;  %7625 = vst [vmem:[#allocation135_spill] sm:$0xff] %v5081_v14 }
 0x64b   : > { %v5083_v15 = vpop.permute.xlu0 %1726  ;;  %v5085_v10 = vpop.permute.xlu1 %1728 }
 0x64c   : > { %7626 = vst [vmem:[#allocation136_spill] sm:$0xff] %v5083_v15  ;;  %7627 = vst [vmem:[#allocation137_spill] sm:$0xff] %v5085_v10 }
 0x64f   : > { %v5087_v7 = vpop.permute.xlu0 %1730  ;;  %v5089_v62 = vpop.permute.xlu1 %1732 }
 0x650   : > { %7628 = vst [vmem:[#allocation138_spill] sm:$0xff] %v5087_v7  ;;  %7629 = vst [vmem:[#allocation139_spill] sm:$0xff] %v5089_v62 }
 0x660   : > { %v1774_v11 = vpop.permute.xlu0 %1773  ;;  %v1779_v6 = vpop.permute.xlu1 %1778 }
 0x661   : > { %v1791_v20 = vmul.f32 %v1774_v11, %v4363_v2  ;;  %v1792_v9 = vmul.f32 %v1774_v11, %v4366_v3  ;;  %v1794_v57 = vmul.f32 %v1779_v6, %v4363_v2  ;;  %v1793_v15 = vmul.f32 %v1774_v11, %v4371_v8 }
 0x662   : > { %v1795_v62 = vmul.f32 %v1779_v6, %v4366_v3  ;;  %v1796_v10 = vmul.f32 %v1779_v6, %v4371_v8 }
 0x663   : > { %1817 = vrot.lane.b32.xlu1 %v1792_v9, %s4164_s22  ;;  %1815 = vrot.lane.b32.xlu0 %v1791_v20, %s4164_s22 }
 0x664   : > { %v1784_v7 = vpop.permute.xlu0 %1783  ;;  %v1789_v14 = vpop.permute.xlu1 %1788 }
 0x665   : > { %v1797_v9 = vmul.f32 %v1784_v7, %v4363_v2  ;;  %v1798_v20 = vmul.f32 %v1784_v7, %v4366_v3  ;;  %v1799_v11 = vmul.f32 %v1784_v7, %v4371_v8  ;;  %v1801_v6 = vmul.f32 %v1789_v14, %v4366_v3  ;;  %v4052_v7 = vld [vmem:[%s7273_s1 + $0x238] sm:$0xff] }
 0x667   : > { %1821 = vrot.lane.b32.xlu1 %v1794_v57, %s4164_s22  ;;  %1819 = vrot.lane.b32.xlu0 %v1793_v15, %s4164_s22  ;;  %v1800_v15 = vmul.f32 %v1789_v14, %v4363_v2  ;;  %v4050_v57 = vld [vmem:[%s7273_s1 + $0x228] sm:$0xff] }
 0x66b   : > { %1825 = vrot.lane.b32.xlu1 %v1796_v10, %s4164_s22  ;;  %1823 = vrot.lane.b32.xlu0 %v1795_v62, %s4164_s22  ;;  %v1802_v62 = vmul.f32 %v1789_v14, %v4371_v8  ;;  %v4049_v10 = vld [vmem:[%s7273_s1 + $0x220] sm:$0xff]  ;;  %v4051_v14 = vld [vmem:[%s7273_s1 + $0x230] sm:$0xff] }
 0x66f   : > { %1829 = vrot.lane.b32.xlu1 %v1798_v20, %s4164_s22  ;;  %1827 = vrot.lane.b32.xlu0 %v1797_v9, %s4164_s22 }
 0x673   : > { %1833 = vrot.lane.b32.xlu1 %v1800_v15, %s4164_s22  ;;  %1831 = vrot.lane.b32.xlu0 %v1799_v11, %s4164_s22 }
 0x677   : > { %1837 = vrot.lane.b32.xlu1 %v1802_v62, %s4164_s22  ;;  %1835 = vrot.lane.b32.xlu0 %v1801_v6, %s4164_s22 }
 0x67b   : > { %1884 = vperm.xlu1 %4149, %v4050_v57   ;;  %1879 = vperm.xlu0 %4148, %v4049_v10  }
 0x67f   : > { %1894 = vperm.xlu1 %4149, %v4052_v7   ;;  %1889 = vperm.xlu0 %4148, %v4051_v14  }
 0x6d5   : > { %v5127_v9 = vpop.permute.xlu0 %1815  ;;  %v5129_v20 = vpop.permute.xlu1 %1817 }
 0x6d6   : > { %7630 = vst [vmem:[#allocation140_spill] sm:$0xff] %v5127_v9  ;;  %7631 = vst [vmem:[#allocation141_spill] sm:$0xff] %v5129_v20 }
 0x6d9   : > { %v5131_v15 = vpop.permute.xlu0 %1819  ;;  %v5133_v11 = vpop.permute.xlu1 %1821 }
 0x6da   : > { %7632 = vst [vmem:[#allocation142_spill] sm:$0xff] %v5131_v15  ;;  %7633 = vst [vmem:[#allocation143_spill] sm:$0xff] %v5133_v11 }
 0x6dd   : > { %v5135_v6 = vpop.permute.xlu0 %1823  ;;  %v5137_v62 = vpop.permute.xlu1 %1825 }
 0x6de   : > { %7634 = vst [vmem:[#allocation144_spill] sm:$0xff] %v5135_v6  ;;  %7635 = vst [vmem:[#allocation145_spill] sm:$0xff] %v5137_v62 }
 0x6e1   : > { %v5139_v57 = vpop.permute.xlu0 %1827  ;;  %v5141_v10 = vpop.permute.xlu1 %1829 }
 0x6e2   : > { %7636 = vst [vmem:[#allocation146_spill] sm:$0xff] %v5139_v57  ;;  %7637 = vst [vmem:[#allocation147_spill] sm:$0xff] %v5141_v10 }
 0x6e5   : > { %v5143_v17 = vpop.permute.xlu0 %1831  ;;  %v5145_v7 = vpop.permute.xlu1 %1833 }
 0x6e6   : > { %7638 = vst [vmem:[#allocation148_spill] sm:$0xff] %v5143_v17  ;;  %7639 = vst [vmem:[#allocation149_spill] sm:$0xff] %v5145_v7 }
 0x6e9   : > { %v5147_v14 = vpop.permute.xlu0 %1835  ;;  %v5149_v9 = vpop.permute.xlu1 %1837 }
 0x6ea   : > { %7640 = vst [vmem:[#allocation150_spill] sm:$0xff] %v5147_v14  ;;  %7641 = vst [vmem:[#allocation151_spill] sm:$0xff] %v5149_v9 }
 0x6fa   : > { %v1880_v20 = vpop.permute.xlu0 %1879  ;;  %v1885_v6 = vpop.permute.xlu1 %1884 }
 0x6fb   : > { %v1897_v15 = vmul.f32 %v1880_v20, %v4403_v33  ;;  %v1898_v11 = vmul.f32 %v1880_v20, %v4406_v34  ;;  %v1899_v57 = vmul.f32 %v1880_v20, %v4413_v38  ;;  %v1900_v17 = vmul.f32 %v1885_v6, %v4403_v33 }
 0x6fc   : > { %v1901_v9 = vmul.f32 %v1885_v6, %v4406_v34  ;;  %v1902_v7 = vmul.f32 %v1885_v6, %v4413_v38 }
 0x6fd   : > { %1921 = vrot.lane.b32.xlu0 %v1897_v15, %s4164_s22  ;;  %1923 = vrot.lane.b32.xlu1 %v1898_v11, %s4164_s22 }
 0x6fe   : > { %v1890_v14 = vpop.permute.xlu0 %1889  ;;  %v1895_v20 = vpop.permute.xlu1 %1894 }
 0x6ff   : > { %v1903_v15 = vmul.f32 %v1890_v14, %v4403_v33  ;;  %v1904_v11 = vmul.f32 %v1890_v14, %v4406_v34  ;;  %v1908_v6 = vmul.f32 %v1895_v20, %v4413_v38 }
 0x701   : > { %1925 = vrot.lane.b32.xlu0 %v1899_v57, %s4164_s22  ;;  %1927 = vrot.lane.b32.xlu1 %v1900_v17, %s4164_s22  ;;  %v1905_v17 = vmul.f32 %v1890_v14, %v4413_v38  ;;  %v1906_v57 = vmul.f32 %v1895_v20, %v4403_v33  ;;  %v4054_v14 = vld [vmem:[%s7273_s1 + $0x248] sm:$0xff] }
 0x705   : > { %1929 = vrot.lane.b32.xlu0 %v1901_v9, %s4164_s22  ;;  %1931 = vrot.lane.b32.xlu1 %v1902_v7, %s4164_s22  ;;  %v1907_v9 = vmul.f32 %v1895_v20, %v4406_v34  ;;  %v4053_v7 = vld [vmem:[%s7273_s1 + $0x240] sm:$0xff] }
 0x709   : > { %1933 = vrot.lane.b32.xlu0 %v1903_v15, %s4164_s22  ;;  %1935 = vrot.lane.b32.xlu1 %v1904_v11, %s4164_s22  ;;  %v4055_v15 = vld [vmem:[%s7273_s1 + $0x250] sm:$0xff]  ;;  %v4056_v11 = vld [vmem:[%s7273_s1 + $0x258] sm:$0xff] }
 0x70d   : > { %1937 = vrot.lane.b32.xlu0 %v1905_v17, %s4164_s22  ;;  %1939 = vrot.lane.b32.xlu1 %v1906_v57, %s4164_s22 }
 0x711   : > { %1941 = vrot.lane.b32.xlu0 %v1907_v9, %s4164_s22  ;;  %1943 = vrot.lane.b32.xlu1 %v1908_v6, %s4164_s22 }
 0x715   : > { %1984 = vperm.xlu0 %4148, %v4053_v7   ;;  %1989 = vperm.xlu1 %4149, %v4054_v14  }
 0x719   : > { %1994 = vperm.xlu0 %4148, %v4055_v15   ;;  %1999 = vperm.xlu1 %4149, %v4056_v11  }
 0x76f   : > { %v5187_v20 = vpop.permute.xlu0 %1921  ;;  %v5189_v17 = vpop.permute.xlu1 %1923 }
 0x770   : > { %7642 = vst [vmem:[#allocation152_spill] sm:$0xff] %v5187_v20  ;;  %7643 = vst [vmem:[#allocation153_spill] sm:$0xff] %v5189_v17 }
 0x773   : > { %v5191_v57 = vpop.permute.xlu0 %1925  ;;  %v5193_v9 = vpop.permute.xlu1 %1927 }
 0x774   : > { %7644 = vst [vmem:[#allocation154_spill] sm:$0xff] %v5191_v57  ;;  %7645 = vst [vmem:[#allocation155_spill] sm:$0xff] %v5193_v9 }
 0x777   : > { %v5195_v6 = vpop.permute.xlu0 %1929  ;;  %v5197_v7 = vpop.permute.xlu1 %1931 }
 0x778   : > { %7646 = vst [vmem:[#allocation156_spill] sm:$0xff] %v5195_v6  ;;  %7647 = vst [vmem:[#allocation157_spill] sm:$0xff] %v5197_v7 }
 0x77b   : > { %v5199_v14 = vpop.permute.xlu0 %1933  ;;  %v5201_v10 = vpop.permute.xlu1 %1935 }
 0x77c   : > { %7648 = vst [vmem:[#allocation158_spill] sm:$0xff] %v5199_v14  ;;  %7649 = vst [vmem:[#allocation159_spill] sm:$0xff] %v5201_v10 }
 0x77f   : > { %v5203_v62 = vpop.permute.xlu0 %1937  ;;  %v5205_v15 = vpop.permute.xlu1 %1939 }
 0x780   : > { %7650 = vst [vmem:[#allocation160_spill] sm:$0xff] %v5203_v62  ;;  %7651 = vst [vmem:[#allocation161_spill] sm:$0xff] %v5205_v15 }
 0x783   : > { %v5207_v11 = vpop.permute.xlu0 %1941  ;;  %v5209_v20 = vpop.permute.xlu1 %1943 }
 0x784   : > { %7652 = vst [vmem:[#allocation162_spill] sm:$0xff] %v5207_v11  ;;  %7653 = vst [vmem:[#allocation163_spill] sm:$0xff] %v5209_v20 }
 0x794   : > { %v1985_v17 = vpop.permute.xlu0 %1984  ;;  %v1990_v6 = vpop.permute.xlu1 %1989 }
 0x795   : > { %v2002_v57 = vmul.f32 %v1985_v17, %v4445_v12  ;;  %v2003_v9 = vmul.f32 %v1985_v17, %v4448_v13  ;;  %v2005_v14 = vmul.f32 %v1990_v6, %v4445_v12  ;;  %v2004_v62 = vmul.f32 %v1985_v17, %v4455_v19 }
 0x796   : > { %v2006_v20 = vmul.f32 %v1990_v6, %v4448_v13  ;;  %v2007_v15 = vmul.f32 %v1990_v6, %v4455_v19 }
 0x797   : > { %2028 = vrot.lane.b32.xlu1 %v2003_v9, %s4164_s22  ;;  %2026 = vrot.lane.b32.xlu0 %v2002_v57, %s4164_s22 }
 0x798   : > { %v1995_v11 = vpop.permute.xlu0 %1994  ;;  %v2000_v10 = vpop.permute.xlu1 %1999 }
 0x799   : > { %v2008_v9 = vmul.f32 %v1995_v11, %v4445_v12  ;;  %v2009_v57 = vmul.f32 %v1995_v11, %v4448_v13  ;;  %v2010_v17 = vmul.f32 %v1995_v11, %v4455_v19  ;;  %v2012_v6 = vmul.f32 %v2000_v10, %v4448_v13  ;;  %v4060_v11 = vld [vmem:[%s7273_s1 + $0x278] sm:$0xff] }
 0x79b   : > { %2032 = vrot.lane.b32.xlu1 %v2005_v14, %s4164_s22  ;;  %2030 = vrot.lane.b32.xlu0 %v2004_v62, %s4164_s22  ;;  %v2011_v62 = vmul.f32 %v2000_v10, %v4445_v12  ;;  %v4058_v14 = vld [vmem:[%s7273_s1 + $0x268] sm:$0xff] }
 0x79f   : > { %2036 = vrot.lane.b32.xlu1 %v2007_v15, %s4164_s22  ;;  %2034 = vrot.lane.b32.xlu0 %v2006_v20, %s4164_s22  ;;  %v2013_v20 = vmul.f32 %v2000_v10, %v4455_v19  ;;  %v4057_v15 = vld [vmem:[%s7273_s1 + $0x260] sm:$0xff]  ;;  %v4059_v10 = vld [vmem:[%s7273_s1 + $0x270] sm:$0xff] }
 0x7a3   : > { %2040 = vrot.lane.b32.xlu1 %v2009_v57, %s4164_s22  ;;  %2038 = vrot.lane.b32.xlu0 %v2008_v9, %s4164_s22 }
 0x7a7   : > { %2044 = vrot.lane.b32.xlu1 %v2011_v62, %s4164_s22  ;;  %2042 = vrot.lane.b32.xlu0 %v2010_v17, %s4164_s22 }
 0x7ab   : > { %2048 = vrot.lane.b32.xlu1 %v2013_v20, %s4164_s22  ;;  %2046 = vrot.lane.b32.xlu0 %v2012_v6, %s4164_s22 }
 0x7af   : > { %2094 = vperm.xlu1 %4149, %v4058_v14   ;;  %2089 = vperm.xlu0 %4148, %v4057_v15  }
 0x7b3   : > { %2104 = vperm.xlu1 %4149, %v4060_v11   ;;  %2099 = vperm.xlu0 %4148, %v4059_v10  }
 0x809   : > { %v5247_v9 = vpop.permute.xlu0 %2026  ;;  %v5249_v57 = vpop.permute.xlu1 %2028 }
 0x80a   : > { %7654 = vst [vmem:[#allocation164_spill] sm:$0xff] %v5247_v9  ;;  %7655 = vst [vmem:[#allocation165_spill] sm:$0xff] %v5249_v57 }
 0x80d   : > { %v5251_v62 = vpop.permute.xlu0 %2030  ;;  %v5253_v17 = vpop.permute.xlu1 %2032 }
 0x80e   : > { %7656 = vst [vmem:[#allocation166_spill] sm:$0xff] %v5251_v62  ;;  %7657 = vst [vmem:[#allocation167_spill] sm:$0xff] %v5253_v17 }
 0x811   : > { %v5255_v6 = vpop.permute.xlu0 %2034  ;;  %v5257_v20 = vpop.permute.xlu1 %2036 }
 0x812   : > { %7658 = vst [vmem:[#allocation168_spill] sm:$0xff] %v5255_v6  ;;  %7659 = vst [vmem:[#allocation169_spill] sm:$0xff] %v5257_v20 }
 0x815   : > { %v5259_v14 = vpop.permute.xlu0 %2038  ;;  %v5261_v15 = vpop.permute.xlu1 %2040 }
 0x816   : > { %7660 = vst [vmem:[#allocation170_spill] sm:$0xff] %v5259_v14  ;;  %7661 = vst [vmem:[#allocation171_spill] sm:$0xff] %v5261_v15 }
 0x819   : > { %v5263_v7 = vpop.permute.xlu0 %2042  ;;  %v5265_v11 = vpop.permute.xlu1 %2044 }
 0x81a   : > { %7662 = vst [vmem:[#allocation172_spill] sm:$0xff] %v5263_v7  ;;  %7663 = vst [vmem:[#allocation173_spill] sm:$0xff] %v5265_v11 }
 0x81d   : > { %v5267_v10 = vpop.permute.xlu0 %2046  ;;  %v5269_v9 = vpop.permute.xlu1 %2048 }
 0x81e   : > { %7664 = vst [vmem:[#allocation174_spill] sm:$0xff] %v5267_v10  ;;  %7665 = vst [vmem:[#allocation175_spill] sm:$0xff] %v5269_v9 }
 0x82e   : > { %v2090_v57 = vpop.permute.xlu0 %2089  ;;  %v2095_v6 = vpop.permute.xlu1 %2094 }
 0x82f   : > { %v2107_v62 = vmul.f32 %v2090_v57, %v4261_v24  ;;  %v2108_v17 = vmul.f32 %v2090_v57, %v4263_v25  ;;  %v2109_v14 = vmul.f32 %v2090_v57, %v4265_v26  ;;  %v2110_v7 = vmul.f32 %v2095_v6, %v4261_v24 }
 0x830   : > { %v2111_v9 = vmul.f32 %v2095_v6, %v4263_v25  ;;  %v2112_v11 = vmul.f32 %v2095_v6, %v4265_v26 }
 0x831   : > { %2131 = vrot.lane.b32.xlu0 %v2107_v62, %s4164_s22  ;;  %2133 = vrot.lane.b32.xlu1 %v2108_v17, %s4164_s22 }
 0x832   : > { %v2100_v10 = vpop.permute.xlu0 %2099  ;;  %v2105_v57 = vpop.permute.xlu1 %2104 }
 0x833   : > { %v2113_v62 = vmul.f32 %v2100_v10, %v4261_v24  ;;  %v2114_v17 = vmul.f32 %v2100_v10, %v4263_v25  ;;  %v2118_v6 = vmul.f32 %v2105_v57, %v4265_v26 }
 0x835   : > { %2135 = vrot.lane.b32.xlu0 %v2109_v14, %s4164_s22  ;;  %2137 = vrot.lane.b32.xlu1 %v2110_v7, %s4164_s22  ;;  %v2115_v7 = vmul.f32 %v2100_v10, %v4265_v26  ;;  %v2116_v14 = vmul.f32 %v2105_v57, %v4261_v24  ;;  %v4062_v10 = vld [vmem:[%s7273_s1 + $0x288] sm:$0xff] }
 0x839   : > { %2139 = vrot.lane.b32.xlu0 %v2111_v9, %s4164_s22  ;;  %2141 = vrot.lane.b32.xlu1 %v2112_v11, %s4164_s22  ;;  %v2117_v9 = vmul.f32 %v2105_v57, %v4263_v25  ;;  %v4061_v11 = vld [vmem:[%s7273_s1 + $0x280] sm:$0xff] }
 0x83d   : > { %2143 = vrot.lane.b32.xlu0 %v2113_v62, %s4164_s22  ;;  %2145 = vrot.lane.b32.xlu1 %v2114_v17, %s4164_s22  ;;  %v4063_v62 = vld [vmem:[%s7273_s1 + $0x290] sm:$0xff]  ;;  %v4064_v17 = vld [vmem:[%s7273_s1 + $0x298] sm:$0xff] }
 0x841   : > { %2147 = vrot.lane.b32.xlu0 %v2115_v7, %s4164_s22  ;;  %2149 = vrot.lane.b32.xlu1 %v2116_v14, %s4164_s22 }
 0x845   : > { %2151 = vrot.lane.b32.xlu0 %v2117_v9, %s4164_s22  ;;  %2153 = vrot.lane.b32.xlu1 %v2118_v6, %s4164_s22  ;;  %s4165_s22 = smov 108  }
 0x849   : > { %2194 = vperm.xlu0 %4148, %v4061_v11   ;;  %2199 = vperm.xlu1 %4149, %v4062_v10  }
 0x84d   : > { %2204 = vperm.xlu0 %4148, %v4063_v62   ;;  %2209 = vperm.xlu1 %4149, %v4064_v17  }
 0x8a3   : > { %v5307_v57 = vpop.permute.xlu0 %2131  ;;  %v5309_v7 = vpop.permute.xlu1 %2133 }
 0x8a4   : > { %7666 = vst [vmem:[#allocation176_spill] sm:$0xff] %v5307_v57  ;;  %7667 = vst [vmem:[#allocation177_spill] sm:$0xff] %v5309_v7 }
 0x8a7   : > { %v5311_v14 = vpop.permute.xlu0 %2135  ;;  %v5313_v9 = vpop.permute.xlu1 %2137 }
 0x8a8   : > { %7668 = vst [vmem:[#allocation178_spill] sm:$0xff] %v5311_v14  ;;  %7669 = vst [vmem:[#allocation179_spill] sm:$0xff] %v5313_v9 }
 0x8ab   : > { %v5315_v6 = vpop.permute.xlu0 %2139  ;;  %v5317_v11 = vpop.permute.xlu1 %2141 }
 0x8ac   : > { %7670 = vst [vmem:[#allocation180_spill] sm:$0xff] %v5315_v6  ;;  %7671 = vst [vmem:[#allocation181_spill] sm:$0xff] %v5317_v11 }
 0x8af   : > { %v5319_v10 = vpop.permute.xlu0 %2143  ;;  %v5321_v15 = vpop.permute.xlu1 %2145 }
 0x8b0   : > { %7672 = vst [vmem:[#allocation182_spill] sm:$0xff] %v5319_v10  ;;  %7673 = vst [vmem:[#allocation183_spill] sm:$0xff] %v5321_v15 }
 0x8b3   : > { %v5323_v20 = vpop.permute.xlu0 %2147  ;;  %v5325_v62 = vpop.permute.xlu1 %2149 }
 0x8b4   : > { %7674 = vst [vmem:[#allocation184_spill] sm:$0xff] %v5323_v20  ;;  %7675 = vst [vmem:[#allocation185_spill] sm:$0xff] %v5325_v62 }
 0x8b7   : > { %v5327_v17 = vpop.permute.xlu0 %2151  ;;  %v5329_v57 = vpop.permute.xlu1 %2153 }
 0x8b8   : > { %7676 = vst [vmem:[#allocation186_spill] sm:$0xff] %v5327_v17  ;;  %7677 = vst [vmem:[#allocation187_spill] sm:$0xff] %v5329_v57 }
 0x8c8   : > { %v2195_v7 = vpop.permute.xlu0 %2194  ;;  %v2200_v6 = vpop.permute.xlu1 %2199 }
 0x8c9   : > { %v2212_v14 = vmul.f32 %v2195_v7, %v4363_v2  ;;  %v2213_v9 = vmul.f32 %v2195_v7, %v4366_v3  ;;  %v2215_v10 = vmul.f32 %v2200_v6, %v4363_v2  ;;  %v2214_v20 = vmul.f32 %v2195_v7, %v4371_v8 }
 0x8ca   : > { %v2216_v57 = vmul.f32 %v2200_v6, %v4366_v3  ;;  %v2217_v62 = vmul.f32 %v2200_v6, %v4371_v8 }
 0x8cb   : > { %2238 = vrot.lane.b32.xlu1 %v2213_v9, %s4165_s22  ;;  %2236 = vrot.lane.b32.xlu0 %v2212_v14, %s4165_s22 }
 0x8cc   : > { %v2205_v17 = vpop.permute.xlu0 %2204  ;;  %v2210_v15 = vpop.permute.xlu1 %2209 }
 0x8cd   : > { %v2218_v9 = vmul.f32 %v2205_v17, %v4363_v2  ;;  %v2219_v14 = vmul.f32 %v2205_v17, %v4366_v3  ;;  %v2220_v7 = vmul.f32 %v2205_v17, %v4371_v8  ;;  %v2222_v6 = vmul.f32 %v2210_v15, %v4366_v3  ;;  %v4068_v17 = vld [vmem:[%s7273_s1 + $0x2b8] sm:$0xff] }
 0x8cf   : > { %2242 = vrot.lane.b32.xlu1 %v2215_v10, %s4165_s22  ;;  %2240 = vrot.lane.b32.xlu0 %v2214_v20, %s4165_s22  ;;  %v2221_v20 = vmul.f32 %v2210_v15, %v4363_v2  ;;  %v4066_v10 = vld [vmem:[%s7273_s1 + $0x2a8] sm:$0xff] }
 0x8d3   : > { %2246 = vrot.lane.b32.xlu1 %v2217_v62, %s4165_s22  ;;  %2244 = vrot.lane.b32.xlu0 %v2216_v57, %s4165_s22  ;;  %v2223_v57 = vmul.f32 %v2210_v15, %v4371_v8  ;;  %v4065_v62 = vld [vmem:[%s7273_s1 + $0x2a0] sm:$0xff]  ;;  %v4067_v15 = vld [vmem:[%s7273_s1 + $0x2b0] sm:$0xff] }
 0x8d7   : > { %2250 = vrot.lane.b32.xlu1 %v2219_v14, %s4165_s22  ;;  %2248 = vrot.lane.b32.xlu0 %v2218_v9, %s4165_s22 }
 0x8db   : > { %2254 = vrot.lane.b32.xlu1 %v2221_v20, %s4165_s22  ;;  %2252 = vrot.lane.b32.xlu0 %v2220_v7, %s4165_s22 }
 0x8df   : > { %2258 = vrot.lane.b32.xlu1 %v2223_v57, %s4165_s22  ;;  %2256 = vrot.lane.b32.xlu0 %v2222_v6, %s4165_s22 }
 0x8e3   : > { %2305 = vperm.xlu1 %4149, %v4066_v10   ;;  %2300 = vperm.xlu0 %4148, %v4065_v62  }
 0x8e7   : > { %2315 = vperm.xlu1 %4149, %v4068_v17   ;;  %2310 = vperm.xlu0 %4148, %v4067_v15  }
 0x93d   : > { %v5367_v9 = vpop.permute.xlu0 %2236  ;;  %v5369_v14 = vpop.permute.xlu1 %2238 }
 0x93e   : > { %7678 = vst [vmem:[#allocation188_spill] sm:$0xff] %v5367_v9  ;;  %7679 = vst [vmem:[#allocation189_spill] sm:$0xff] %v5369_v14 }
 0x941   : > { %v5371_v20 = vpop.permute.xlu0 %2240  ;;  %v5373_v7 = vpop.permute.xlu1 %2242 }
 0x942   : > { %7680 = vst [vmem:[#allocation190_spill] sm:$0xff] %v5371_v20  ;;  %7681 = vst [vmem:[#allocation191_spill] sm:$0xff] %v5373_v7 }
 0x945   : > { %v5375_v6 = vpop.permute.xlu0 %2244  ;;  %v5377_v57 = vpop.permute.xlu1 %2246 }
 0x946   : > { %7682 = vst [vmem:[#allocation192_spill] sm:$0xff] %v5375_v6  ;;  %7683 = vst [vmem:[#allocation193_spill] sm:$0xff] %v5377_v57 }
 0x949   : > { %v5379_v10 = vpop.permute.xlu0 %2248  ;;  %v5381_v62 = vpop.permute.xlu1 %2250 }
 0x94a   : > { %7684 = vst [vmem:[#allocation194_spill] sm:$0xff] %v5379_v10  ;;  %7685 = vst [vmem:[#allocation195_spill] sm:$0xff] %v5381_v62 }
 0x94d   : > { %v5383_v11 = vpop.permute.xlu0 %2252  ;;  %v5385_v17 = vpop.permute.xlu1 %2254 }
 0x94e   : > { %7686 = vst [vmem:[#allocation196_spill] sm:$0xff] %v5383_v11  ;;  %7687 = vst [vmem:[#allocation197_spill] sm:$0xff] %v5385_v17 }
 0x951   : > { %v5387_v15 = vpop.permute.xlu0 %2256  ;;  %v5389_v9 = vpop.permute.xlu1 %2258 }
 0x952   : > { %7688 = vst [vmem:[#allocation198_spill] sm:$0xff] %v5387_v15  ;;  %7689 = vst [vmem:[#allocation199_spill] sm:$0xff] %v5389_v9 }
 0x962   : > { %v2301_v14 = vpop.permute.xlu0 %2300  ;;  %v2306_v6 = vpop.permute.xlu1 %2305 }
 0x963   : > { %v2318_v20 = vmul.f32 %v2301_v14, %v4403_v33  ;;  %v2319_v7 = vmul.f32 %v2301_v14, %v4406_v34  ;;  %v2320_v10 = vmul.f32 %v2301_v14, %v4413_v38  ;;  %v2321_v11 = vmul.f32 %v2306_v6, %v4403_v33 }
 0x964   : > { %v2322_v9 = vmul.f32 %v2306_v6, %v4406_v34  ;;  %v2323_v17 = vmul.f32 %v2306_v6, %v4413_v38 }
 0x965   : > { %2342 = vrot.lane.b32.xlu0 %v2318_v20, %s4165_s22  ;;  %2344 = vrot.lane.b32.xlu1 %v2319_v7, %s4165_s22 }
 0x966   : > { %v2311_v15 = vpop.permute.xlu0 %2310  ;;  %v2316_v14 = vpop.permute.xlu1 %2315 }
 0x967   : > { %v2324_v20 = vmul.f32 %v2311_v15, %v4403_v33  ;;  %v2325_v7 = vmul.f32 %v2311_v15, %v4406_v34  ;;  %v2329_v6 = vmul.f32 %v2316_v14, %v4413_v38 }
 0x969   : > { %2346 = vrot.lane.b32.xlu0 %v2320_v10, %s4165_s22  ;;  %2348 = vrot.lane.b32.xlu1 %v2321_v11, %s4165_s22  ;;  %v2326_v11 = vmul.f32 %v2311_v15, %v4413_v38  ;;  %v2327_v10 = vmul.f32 %v2316_v14, %v4403_v33  ;;  %v4070_v15 = vld [vmem:[%s7273_s1 + $0x2c8] sm:$0xff] }
 0x96d   : > { %2350 = vrot.lane.b32.xlu0 %v2322_v9, %s4165_s22  ;;  %2352 = vrot.lane.b32.xlu1 %v2323_v17, %s4165_s22  ;;  %v2328_v9 = vmul.f32 %v2316_v14, %v4406_v34  ;;  %v4069_v17 = vld [vmem:[%s7273_s1 + $0x2c0] sm:$0xff] }
 0x971   : > { %2354 = vrot.lane.b32.xlu0 %v2324_v20, %s4165_s22  ;;  %2356 = vrot.lane.b32.xlu1 %v2325_v7, %s4165_s22  ;;  %v4071_v20 = vld [vmem:[%s7273_s1 + $0x2d0] sm:$0xff]  ;;  %v4072_v7 = vld [vmem:[%s7273_s1 + $0x2d8] sm:$0xff] }
 0x975   : > { %2358 = vrot.lane.b32.xlu0 %v2326_v11, %s4165_s22  ;;  %2360 = vrot.lane.b32.xlu1 %v2327_v10, %s4165_s22 }
 0x979   : > { %2362 = vrot.lane.b32.xlu0 %v2328_v9, %s4165_s22  ;;  %2364 = vrot.lane.b32.xlu1 %v2329_v6, %s4165_s22 }
 0x97d   : > { %2405 = vperm.xlu0 %4148, %v4069_v17   ;;  %2410 = vperm.xlu1 %4149, %v4070_v15  }
 0x981   : > { %2415 = vperm.xlu0 %4148, %v4071_v20   ;;  %2420 = vperm.xlu1 %4149, %v4072_v7  }
 0x9d7   : > { %v5427_v14 = vpop.permute.xlu0 %2342  ;;  %v5429_v11 = vpop.permute.xlu1 %2344 }
 0x9d8   : > { %7690 = vst [vmem:[#allocation200_spill] sm:$0xff] %v5427_v14  ;;  %7691 = vst [vmem:[#allocation201_spill] sm:$0xff] %v5429_v11 }
 0x9db   : > { %v5431_v10 = vpop.permute.xlu0 %2346  ;;  %v5433_v9 = vpop.permute.xlu1 %2348 }
 0x9dc   : > { %7692 = vst [vmem:[#allocation202_spill] sm:$0xff] %v5431_v10  ;;  %7693 = vst [vmem:[#allocation203_spill] sm:$0xff] %v5433_v9 }
 0x9df   : > { %v5435_v6 = vpop.permute.xlu0 %2350  ;;  %v5437_v17 = vpop.permute.xlu1 %2352 }
 0x9e0   : > { %7694 = vst [vmem:[#allocation204_spill] sm:$0xff] %v5435_v6  ;;  %7695 = vst [vmem:[#allocation205_spill] sm:$0xff] %v5437_v17 }
 0x9e3   : > { %v5439_v15 = vpop.permute.xlu0 %2354  ;;  %v5441_v62 = vpop.permute.xlu1 %2356 }
 0x9e4   : > { %7696 = vst [vmem:[#allocation206_spill] sm:$0xff] %v5439_v15  ;;  %7697 = vst [vmem:[#allocation207_spill] sm:$0xff] %v5441_v62 }
 0x9e7   : > { %v5443_v57 = vpop.permute.xlu0 %2358  ;;  %v5445_v20 = vpop.permute.xlu1 %2360 }
 0x9e8   : > { %7698 = vst [vmem:[#allocation208_spill] sm:$0xff] %v5443_v57  ;;  %7699 = vst [vmem:[#allocation209_spill] sm:$0xff] %v5445_v20 }
 0x9eb   : > { %v5447_v7 = vpop.permute.xlu0 %2362  ;;  %v5449_v14 = vpop.permute.xlu1 %2364 }
 0x9ec   : > { %7700 = vst [vmem:[#allocation210_spill] sm:$0xff] %v5447_v7  ;;  %7701 = vst [vmem:[#allocation211_spill] sm:$0xff] %v5449_v14 }
 0x9fc   : > { %v2406_v11 = vpop.permute.xlu0 %2405  ;;  %v2411_v6 = vpop.permute.xlu1 %2410 }
 0x9fd   : > { %v2423_v10 = vmul.f32 %v2406_v11, %v4445_v12  ;;  %v2424_v9 = vmul.f32 %v2406_v11, %v4448_v13  ;;  %v2426_v15 = vmul.f32 %v2411_v6, %v4445_v12  ;;  %v2425_v57 = vmul.f32 %v2406_v11, %v4455_v19 }
 0x9fe   : > { %v2427_v14 = vmul.f32 %v2411_v6, %v4448_v13  ;;  %v2428_v20 = vmul.f32 %v2411_v6, %v4455_v19 }
 0x9ff   : > { %2449 = vrot.lane.b32.xlu1 %v2424_v9, %s4165_s22  ;;  %2447 = vrot.lane.b32.xlu0 %v2423_v10, %s4165_s22 }
 0xa00   : > { %v2416_v7 = vpop.permute.xlu0 %2415  ;;  %v2421_v62 = vpop.permute.xlu1 %2420 }
 0xa01   : > { %v2429_v9 = vmul.f32 %v2416_v7, %v4445_v12  ;;  %v2430_v10 = vmul.f32 %v2416_v7, %v4448_v13  ;;  %v2431_v11 = vmul.f32 %v2416_v7, %v4455_v19  ;;  %v2433_v6 = vmul.f32 %v2421_v62, %v4448_v13  ;;  %v4076_v7 = vld [vmem:[%s7273_s1 + $0x2f8] sm:$0xff] }
 0xa03   : > { %2453 = vrot.lane.b32.xlu1 %v2426_v15, %s4165_s22  ;;  %2451 = vrot.lane.b32.xlu0 %v2425_v57, %s4165_s22  ;;  %v2432_v57 = vmul.f32 %v2421_v62, %v4445_v12  ;;  %v4074_v15 = vld [vmem:[%s7273_s1 + $0x2e8] sm:$0xff] }
 0xa07   : > { %2457 = vrot.lane.b32.xlu1 %v2428_v20, %s4165_s22  ;;  %2455 = vrot.lane.b32.xlu0 %v2427_v14, %s4165_s22  ;;  %v2434_v14 = vmul.f32 %v2421_v62, %v4455_v19  ;;  %v4073_v20 = vld [vmem:[%s7273_s1 + $0x2e0] sm:$0xff]  ;;  %v4075_v62 = vld [vmem:[%s7273_s1 + $0x2f0] sm:$0xff] }
 0xa0b   : > { %2461 = vrot.lane.b32.xlu1 %v2430_v10, %s4165_s22  ;;  %2459 = vrot.lane.b32.xlu0 %v2429_v9, %s4165_s22 }
 0xa0f   : > { %2465 = vrot.lane.b32.xlu1 %v2432_v57, %s4165_s22  ;;  %2463 = vrot.lane.b32.xlu0 %v2431_v11, %s4165_s22 }
 0xa13   : > { %2469 = vrot.lane.b32.xlu1 %v2434_v14, %s4165_s22  ;;  %2467 = vrot.lane.b32.xlu0 %v2433_v6, %s4165_s22 }
 0xa17   : > { %2515 = vperm.xlu1 %4149, %v4074_v15   ;;  %2510 = vperm.xlu0 %4148, %v4073_v20  }
 0xa1b   : > { %2525 = vperm.xlu1 %4149, %v4076_v7   ;;  %2520 = vperm.xlu0 %4148, %v4075_v62  }
 0xa71   : > { %v5487_v9 = vpop.permute.xlu0 %2447  ;;  %v5489_v10 = vpop.permute.xlu1 %2449 }
 0xa72   : > { %7702 = vst [vmem:[#allocation212_spill] sm:$0xff] %v5487_v9  ;;  %7703 = vst [vmem:[#allocation213_spill] sm:$0xff] %v5489_v10 }
 0xa75   : > { %v5491_v57 = vpop.permute.xlu0 %2451  ;;  %v5493_v11 = vpop.permute.xlu1 %2453 }
 0xa76   : > { %7704 = vst [vmem:[#allocation214_spill] sm:$0xff] %v5491_v57  ;;  %7705 = vst [vmem:[#allocation215_spill] sm:$0xff] %v5493_v11 }
 0xa79   : > { %v5495_v6 = vpop.permute.xlu0 %2455  ;;  %v5497_v14 = vpop.permute.xlu1 %2457 }
 0xa7a   : > { %7706 = vst [vmem:[#allocation216_spill] sm:$0xff] %v5495_v6  ;;  %7707 = vst [vmem:[#allocation217_spill] sm:$0xff] %v5497_v14 }
 0xa7d   : > { %v5499_v15 = vpop.permute.xlu0 %2459  ;;  %v5501_v20 = vpop.permute.xlu1 %2461 }
 0xa7e   : > { %7708 = vst [vmem:[#allocation218_spill] sm:$0xff] %v5499_v15  ;;  %7709 = vst [vmem:[#allocation219_spill] sm:$0xff] %v5501_v20 }
 0xa81   : > { %v5503_v17 = vpop.permute.xlu0 %2463  ;;  %v5505_v7 = vpop.permute.xlu1 %2465 }
 0xa82   : > { %7710 = vst [vmem:[#allocation220_spill] sm:$0xff] %v5503_v17  ;;  %7711 = vst [vmem:[#allocation221_spill] sm:$0xff] %v5505_v7 }
 0xa85   : > { %v5507_v62 = vpop.permute.xlu0 %2467  ;;  %v5509_v9 = vpop.permute.xlu1 %2469 }
 0xa86   : > { %7712 = vst [vmem:[#allocation222_spill] sm:$0xff] %v5507_v62  ;;  %7713 = vst [vmem:[#allocation223_spill] sm:$0xff] %v5509_v9 }
 0xa96   : > { %v2511_v10 = vpop.permute.xlu0 %2510  ;;  %v2516_v6 = vpop.permute.xlu1 %2515 }
 0xa97   : > { %v2528_v57 = vmul.f32 %v2511_v10, %v4261_v24  ;;  %v2529_v11 = vmul.f32 %v2511_v10, %v4263_v25  ;;  %v2530_v15 = vmul.f32 %v2511_v10, %v4265_v26  ;;  %v2531_v17 = vmul.f32 %v2516_v6, %v4261_v24 }
 0xa98   : > { %v2532_v9 = vmul.f32 %v2516_v6, %v4263_v25  ;;  %v2533_v7 = vmul.f32 %v2516_v6, %v4265_v26 }
 0xa99   : > { %2552 = vrot.lane.b32.xlu0 %v2528_v57, %s4165_s22  ;;  %2554 = vrot.lane.b32.xlu1 %v2529_v11, %s4165_s22 }
 0xa9a   : > { %v2521_v62 = vpop.permute.xlu0 %2520  ;;  %v2526_v10 = vpop.permute.xlu1 %2525 }
 0xa9b   : > { %v2534_v57 = vmul.f32 %v2521_v62, %v4261_v24  ;;  %v2535_v11 = vmul.f32 %v2521_v62, %v4263_v25  ;;  %v2539_v6 = vmul.f32 %v2526_v10, %v4265_v26 }
 0xa9d   : > { %2556 = vrot.lane.b32.xlu0 %v2530_v15, %s4165_s22  ;;  %2558 = vrot.lane.b32.xlu1 %v2531_v17, %s4165_s22  ;;  %v2536_v17 = vmul.f32 %v2521_v62, %v4265_v26  ;;  %v2537_v15 = vmul.f32 %v2526_v10, %v4261_v24  ;;  %v4078_v62 = vld [vmem:[%s7273_s1 + $0x308] sm:$0xff] }
 0xaa1   : > { %2560 = vrot.lane.b32.xlu0 %v2532_v9, %s4165_s22  ;;  %2562 = vrot.lane.b32.xlu1 %v2533_v7, %s4165_s22  ;;  %v2538_v9 = vmul.f32 %v2526_v10, %v4263_v25  ;;  %v4077_v7 = vld [vmem:[%s7273_s1 + $0x300] sm:$0xff] }
 0xaa5   : > { %2564 = vrot.lane.b32.xlu0 %v2534_v57, %s4165_s22  ;;  %2566 = vrot.lane.b32.xlu1 %v2535_v11, %s4165_s22  ;;  %v4079_v57 = vld [vmem:[%s7273_s1 + $0x310] sm:$0xff]  ;;  %v4080_v11 = vld [vmem:[%s7273_s1 + $0x318] sm:$0xff] }
 0xaa9   : > { %2568 = vrot.lane.b32.xlu0 %v2536_v17, %s4165_s22  ;;  %2570 = vrot.lane.b32.xlu1 %v2537_v15, %s4165_s22 }
 0xaad   : > { %2572 = vrot.lane.b32.xlu0 %v2538_v9, %s4165_s22  ;;  %2574 = vrot.lane.b32.xlu1 %v2539_v6, %s4165_s22  ;;  %s4166_s22 = smov 92  }
 0xab1   : > { %2615 = vperm.xlu0 %4148, %v4077_v7   ;;  %2620 = vperm.xlu1 %4149, %v4078_v62  }
 0xab5   : > { %2625 = vperm.xlu0 %4148, %v4079_v57   ;;  %2630 = vperm.xlu1 %4149, %v4080_v11  }
 0xb0b   : > { %v5547_v10 = vpop.permute.xlu0 %2552  ;;  %v5549_v17 = vpop.permute.xlu1 %2554 }
 0xb0c   : > { %7714 = vst [vmem:[#allocation224_spill] sm:$0xff] %v5547_v10  ;;  %7715 = vst [vmem:[#allocation225_spill] sm:$0xff] %v5549_v17 }
 0xb0f   : > { %v5551_v15 = vpop.permute.xlu0 %2556  ;;  %v5553_v9 = vpop.permute.xlu1 %2558 }
 0xb10   : > { %7716 = vst [vmem:[#allocation226_spill] sm:$0xff] %v5551_v15  ;;  %7717 = vst [vmem:[#allocation227_spill] sm:$0xff] %v5553_v9 }
 0xb13   : > { %v5555_v6 = vpop.permute.xlu0 %2560  ;;  %v5557_v7 = vpop.permute.xlu1 %2562 }
 0xb14   : > { %7718 = vst [vmem:[#allocation228_spill] sm:$0xff] %v5555_v6  ;;  %7719 = vst [vmem:[#allocation229_spill] sm:$0xff] %v5557_v7 }
 0xb17   : > { %v5559_v62 = vpop.permute.xlu0 %2564  ;;  %v5561_v20 = vpop.permute.xlu1 %2566 }
 0xb18   : > { %7720 = vst [vmem:[#allocation230_spill] sm:$0xff] %v5559_v62  ;;  %7721 = vst [vmem:[#allocation231_spill] sm:$0xff] %v5561_v20 }
 0xb1b   : > { %v5563_v14 = vpop.permute.xlu0 %2568  ;;  %v5565_v57 = vpop.permute.xlu1 %2570 }
 0xb1c   : > { %7722 = vst [vmem:[#allocation232_spill] sm:$0xff] %v5563_v14  ;;  %7723 = vst [vmem:[#allocation233_spill] sm:$0xff] %v5565_v57 }
 0xb1f   : > { %v5567_v11 = vpop.permute.xlu0 %2572  ;;  %v5569_v10 = vpop.permute.xlu1 %2574 }
 0xb20   : > { %7724 = vst [vmem:[#allocation234_spill] sm:$0xff] %v5567_v11  ;;  %7725 = vst [vmem:[#allocation235_spill] sm:$0xff] %v5569_v10 }
 0xb30   : > { %v2616_v17 = vpop.permute.xlu0 %2615  ;;  %v2621_v6 = vpop.permute.xlu1 %2620 }
 0xb31   : > { %v2633_v15 = vmul.f32 %v2616_v17, %v4363_v2  ;;  %v2634_v9 = vmul.f32 %v2616_v17, %v4366_v3  ;;  %v2636_v62 = vmul.f32 %v2621_v6, %v4363_v2  ;;  %v2635_v14 = vmul.f32 %v2616_v17, %v4371_v8 }
 0xb32   : > { %v2637_v10 = vmul.f32 %v2621_v6, %v4366_v3  ;;  %v2638_v57 = vmul.f32 %v2621_v6, %v4371_v8 }
 0xb33   : > { %2659 = vrot.lane.b32.xlu1 %v2634_v9, %s4166_s22  ;;  %2657 = vrot.lane.b32.xlu0 %v2633_v15, %s4166_s22 }
 0xb34   : > { %v2626_v11 = vpop.permute.xlu0 %2625  ;;  %v2631_v20 = vpop.permute.xlu1 %2630 }
 0xb35   : > { %v2639_v9 = vmul.f32 %v2626_v11, %v4363_v2  ;;  %v2640_v15 = vmul.f32 %v2626_v11, %v4366_v3  ;;  %v2641_v17 = vmul.f32 %v2626_v11, %v4371_v8  ;;  %v2643_v6 = vmul.f32 %v2631_v20, %v4366_v3  ;;  %v4084_v11 = vld [vmem:[%s7273_s1 + $0x338] sm:$0xff] }
 0xb37   : > { %2663 = vrot.lane.b32.xlu1 %v2636_v62, %s4166_s22  ;;  %2661 = vrot.lane.b32.xlu0 %v2635_v14, %s4166_s22  ;;  %v2642_v14 = vmul.f32 %v2631_v20, %v4363_v2  ;;  %v4082_v62 = vld [vmem:[%s7273_s1 + $0x328] sm:$0xff] }
 0xb3b   : > { %2667 = vrot.lane.b32.xlu1 %v2638_v57, %s4166_s22  ;;  %2665 = vrot.lane.b32.xlu0 %v2637_v10, %s4166_s22  ;;  %v2644_v10 = vmul.f32 %v2631_v20, %v4371_v8  ;;  %v4081_v57 = vld [vmem:[%s7273_s1 + $0x320] sm:$0xff]  ;;  %v4083_v20 = vld [vmem:[%s7273_s1 + $0x330] sm:$0xff] }
 0xb3f   : > { %2671 = vrot.lane.b32.xlu1 %v2640_v15, %s4166_s22  ;;  %2669 = vrot.lane.b32.xlu0 %v2639_v9, %s4166_s22 }
 0xb43   : > { %2675 = vrot.lane.b32.xlu1 %v2642_v14, %s4166_s22  ;;  %2673 = vrot.lane.b32.xlu0 %v2641_v17, %s4166_s22 }
 0xb47   : > { %2679 = vrot.lane.b32.xlu1 %v2644_v10, %s4166_s22  ;;  %2677 = vrot.lane.b32.xlu0 %v2643_v6, %s4166_s22 }
 0xb4b   : > { %2726 = vperm.xlu1 %4149, %v4082_v62   ;;  %2721 = vperm.xlu0 %4148, %v4081_v57  }
 0xb4f   : > { %2736 = vperm.xlu1 %4149, %v4084_v11   ;;  %2731 = vperm.xlu0 %4148, %v4083_v20  }
 0xba5   : > { %v5607_v9 = vpop.permute.xlu0 %2657  ;;  %v5609_v15 = vpop.permute.xlu1 %2659 }
 0xba6   : > { %7726 = vst [vmem:[#allocation236_spill] sm:$0xff] %v5607_v9  ;;  %7727 = vst [vmem:[#allocation237_spill] sm:$0xff] %v5609_v15 }
 0xba9   : > { %v5611_v14 = vpop.permute.xlu0 %2661  ;;  %v5613_v17 = vpop.permute.xlu1 %2663 }
 0xbaa   : > { %7728 = vst [vmem:[#allocation238_spill] sm:$0xff] %v5611_v14  ;;  %7729 = vst [vmem:[#allocation239_spill] sm:$0xff] %v5613_v17 }
 0xbad   : > { %v5615_v6 = vpop.permute.xlu0 %2665  ;;  %v5617_v10 = vpop.permute.xlu1 %2667 }
 0xbae   : > { %7730 = vst [vmem:[#allocation240_spill] sm:$0xff] %v5615_v6  ;;  %7731 = vst [vmem:[#allocation241_spill] sm:$0xff] %v5617_v10 }
 0xbb1   : > { %v5619_v62 = vpop.permute.xlu0 %2669  ;;  %v5621_v57 = vpop.permute.xlu1 %2671 }
 0xbb2   : > { %7732 = vst [vmem:[#allocation242_spill] sm:$0xff] %v5619_v62  ;;  %7733 = vst [vmem:[#allocation243_spill] sm:$0xff] %v5621_v57 }
 0xbb5   : > { %v5623_v7 = vpop.permute.xlu0 %2673  ;;  %v5625_v11 = vpop.permute.xlu1 %2675 }
 0xbb6   : > { %7734 = vst [vmem:[#allocation244_spill] sm:$0xff] %v5623_v7  ;;  %7735 = vst [vmem:[#allocation245_spill] sm:$0xff] %v5625_v11 }
 0xbb9   : > { %v5627_v20 = vpop.permute.xlu0 %2677  ;;  %v5629_v9 = vpop.permute.xlu1 %2679 }
 0xbba   : > { %7736 = vst [vmem:[#allocation246_spill] sm:$0xff] %v5627_v20  ;;  %7737 = vst [vmem:[#allocation247_spill] sm:$0xff] %v5629_v9 }
 0xbca   : > { %v2722_v15 = vpop.permute.xlu0 %2721  ;;  %v2727_v6 = vpop.permute.xlu1 %2726 }
 0xbcb   : > { %v2739_v14 = vmul.f32 %v2722_v15, %v4403_v33  ;;  %v2740_v17 = vmul.f32 %v2722_v15, %v4406_v34  ;;  %v2741_v62 = vmul.f32 %v2722_v15, %v4413_v38  ;;  %v2742_v7 = vmul.f32 %v2727_v6, %v4403_v33 }
 0xbcc   : > { %v2743_v9 = vmul.f32 %v2727_v6, %v4406_v34  ;;  %v2744_v11 = vmul.f32 %v2727_v6, %v4413_v38 }
 0xbcd   : > { %2763 = vrot.lane.b32.xlu0 %v2739_v14, %s4166_s22  ;;  %2765 = vrot.lane.b32.xlu1 %v2740_v17, %s4166_s22 }
 0xbce   : > { %v2732_v20 = vpop.permute.xlu0 %2731  ;;  %v2737_v15 = vpop.permute.xlu1 %2736 }
 0xbcf   : > { %v2745_v14 = vmul.f32 %v2732_v20, %v4403_v33  ;;  %v2746_v17 = vmul.f32 %v2732_v20, %v4406_v34  ;;  %v2750_v6 = vmul.f32 %v2737_v15, %v4413_v38 }
 0xbd1   : > { %2767 = vrot.lane.b32.xlu0 %v2741_v62, %s4166_s22  ;;  %2769 = vrot.lane.b32.xlu1 %v2742_v7, %s4166_s22  ;;  %v2747_v7 = vmul.f32 %v2732_v20, %v4413_v38  ;;  %v2748_v62 = vmul.f32 %v2737_v15, %v4403_v33  ;;  %v4086_v20 = vld [vmem:[%s7273_s1 + $0x348] sm:$0xff] }
 0xbd5   : > { %2771 = vrot.lane.b32.xlu0 %v2743_v9, %s4166_s22  ;;  %2773 = vrot.lane.b32.xlu1 %v2744_v11, %s4166_s22  ;;  %v2749_v9 = vmul.f32 %v2737_v15, %v4406_v34  ;;  %v4085_v11 = vld [vmem:[%s7273_s1 + $0x340] sm:$0xff] }
 0xbd9   : > { %2775 = vrot.lane.b32.xlu0 %v2745_v14, %s4166_s22  ;;  %2777 = vrot.lane.b32.xlu1 %v2746_v17, %s4166_s22  ;;  %v4087_v14 = vld [vmem:[%s7273_s1 + $0x350] sm:$0xff]  ;;  %v4088_v17 = vld [vmem:[%s7273_s1 + $0x358] sm:$0xff] }
 0xbdd   : > { %2779 = vrot.lane.b32.xlu0 %v2747_v7, %s4166_s22  ;;  %2781 = vrot.lane.b32.xlu1 %v2748_v62, %s4166_s22 }
 0xbe1   : > { %2783 = vrot.lane.b32.xlu0 %v2749_v9, %s4166_s22  ;;  %2785 = vrot.lane.b32.xlu1 %v2750_v6, %s4166_s22 }
 0xbe5   : > { %2826 = vperm.xlu0 %4148, %v4085_v11   ;;  %2831 = vperm.xlu1 %4149, %v4086_v20  }
 0xbe9   : > { %2836 = vperm.xlu0 %4148, %v4087_v14   ;;  %2841 = vperm.xlu1 %4149, %v4088_v17  }
 0xc3f   : > { %v5667_v15 = vpop.permute.xlu0 %2763  ;;  %v5669_v7 = vpop.permute.xlu1 %2765 }
 0xc40   : > { %7738 = vst [vmem:[#allocation248_spill] sm:$0xff] %v5667_v15  ;;  %7739 = vst [vmem:[#allocation249_spill] sm:$0xff] %v5669_v7 }
 0xc43   : > { %v5671_v62 = vpop.permute.xlu0 %2767  ;;  %v5673_v9 = vpop.permute.xlu1 %2769 }
 0xc44   : > { %7740 = vst [vmem:[#allocation250_spill] sm:$0xff] %v5671_v62  ;;  %7741 = vst [vmem:[#allocation251_spill] sm:$0xff] %v5673_v9 }
 0xc47   : > { %v5675_v6 = vpop.permute.xlu0 %2771  ;;  %v5677_v11 = vpop.permute.xlu1 %2773 }
 0xc48   : > { %7742 = vst [vmem:[#allocation252_spill] sm:$0xff] %v5675_v6  ;;  %7743 = vst [vmem:[#allocation253_spill] sm:$0xff] %v5677_v11 }
 0xc4b   : > { %v5679_v20 = vpop.permute.xlu0 %2775  ;;  %v5681_v57 = vpop.permute.xlu1 %2777 }
 0xc4c   : > { %7744 = vst [vmem:[#allocation254_spill] sm:$0xff] %v5679_v20  ;;  %7745 = vst [vmem:[#allocation255_spill] sm:$0xff] %v5681_v57 }
 0xc4f   : > { %v5683_v10 = vpop.permute.xlu0 %2779  ;;  %v5685_v14 = vpop.permute.xlu1 %2781 }
 0xc50   : > { %7746 = vst [vmem:[#allocation256_spill] sm:$0xff] %v5683_v10  ;;  %7747 = vst [vmem:[#allocation257_spill] sm:$0xff] %v5685_v14 }
 0xc53   : > { %v5687_v17 = vpop.permute.xlu0 %2783  ;;  %v5689_v15 = vpop.permute.xlu1 %2785 }
 0xc54   : > { %7748 = vst [vmem:[#allocation258_spill] sm:$0xff] %v5687_v17  ;;  %7749 = vst [vmem:[#allocation259_spill] sm:$0xff] %v5689_v15 }
 0xc64   : > { %v2827_v7 = vpop.permute.xlu0 %2826  ;;  %v2832_v6 = vpop.permute.xlu1 %2831 }
 0xc65   : > { %v2844_v62 = vmul.f32 %v2827_v7, %v4445_v12  ;;  %v2845_v9 = vmul.f32 %v2827_v7, %v4448_v13  ;;  %v2847_v20 = vmul.f32 %v2832_v6, %v4445_v12  ;;  %v2846_v10 = vmul.f32 %v2827_v7, %v4455_v19 }
 0xc66   : > { %v2848_v15 = vmul.f32 %v2832_v6, %v4448_v13  ;;  %v2849_v14 = vmul.f32 %v2832_v6, %v4455_v19 }
 0xc67   : > { %2870 = vrot.lane.b32.xlu1 %v2845_v9, %s4166_s22  ;;  %2868 = vrot.lane.b32.xlu0 %v2844_v62, %s4166_s22 }
 0xc68   : > { %v2837_v17 = vpop.permute.xlu0 %2836  ;;  %v2842_v57 = vpop.permute.xlu1 %2841 }
 0xc69   : > { %v2850_v9 = vmul.f32 %v2837_v17, %v4445_v12  ;;  %v2851_v62 = vmul.f32 %v2837_v17, %v4448_v13  ;;  %v2852_v7 = vmul.f32 %v2837_v17, %v4455_v19  ;;  %v2854_v6 = vmul.f32 %v2842_v57, %v4448_v13  ;;  %v4092_v17 = vld [vmem:[%s7273_s1 + $0x378] sm:$0xff] }
 0xc6b   : > { %2874 = vrot.lane.b32.xlu1 %v2847_v20, %s4166_s22  ;;  %2872 = vrot.lane.b32.xlu0 %v2846_v10, %s4166_s22  ;;  %v2853_v10 = vmul.f32 %v2842_v57, %v4445_v12  ;;  %v4090_v20 = vld [vmem:[%s7273_s1 + $0x368] sm:$0xff] }
 0xc6f   : > { %2878 = vrot.lane.b32.xlu1 %v2849_v14, %s4166_s22  ;;  %2876 = vrot.lane.b32.xlu0 %v2848_v15, %s4166_s22  ;;  %v2855_v15 = vmul.f32 %v2842_v57, %v4455_v19  ;;  %v4089_v14 = vld [vmem:[%s7273_s1 + $0x360] sm:$0xff]  ;;  %v4091_v57 = vld [vmem:[%s7273_s1 + $0x370] sm:$0xff] }
 0xc73   : > { %2882 = vrot.lane.b32.xlu1 %v2851_v62, %s4166_s22  ;;  %2880 = vrot.lane.b32.xlu0 %v2850_v9, %s4166_s22 }
 0xc77   : > { %2886 = vrot.lane.b32.xlu1 %v2853_v10, %s4166_s22  ;;  %2884 = vrot.lane.b32.xlu0 %v2852_v7, %s4166_s22 }
 0xc7b   : > { %2890 = vrot.lane.b32.xlu1 %v2855_v15, %s4166_s22  ;;  %2888 = vrot.lane.b32.xlu0 %v2854_v6, %s4166_s22 }
 0xc7f   : > { %2936 = vperm.xlu1 %4149, %v4090_v20   ;;  %2931 = vperm.xlu0 %4148, %v4089_v14  }
 0xc83   : > { %2946 = vperm.xlu1 %4149, %v4092_v17   ;;  %2941 = vperm.xlu0 %4148, %v4091_v57  }
 0xcd9   : > { %v5727_v9 = vpop.permute.xlu0 %2868  ;;  %v5729_v62 = vpop.permute.xlu1 %2870 }
 0xcda   : > { %7750 = vst [vmem:[#allocation260_spill] sm:$0xff] %v5727_v9  ;;  %7751 = vst [vmem:[#allocation261_spill] sm:$0xff] %v5729_v62 }
 0xcdd   : > { %v5731_v10 = vpop.permute.xlu0 %2872  ;;  %v5733_v7 = vpop.permute.xlu1 %2874 }
 0xcde   : > { %7752 = vst [vmem:[#allocation262_spill] sm:$0xff] %v5731_v10  ;;  %7753 = vst [vmem:[#allocation263_spill] sm:$0xff] %v5733_v7 }
 0xce1   : > { %v5735_v6 = vpop.permute.xlu0 %2876  ;;  %v5737_v15 = vpop.permute.xlu1 %2878 }
 0xce2   : > { %7754 = vst [vmem:[#allocation264_spill] sm:$0xff] %v5735_v6  ;;  %7755 = vst [vmem:[#allocation265_spill] sm:$0xff] %v5737_v15 }
 0xce5   : > { %v5739_v20 = vpop.permute.xlu0 %2880  ;;  %v5741_v14 = vpop.permute.xlu1 %2882 }
 0xce6   : > { %7756 = vst [vmem:[#allocation266_spill] sm:$0xff] %v5739_v20  ;;  %7757 = vst [vmem:[#allocation267_spill] sm:$0xff] %v5741_v14 }
 0xce9   : > { %v5743_v11 = vpop.permute.xlu0 %2884  ;;  %v5745_v17 = vpop.permute.xlu1 %2886 }
 0xcea   : > { %7758 = vst [vmem:[#allocation268_spill] sm:$0xff] %v5743_v11  ;;  %7759 = vst [vmem:[#allocation269_spill] sm:$0xff] %v5745_v17 }
 0xced   : > { %v5747_v57 = vpop.permute.xlu0 %2888  ;;  %v5749_v9 = vpop.permute.xlu1 %2890 }
 0xcee   : > { %7760 = vst [vmem:[#allocation270_spill] sm:$0xff] %v5747_v57  ;;  %7761 = vst [vmem:[#allocation271_spill] sm:$0xff] %v5749_v9 }
 0xcfe   : > { %v2932_v62 = vpop.permute.xlu0 %2931  ;;  %v2937_v6 = vpop.permute.xlu1 %2936 }
 0xcff   : > { %v2949_v10 = vmul.f32 %v2932_v62, %v4261_v24  ;;  %v2950_v7 = vmul.f32 %v2932_v62, %v4263_v25  ;;  %v2951_v20 = vmul.f32 %v2932_v62, %v4265_v26  ;;  %v2952_v11 = vmul.f32 %v2937_v6, %v4261_v24 }
 0xd00   : > { %v2953_v9 = vmul.f32 %v2937_v6, %v4263_v25  ;;  %v2954_v17 = vmul.f32 %v2937_v6, %v4265_v26 }
 0xd01   : > { %2973 = vrot.lane.b32.xlu0 %v2949_v10, %s4166_s22  ;;  %2975 = vrot.lane.b32.xlu1 %v2950_v7, %s4166_s22 }
 0xd02   : > { %v2942_v57 = vpop.permute.xlu0 %2941  ;;  %v2947_v62 = vpop.permute.xlu1 %2946 }
 0xd03   : > { %v2955_v10 = vmul.f32 %v2942_v57, %v4261_v24  ;;  %v2956_v7 = vmul.f32 %v2942_v57, %v4263_v25  ;;  %v2960_v6 = vmul.f32 %v2947_v62, %v4265_v26 }
 0xd05   : > { %2977 = vrot.lane.b32.xlu0 %v2951_v20, %s4166_s22  ;;  %2979 = vrot.lane.b32.xlu1 %v2952_v11, %s4166_s22  ;;  %v2957_v11 = vmul.f32 %v2942_v57, %v4265_v26  ;;  %v2958_v20 = vmul.f32 %v2947_v62, %v4261_v24  ;;  %v4094_v57 = vld [vmem:[%s7273_s1 + $0x388] sm:$0xff] }
 0xd09   : > { %2981 = vrot.lane.b32.xlu0 %v2953_v9, %s4166_s22  ;;  %2983 = vrot.lane.b32.xlu1 %v2954_v17, %s4166_s22  ;;  %v2959_v9 = vmul.f32 %v2947_v62, %v4263_v25  ;;  %v4093_v17 = vld [vmem:[%s7273_s1 + $0x380] sm:$0xff] }
 0xd0d   : > { %2985 = vrot.lane.b32.xlu0 %v2955_v10, %s4166_s22  ;;  %2987 = vrot.lane.b32.xlu1 %v2956_v7, %s4166_s22  ;;  %v4095_v10 = vld [vmem:[%s7273_s1 + $0x390] sm:$0xff]  ;;  %v4096_v7 = vld [vmem:[%s7273_s1 + $0x398] sm:$0xff] }
 0xd11   : > { %2989 = vrot.lane.b32.xlu0 %v2957_v11, %s4166_s22  ;;  %2991 = vrot.lane.b32.xlu1 %v2958_v20, %s4166_s22 }
 0xd15   : > { %2993 = vrot.lane.b32.xlu0 %v2959_v9, %s4166_s22  ;;  %2995 = vrot.lane.b32.xlu1 %v2960_v6, %s4166_s22  ;;  %s4167_s22 = smov 91  }
 0xd19   : > { %3036 = vperm.xlu0 %4148, %v4093_v17   ;;  %3041 = vperm.xlu1 %4149, %v4094_v57  }
 0xd1d   : > { %3046 = vperm.xlu0 %4148, %v4095_v10   ;;  %3051 = vperm.xlu1 %4149, %v4096_v7  }
 0xd73   : > { %v5787_v62 = vpop.permute.xlu0 %2973  ;;  %v5789_v11 = vpop.permute.xlu1 %2975 }
 0xd74   : > { %7762 = vst [vmem:[#allocation272_spill] sm:$0xff] %v5787_v62  ;;  %7763 = vst [vmem:[#allocation273_spill] sm:$0xff] %v5789_v11 }
 0xd77   : > { %v5791_v20 = vpop.permute.xlu0 %2977  ;;  %v5793_v9 = vpop.permute.xlu1 %2979 }
 0xd78   : > { %7764 = vst [vmem:[#allocation274_spill] sm:$0xff] %v5791_v20  ;;  %7765 = vst [vmem:[#allocation275_spill] sm:$0xff] %v5793_v9 }
 0xd7b   : > { %v5795_v6 = vpop.permute.xlu0 %2981  ;;  %v5797_v17 = vpop.permute.xlu1 %2983 }
 0xd7c   : > { %7766 = vst [vmem:[#allocation276_spill] sm:$0xff] %v5795_v6  ;;  %7767 = vst [vmem:[#allocation277_spill] sm:$0xff] %v5797_v17 }
 0xd7f   : > { %v5799_v57 = vpop.permute.xlu0 %2985  ;;  %v5801_v14 = vpop.permute.xlu1 %2987 }
 0xd80   : > { %7768 = vst [vmem:[#allocation278_spill] sm:$0xff] %v5799_v57  ;;  %7769 = vst [vmem:[#allocation279_spill] sm:$0xff] %v5801_v14 }
 0xd83   : > { %v5803_v15 = vpop.permute.xlu0 %2989  ;;  %v5805_v10 = vpop.permute.xlu1 %2991 }
 0xd84   : > { %7770 = vst [vmem:[#allocation280_spill] sm:$0xff] %v5803_v15  ;;  %7771 = vst [vmem:[#allocation281_spill] sm:$0xff] %v5805_v10 }
 0xd87   : > { %v5807_v7 = vpop.permute.xlu0 %2993  ;;  %v5809_v62 = vpop.permute.xlu1 %2995 }
 0xd88   : > { %7772 = vst [vmem:[#allocation282_spill] sm:$0xff] %v5807_v7  ;;  %7773 = vst [vmem:[#allocation283_spill] sm:$0xff] %v5809_v62 }
 0xd98   : > { %v3037_v11 = vpop.permute.xlu0 %3036  ;;  %v3042_v6 = vpop.permute.xlu1 %3041 }
 0xd99   : > { %v3054_v20 = vmul.f32 %v3037_v11, %v4363_v2  ;;  %v3055_v9 = vmul.f32 %v3037_v11, %v4366_v3  ;;  %v3057_v57 = vmul.f32 %v3042_v6, %v4363_v2  ;;  %v3056_v15 = vmul.f32 %v3037_v11, %v4371_v8 }
 0xd9a   : > { %v3058_v62 = vmul.f32 %v3042_v6, %v4366_v3  ;;  %v3059_v10 = vmul.f32 %v3042_v6, %v4371_v8 }
 0xd9b   : > { %3080 = vrot.lane.b32.xlu1 %v3055_v9, %s4167_s22  ;;  %3078 = vrot.lane.b32.xlu0 %v3054_v20, %s4167_s22 }
 0xd9c   : > { %v3047_v7 = vpop.permute.xlu0 %3046  ;;  %v3052_v14 = vpop.permute.xlu1 %3051 }
 0xd9d   : > { %v3060_v9 = vmul.f32 %v3047_v7, %v4363_v2  ;;  %v3061_v20 = vmul.f32 %v3047_v7, %v4366_v3  ;;  %v3062_v11 = vmul.f32 %v3047_v7, %v4371_v8  ;;  %v3064_v6 = vmul.f32 %v3052_v14, %v4366_v3  ;;  %v4100_v7 = vld [vmem:[%s7273_s1 + $0x3b8] sm:$0xff] }
 0xd9f   : > { %3084 = vrot.lane.b32.xlu1 %v3057_v57, %s4167_s22  ;;  %3082 = vrot.lane.b32.xlu0 %v3056_v15, %s4167_s22  ;;  %v3063_v15 = vmul.f32 %v3052_v14, %v4363_v2  ;;  %v4098_v57 = vld [vmem:[%s7273_s1 + $0x3a8] sm:$0xff] }
 0xda3   : > { %3088 = vrot.lane.b32.xlu1 %v3059_v10, %s4167_s22  ;;  %3086 = vrot.lane.b32.xlu0 %v3058_v62, %s4167_s22  ;;  %v3065_v62 = vmul.f32 %v3052_v14, %v4371_v8  ;;  %v4097_v10 = vld [vmem:[%s7273_s1 + $0x3a0] sm:$0xff]  ;;  %v4099_v14 = vld [vmem:[%s7273_s1 + $0x3b0] sm:$0xff] }
 0xda7   : > { %3092 = vrot.lane.b32.xlu1 %v3061_v20, %s4167_s22  ;;  %3090 = vrot.lane.b32.xlu0 %v3060_v9, %s4167_s22 }
 0xdab   : > { %3096 = vrot.lane.b32.xlu1 %v3063_v15, %s4167_s22  ;;  %3094 = vrot.lane.b32.xlu0 %v3062_v11, %s4167_s22 }
 0xdaf   : > { %3100 = vrot.lane.b32.xlu1 %v3065_v62, %s4167_s22  ;;  %3098 = vrot.lane.b32.xlu0 %v3064_v6, %s4167_s22 }
 0xdb3   : > { %3147 = vperm.xlu1 %4149, %v4098_v57   ;;  %3142 = vperm.xlu0 %4148, %v4097_v10  }
 0xdb7   : > { %3157 = vperm.xlu1 %4149, %v4100_v7   ;;  %3152 = vperm.xlu0 %4148, %v4099_v14  }
 0xe0d   : > { %v5847_v9 = vpop.permute.xlu0 %3078  ;;  %v5849_v20 = vpop.permute.xlu1 %3080 }
 0xe0e   : > { %7774 = vst [vmem:[#allocation284_spill] sm:$0xff] %v5847_v9  ;;  %7775 = vst [vmem:[#allocation285_spill] sm:$0xff] %v5849_v20 }
 0xe11   : > { %v5851_v15 = vpop.permute.xlu0 %3082  ;;  %v5853_v11 = vpop.permute.xlu1 %3084 }
 0xe12   : > { %7776 = vst [vmem:[#allocation286_spill] sm:$0xff] %v5851_v15  ;;  %7777 = vst [vmem:[#allocation287_spill] sm:$0xff] %v5853_v11 }
 0xe15   : > { %v5855_v6 = vpop.permute.xlu0 %3086  ;;  %v5857_v62 = vpop.permute.xlu1 %3088 }
 0xe16   : > { %7778 = vst [vmem:[#allocation288_spill] sm:$0xff] %v5855_v6  ;;  %7779 = vst [vmem:[#allocation289_spill] sm:$0xff] %v5857_v62 }
 0xe19   : > { %v5859_v57 = vpop.permute.xlu0 %3090  ;;  %v5861_v10 = vpop.permute.xlu1 %3092 }
 0xe1a   : > { %7780 = vst [vmem:[#allocation290_spill] sm:$0xff] %v5859_v57  ;;  %7781 = vst [vmem:[#allocation291_spill] sm:$0xff] %v5861_v10 }
 0xe1d   : > { %v5863_v17 = vpop.permute.xlu0 %3094  ;;  %v5865_v7 = vpop.permute.xlu1 %3096 }
 0xe1e   : > { %7782 = vst [vmem:[#allocation292_spill] sm:$0xff] %v5863_v17  ;;  %7783 = vst [vmem:[#allocation293_spill] sm:$0xff] %v5865_v7 }
 0xe21   : > { %v5867_v14 = vpop.permute.xlu0 %3098  ;;  %v5869_v9 = vpop.permute.xlu1 %3100 }
 0xe22   : > { %7784 = vst [vmem:[#allocation294_spill] sm:$0xff] %v5867_v14  ;;  %7785 = vst [vmem:[#allocation295_spill] sm:$0xff] %v5869_v9 }
 0xe32   : > { %v3143_v20 = vpop.permute.xlu0 %3142  ;;  %v3148_v6 = vpop.permute.xlu1 %3147 }
 0xe33   : > { %v3160_v15 = vmul.f32 %v3143_v20, %v4403_v33  ;;  %v3161_v11 = vmul.f32 %v3143_v20, %v4406_v34  ;;  %v3162_v57 = vmul.f32 %v3143_v20, %v4413_v38  ;;  %v3163_v17 = vmul.f32 %v3148_v6, %v4403_v33 }
 0xe34   : > { %v3164_v9 = vmul.f32 %v3148_v6, %v4406_v34  ;;  %v3165_v7 = vmul.f32 %v3148_v6, %v4413_v38 }
 0xe35   : > { %3184 = vrot.lane.b32.xlu0 %v3160_v15, %s4167_s22  ;;  %3186 = vrot.lane.b32.xlu1 %v3161_v11, %s4167_s22 }
 0xe36   : > { %v3153_v14 = vpop.permute.xlu0 %3152  ;;  %v3158_v20 = vpop.permute.xlu1 %3157 }
 0xe37   : > { %v3166_v15 = vmul.f32 %v3153_v14, %v4403_v33  ;;  %v3167_v11 = vmul.f32 %v3153_v14, %v4406_v34  ;;  %v3171_v6 = vmul.f32 %v3158_v20, %v4413_v38 }
 0xe39   : > { %3188 = vrot.lane.b32.xlu0 %v3162_v57, %s4167_s22  ;;  %3190 = vrot.lane.b32.xlu1 %v3163_v17, %s4167_s22  ;;  %v3168_v17 = vmul.f32 %v3153_v14, %v4413_v38  ;;  %v3169_v57 = vmul.f32 %v3158_v20, %v4403_v33  ;;  %v4102_v14 = vld [vmem:[%s7273_s1 + $0x3c8] sm:$0xff] }
 0xe3d   : > { %3192 = vrot.lane.b32.xlu0 %v3164_v9, %s4167_s22  ;;  %3194 = vrot.lane.b32.xlu1 %v3165_v7, %s4167_s22  ;;  %v3170_v9 = vmul.f32 %v3158_v20, %v4406_v34  ;;  %v4101_v7 = vld [vmem:[%s7273_s1 + $0x3c0] sm:$0xff] }
 0xe41   : > { %3196 = vrot.lane.b32.xlu0 %v3166_v15, %s4167_s22  ;;  %3198 = vrot.lane.b32.xlu1 %v3167_v11, %s4167_s22  ;;  %v4103_v15 = vld [vmem:[%s7273_s1 + $0x3d0] sm:$0xff]  ;;  %v4104_v11 = vld [vmem:[%s7273_s1 + $0x3d8] sm:$0xff] }
 0xe45   : > { %3200 = vrot.lane.b32.xlu0 %v3168_v17, %s4167_s22  ;;  %3202 = vrot.lane.b32.xlu1 %v3169_v57, %s4167_s22 }
 0xe49   : > { %3204 = vrot.lane.b32.xlu0 %v3170_v9, %s4167_s22  ;;  %3206 = vrot.lane.b32.xlu1 %v3171_v6, %s4167_s22 }
 0xe4d   : > { %3247 = vperm.xlu0 %4148, %v4101_v7   ;;  %3252 = vperm.xlu1 %4149, %v4102_v14  }
 0xe51   : > { %3257 = vperm.xlu0 %4148, %v4103_v15   ;;  %3262 = vperm.xlu1 %4149, %v4104_v11  }
 0xea7   : > { %v5907_v20 = vpop.permute.xlu0 %3184  ;;  %v5909_v17 = vpop.permute.xlu1 %3186 }
 0xea8   : > { %7786 = vst [vmem:[#allocation296_spill] sm:$0xff] %v5907_v20  ;;  %7787 = vst [vmem:[#allocation297_spill] sm:$0xff] %v5909_v17 }
 0xeab   : > { %v5911_v57 = vpop.permute.xlu0 %3188  ;;  %v5913_v9 = vpop.permute.xlu1 %3190 }
 0xeac   : > { %7788 = vst [vmem:[#allocation298_spill] sm:$0xff] %v5911_v57  ;;  %7789 = vst [vmem:[#allocation299_spill] sm:$0xff] %v5913_v9 }
 0xeaf   : > { %v5915_v6 = vpop.permute.xlu0 %3192  ;;  %v5917_v7 = vpop.permute.xlu1 %3194 }
 0xeb0   : > { %7790 = vst [vmem:[#allocation300_spill] sm:$0xff] %v5915_v6  ;;  %7791 = vst [vmem:[#allocation301_spill] sm:$0xff] %v5917_v7  ;;  %v327_v7 = vmul.f32 %v4403_v33, %v4331_v50 }
 0xeb3   : > { %v5919_v14 = vpop.permute.xlu0 %3196  ;;  %v5921_v10 = vpop.permute.xlu1 %3198 }
 0xeb4   : > { %7792 = vst [vmem:[#allocation302_spill] sm:$0xff] %v5919_v14  ;;  %7793 = vst [vmem:[#allocation303_spill] sm:$0xff] %v5921_v10  ;;  %v253_v10 = vmul.f32 %v4371_v8, %v4323_v46 }
 0xeb7   : > { %v5923_v62 = vpop.permute.xlu0 %3200  ;;  %v5925_v15 = vpop.permute.xlu1 %3202 }
 0xeb8   : > { %7794 = vst [vmem:[#allocation304_spill] sm:$0xff] %v5923_v62  ;;  %7795 = vst [vmem:[#allocation305_spill] sm:$0xff] %v5925_v15  ;;  %v4105_v15 = vld [vmem:[%s7273_s1 + $0x3e0] sm:$0xff] }
 0xebb   : > { %v5927_v11 = vpop.permute.xlu0 %3204  ;;  %v5929_v20 = vpop.permute.xlu1 %3206 }
 0xebc   : > { %7796 = vst [vmem:[#allocation306_spill] sm:$0xff] %v5927_v11  ;;  %7797 = vst [vmem:[#allocation307_spill] sm:$0xff] %v5929_v20  ;;  %v4106_v20 = vld [vmem:[%s7273_s1 + $0x3e8] sm:$0xff]  ;;  %v332_v11 = vmul.f32 %v4413_v38, %v4329_v49 }
 0xecc   : > { %v3248_v17 = vpop.permute.xlu0 %3247  ;;  %v3253_v6 = vpop.permute.xlu1 %3252 }
 0xecd   : > { %v3265_v57 = vmul.f32 %v3248_v17, %v4445_v12  ;;  %v3266_v9 = vmul.f32 %v3248_v17, %v4448_v13  ;;  %v3268_v14 = vmul.f32 %v3253_v6, %v4445_v12  ;;  %v3267_v62 = vmul.f32 %v3248_v17, %v4455_v19  ;;  %v4107_v17 = vld [vmem:[%s7273_s1 + $0x3f0] sm:$0xff] }
 0xecf   : > { %3291 = vrot.lane.b32.xlu1 %v3266_v9, %s4167_s22  ;;  %3289 = vrot.lane.b32.xlu0 %v3265_v57, %s4167_s22  ;;  %v4109_v57 = vld [vmem:[%s7273_s1 + $0x400] sm:$0xff]  ;;  %v4110_v9 = vld [vmem:[%s7273_s1 + $0x408] sm:$0xff] }
 0xed3   : > { %3295 = vrot.lane.b32.xlu1 %v3268_v14, %s4167_s22  ;;  %3293 = vrot.lane.b32.xlu0 %v3267_v62, %s4167_s22  ;;  %v4108_v62 = vld [vmem:[%s7273_s1 + $0x3f8] sm:$0xff]  ;;  %v4111_v14 = vld [vmem:[%s7273_s1 + $0x410] sm:$0xff] }
 0xed7   : > { %3357 = vperm.xlu1 %4149, %v4106_v20   ;;  %3352 = vperm.xlu0 %4148, %v4105_v15   ;;  %v4113_v20 = vld [vmem:[%s7273_s1 + $0x420] sm:$0xff]  ;;  %v4112_v15 = vld [vmem:[%s7273_s1 + $0x418] sm:$0xff] }
 0xedb   : > { %3457 = vperm.xlu1 %4149, %v4109_v57   ;;  %3362 = vperm.xlu0 %4148, %v4107_v17   ;;  %v4114_v57 = vld [vmem:[%s7273_s1 + $0x428] sm:$0xff]  ;;  %v4117_v17 = vld [vmem:[%s7273_s1 + $0x440] sm:$0xff] }
 0xedf   : > { %3367 = vperm.xlu1 %4149, %v4108_v62   ;;  %3462 = vperm.xlu0 %4148, %v4110_v9   ;;  %v4115_v62 = vld [vmem:[%s7273_s1 + $0x430] sm:$0xff]  ;;  %v4116_v9 = vld [vmem:[%s7273_s1 + $0x438] sm:$0xff] }
 0xee3   : > { %3563 = vperm.xlu1 %4149, %v4113_v20   ;;  %3467 = vperm.xlu0 %4148, %v4111_v14   ;;  %v4118_v20 = vld [vmem:[%s7273_s1 + $0x448] sm:$0xff]  ;;  %v4121_v14 = vld [vmem:[%s7273_s1 + $0x460] sm:$0xff] }
 0xee7   : > { %3472 = vperm.xlu1 %4149, %v4112_v15   ;;  %3568 = vperm.xlu0 %4148, %v4114_v57   ;;  %v4119_v15 = vld [vmem:[%s7273_s1 + $0x450] sm:$0xff]  ;;  %v4120_v57 = vld [vmem:[%s7273_s1 + $0x458] sm:$0xff] }
 0xeeb   : > { %3668 = vperm.xlu1 %4149, %v4117_v17   ;;  %3573 = vperm.xlu0 %4148, %v4115_v62   ;;  %v4122_v17 = vld [vmem:[%s7273_s1 + $0x468] sm:$0xff]  ;;  %v4124_v62 = vld [vmem:[%s7273_s1 + $0x478] sm:$0xff] }
 0xeef   : > { %3578 = vperm.xlu1 %4149, %v4116_v9   ;;  %3673 = vperm.xlu0 %4148, %v4118_v20   ;;  %v4123_v9 = vld [vmem:[%s7273_s1 + $0x470] sm:$0xff]  ;;  %v3269_v20 = vmul.f32 %v3253_v6, %v4448_v13 }
 0xef3   : > { %3773 = vperm.xlu1 %4149, %v4121_v14   ;;  %3678 = vperm.xlu0 %4148, %v4119_v15   ;;  %v3270_v14 = vmul.f32 %v3253_v6, %v4455_v19  ;;  %v3258_v15 = vpop.permute.xlu0 %3257  ;;  %v257_v6 = vmul.f32 %v4363_v2, %v4321_v45 }
 0xef7   : > { %3683 = vperm.xlu1 %4149, %v4120_v57   ;;  %3778 = vperm.xlu0 %4148, %v4122_v17   ;;  %v3271_v57 = vmul.f32 %v3258_v15, %v4445_v12  ;;  %v3272_v17 = vmul.f32 %v3258_v15, %v4448_v13 }
 0xefb   : > { %3788 = vperm.xlu1 %4149, %v4124_v62   ;;  %3783 = vperm.xlu0 %4148, %v4123_v9   ;;  %v3273_v62 = vmul.f32 %v3258_v15, %v4455_v19  ;;  %v6009_v9 = vpop.permute.xlu1 %3262  ;;  %v330_v15 = vmul.f32 %v4403_v33, %v4329_v49 }
 0xefc   : > { %7798 = vst [vmem:[#allocation308_spill] sm:$0xff] %v6009_v9 }
 0xefd   : > { %v342_v43 = vadd.f32 %v330_v15, %v254_v1  ;;  %v406_v1 = vmul.f32 %v4445_v12, %v4337_v53  ;;  %v403_v15 = vmul.f32 %v4445_v12, %v4339_v54 }
 0xeff   : > { %3299 = vrot.lane.b32.xlu1 %v3270_v14, %s4167_s22  ;;  %3297 = vrot.lane.b32.xlu0 %v3269_v20, %s4167_s22  ;;  %v258_v20 = vmul.f32 %v4366_v3, %v4321_v45  ;;  %v259_v14 = vmul.f32 %v4371_v8, %v4321_v45  ;;  %v260_v45 = vmul.f32 %v4363_v2, %v4325_v47 }
 0xf00   : > { %v333_v47 = vmul.f32 %v4403_v33, %v4335_v52 }
 0xf03   : > { %3303 = vrot.lane.b32.xlu1 %v3272_v17, %s4167_s22  ;;  %3301 = vrot.lane.b32.xlu0 %v3271_v57, %s4167_s22  ;;  %v251_v17 = vmul.f32 %v4363_v2, %v4323_v46  ;;  %v252_v57 = vmul.f32 %v4366_v3, %v4323_v46  ;;  %v329_v2 = vmul.f32 %v4413_v38, %v4331_v50 }
 0xf04   : > { %v338_v3 = vmul.f32 %v4413_v38, %v4333_v51  ;;  %v334_v50 = vmul.f32 %v4406_v34, %v4335_v52 }
 0xf07   : > { %3305 = vrot.lane.b32.xlu0 %v3273_v62, %s4167_s22  ;;  %v331_v62 = vmul.f32 %v4406_v34, %v4329_v49  ;;  %v256_v49 = vmul.f32 %v4371_v8, %v4327_v48  ;;  %v336_v48 = vmul.f32 %v4403_v33, %v4333_v51  ;;  %v418_v33 = vadd.f32 %v406_v1, %v342_v43 }
 0xf09   : > { %v343_v41 = vadd.f32 %v331_v62, %v255_v58  ;;  %v344_v39 = vadd.f32 %v332_v11, %v256_v49  ;;  %v335_v58 = vmul.f32 %v4413_v38, %v4335_v52  ;;  %v340_v11 = vadd.f32 %v328_v44, %v252_v57 }
 0xf0a   : > { %v341_v62 = vadd.f32 %v329_v2, %v253_v10  ;;  %v348_v49 = vadd.f32 %v336_v48, %v260_v45  ;;  %v404_v52 = vmul.f32 %v4448_v13, %v4339_v54  ;;  %v405_v38 = vmul.f32 %v4455_v19, %v4339_v54 }
 0xf0b   : > { %v412_v44 = vmul.f32 %v4445_v12, %v4341_v55  ;;  %v413_v57 = vmul.f32 %v4448_v13, %v4341_v55  ;;  %v414_v48 = vmul.f32 %v4455_v19, %v4341_v55  ;;  %v483_v55 = vmul.f32 %v4263_v25, %v4349_v59 }
 0xf0c   : > { %v416_v42 = vadd.f32 %v404_v52, %v340_v11  ;;  %v417_v54 = vadd.f32 %v405_v38, %v341_v62  ;;  %v484_v38 = vmul.f32 %v4265_v26, %v4349_v59 }
 0xf41   : > { %v3292_v9 = vpop.permute.xlu1 %3291  ;;  %v3290_v5 = vpop.permute.xlu0 %3289 }
 0xf42   : > { %v6040_v46 = vsel %vm3102_vm0, %v3290_v5, %v3292_v9  ;;  %v339_v5 = vadd.f32 %v327_v7, %v251_v17  ;;  %v408_v17 = vmul.f32 %v4455_v19, %v4337_v53 }
 0xf43   : > { %7799 = vst [vmem:[#allocation309_spill] sm:$0xff] %v6040_v46  ;;  %v337_v46 = vmul.f32 %v4406_v34, %v4333_v51  ;;  %v407_v51 = vmul.f32 %v4448_v13, %v4337_v53  ;;  %v345_v53 = vadd.f32 %v333_v47, %v257_v6  ;;  %v347_v34 = vadd.f32 %v335_v58, %v259_v14 }
 0xf44   : > { %v420_v10 = vadd.f32 %v408_v17, %v344_v39  ;;  %v415_v45 = vadd.f32 %v403_v15, %v339_v5  ;;  %v411_v6 = vmul.f32 %v4455_v19, %v4343_v56  ;;  %v482_v39 = vmul.f32 %v4261_v24, %v4349_v59 }
 0xf45   : > { %v6058_v8 = vpop.permute.xlu0 %3293  ;;  %v419_v2 = vadd.f32 %v407_v51, %v343_v41  ;;  %v479_v41 = vmul.f32 %v4261_v24, %v4351_v60  ;;  %v488_v14 = vmul.f32 %v4261_v24, %v4356_v63  ;;  %v489_v47 = vmul.f32 %v4263_v25, %v4356_v63  ;;  %v6116_v62 = vpop.permute.xlu1 %3295 }
 0xf46   : > { %7800 = vst [vmem:[#allocation310_spill] sm:$0xff] %v6058_v8  ;;  %v6068_v7 = vsel %vm3102_vm0, %v3292_v9, %v6058_v8  ;;  %v349_v9 = vadd.f32 %v337_v46, %v261_v4  ;;  %v346_v8 = vadd.f32 %v334_v50, %v258_v20  ;;  %v424_v4 = vadd.f32 %v412_v44, %v348_v49 }
 0xf47   : > { %7801 = vst [vmem:[#allocation311_spill] sm:$0xff] %v6068_v7  ;;  %v350_v7 = vadd.f32 %v338_v3, %v262_v61  ;;  %v409_v3 = vmul.f32 %v4445_v12, %v4343_v56  ;;  %v410_v61 = vmul.f32 %v4448_v13, %v4343_v56  ;;  %v480_v20 = vmul.f32 %v4263_v25, %v4351_v60 }
 0xf48   : > { %v425_v46 = vadd.f32 %v413_v57, %v349_v9  ;;  %v481_v56 = vmul.f32 %v4265_v26, %v4351_v60  ;;  %v490_v59 = vmul.f32 %v4265_v26, %v4356_v63  ;;  %v485_v50 = vmul.f32 %v4261_v24, %v4358_v0 }
 0xf49   : > { %v426_v43 = vadd.f32 %v414_v48, %v350_v7  ;;  %v421_v5 = vadd.f32 %v409_v3, %v345_v53  ;;  %v422_v58 = vadd.f32 %v410_v61, %v346_v8  ;;  %v423_v1 = vadd.f32 %v411_v6, %v347_v34 }
 0xf4a   : > { %v486_v7 = vmul.f32 %v4263_v25, %v4358_v0  ;;  %v487_v60 = vmul.f32 %v4265_v26, %v4358_v0  ;;  %v494_v11 = vadd.f32 %v482_v39, %v418_v33  ;;  %v495_v51 = vadd.f32 %v483_v55, %v419_v2 }
 0xf4b   : > { %v496_v17 = vadd.f32 %v484_v38, %v420_v10  ;;  %v491_v15 = vadd.f32 %v479_v41, %v415_v45  ;;  %v492_v49 = vadd.f32 %v480_v20, %v416_v42  ;;  %v493_v52 = vadd.f32 %v481_v56, %v417_v54  ;;  %v7803_v38 = vld [vmem:[#allocation11_spill] sm:$0xff]  ;;  %v7804_v20 = vld [vmem:[#allocation12_spill] sm:$0xff]  ;;  %v7805_v56 = vld [vmem:[#allocation14_spill] sm:$0xff] }
 0xf4c   : > { %v500_v63 = vadd.f32 %v488_v14, %v424_v4  ;;  %v577_v8 = vsel %vm576_vm1, %v4517_v18, %v4515_v16  ;;  %v501_v34 = vadd.f32 %v489_v47, %v425_v46  ;;  %v502_v9 = vadd.f32 %v490_v59, %v426_v43  ;;  %v7806_v14 = vld [vmem:[#allocation15_spill] sm:$0xff] }
 0xf4d   : > { %v497_v44 = vadd.f32 %v485_v50, %v421_v5  ;;  %v578_v0 = vsel %vm576_vm1, %v4515_v16, %v4521_v22  ;;  %v498_v33 = vadd.f32 %v486_v7, %v422_v58  ;;  %v499_v57 = vadd.f32 %v487_v60, %v423_v1  ;;  %v7807_v50 = vld [vmem:[#allocation17_spill] sm:$0xff] }
 0xf4e   : > { %v579_v53 = vsel %vm576_vm1, %v4519_v21, %v4525_v27  ;;  %v580_v42 = vsel %vm576_vm1, %v4525_v27, %v4523_v23  ;;  %v597_v2 = vadd.f32 %v577_v8, %v491_v15  ;;  %v599_v18 = vadd.f32 %v4521_v22, %v493_v52  ;;  %v7811_v8 = vld [vmem:[#allocation20_spill] sm:$0xff] }
 0xf4f   : > { %v581_v10 = vsel %vm576_vm1, %v4529_v29, %v4527_v28  ;;  %v582_v16 = vsel %vm576_vm1, %v4527_v28, %v4533_v31  ;;  %v598_v54 = vadd.f32 %v578_v0, %v492_v49  ;;  %v602_v21 = vadd.f32 %v4523_v23, %v496_v17  ;;  %v7809_v17 = vld [vmem:[#allocation16_spill] sm:$0xff] }
 0xf50   : > { %v583_v27 = vsel %vm576_vm1, %v4531_v30, %v4537_v35  ;;  %v600_v22 = vadd.f32 %v579_v53, %v494_v11  ;;  %v601_v61 = vadd.f32 %v580_v42, %v495_v51  ;;  %v584_v29 = vsel %vm576_vm1, %v4537_v35, %v4535_v32  ;;  %v7802_v35 = vld [vmem:[#allocation13_spill] sm:$0xff]  ;;  %v7808_v51 = vld [vmem:[#allocation19_spill] sm:$0xff] }
 0xf51   : > { %v603_v28 = vadd.f32 %v581_v10, %v497_v44  ;;  %v604_v46 = vadd.f32 %v582_v16, %v498_v33  ;;  %v605_v6 = vadd.f32 %v4533_v31, %v499_v57  ;;  %v682_v23 = vsel %vm576_vm1, %v4541_v37, %v4539_v36  ;;  %v7813_v53 = vld [vmem:[#allocation23_spill] sm:$0xff]  ;;  %v7814_v16 = vld [vmem:[#allocation25_spill] sm:$0xff] }
 0xf52   : > { %v608_v30 = vadd.f32 %v4535_v32, %v502_v9  ;;  %v606_v39 = vadd.f32 %v583_v27, %v500_v63  ;;  %v683_v55 = vsel %vm576_vm1, %v4539_v36, %v4545_v40  ;;  %v684_v41 = vsel %vm576_vm1, %v7803_v38, %v7802_v35  ;;  %v7810_v63 = vld [vmem:[#allocation18_spill] sm:$0xff] }
 0xf53   : > { %v607_v37 = vadd.f32 %v584_v29, %v501_v34  ;;  %v685_v32 = vsel %vm576_vm1, %v7802_v35, %v7804_v20  ;;  %v686_v5 = vsel %vm576_vm1, %v7806_v14, %v7805_v56  ;;  %v702_v47 = vadd.f32 %v682_v23, %v597_v2  ;;  %v7812_v34 = vld [vmem:[#allocation21_spill] sm:$0xff]  ;;  %v7817_v29 = vld [vmem:[#allocation26_spill] sm:$0xff] }
 0xf54   : > { %v704_v59 = vadd.f32 %v4545_v40, %v599_v18  ;;  %v687_v58 = vsel %vm576_vm1, %v7805_v56, %v7807_v50  ;;  %v703_v7 = vadd.f32 %v683_v55, %v598_v54  ;;  %v707_v60 = vadd.f32 %v7804_v20, %v602_v21  ;;  %v7820_v38 = vld [vmem:[#allocation30_spill] sm:$0xff]  ;;  %v7822_v20 = vld [vmem:[#allocation31_spill] sm:$0xff]  ;;  %v7823_v56 = vld [vmem:[#allocation308_spill] sm:$0xff] }
 0xf55   : > { %v705_v11 = vadd.f32 %v684_v41, %v600_v22  ;;  %v688_v15 = vsel %vm576_vm1, %v7809_v17, %v7808_v51  ;;  %v706_v49 = vadd.f32 %v685_v32, %v601_v61  ;;  %v708_v52 = vadd.f32 %v686_v5, %v603_v28  ;;  %v7816_v22 = vld [vmem:[#allocation24_spill] sm:$0xff]  ;;  %v7821_v41 = vld [vmem:[#allocation29_spill] sm:$0xff] }
 0xf56   : > { %v3358_v45 = vpop.permute.xlu1 %3357  ;;  %v3353_v48 = vpop.permute.xlu0 %3352  ;;  %v689_v40 = vsel %vm576_vm1, %v7808_v51, %v7810_v63  ;;  %v787_v9 = vsel %vm576_vm1, %v7812_v34, %v7811_v8  ;;  %v709_v33 = vadd.f32 %v687_v58, %v604_v46  ;;  %v710_v57 = vadd.f32 %v7807_v50, %v605_v6 }
 0xf57   : > { %v3370_v3 = vmul.f32 %v3353_v48, %v4261_v24  ;;  %v3371_v4 = vmul.f32 %v3353_v48, %v4263_v25  ;;  %v3372_v36 = vmul.f32 %v3353_v48, %v4265_v26  ;;  %v3373_v1 = vmul.f32 %v3358_v45, %v4261_v24  ;;  %v7815_v48 = vld [vmem:[#allocation22_spill] sm:$0xff] }
 0xf58   : > { %v788_v42 = vsel %vm576_vm1, %v7811_v8, %v7813_v53  ;;  %v3374_v2 = vmul.f32 %v3358_v45, %v4263_v25  ;;  %v713_v18 = vadd.f32 %v7810_v63, %v608_v30  ;;  %v711_v10 = vadd.f32 %v688_v15, %v606_v39  ;;  %v7819_v30 = vld [vmem:[#allocation28_spill] sm:$0xff] }
 0xf59   : > { %3394 = vrot.lane.b32.xlu1 %v3370_v3, %s4167_s22  ;;  %3396 = vrot.lane.b32.xlu0 %v3371_v4, %s4167_s22  ;;  %v789_v54 = vsel %vm576_vm1, %v7815_v48, %v7814_v16  ;;  %v3375_v21 = vmul.f32 %v3358_v45, %v4265_v26  ;;  %v712_v27 = vadd.f32 %v689_v40, %v607_v37  ;;  %v7818_v4 = vld [vmem:[#allocation27_spill] sm:$0xff]  ;;  %v7829_v40 = vld [vmem:[#allocation37_spill] sm:$0xff] }
 0xf5a   : > { %v6159_v31 = vpop.permute.xlu1 %3457  ;;  %v6161_v43 = vpop.permute.xlu0 %3362  ;;  %v807_v3 = vadd.f32 %v787_v9, %v702_v47  ;;  %v790_v61 = vsel %vm576_vm1, %v7814_v16, %v7816_v22  ;;  %v791_v28 = vsel %vm576_vm1, %v7818_v4, %v7817_v29  ;;  %v808_v46 = vadd.f32 %v788_v42, %v703_v7  ;;  %v7824_v47 = vld [vmem:[#allocation33_spill] sm:$0xff]  ;;  %v7832_v16 = vld [vmem:[#allocation40_spill] sm:$0xff] }
 0xf5b   : > { %v809_v6 = vadd.f32 %v7813_v53, %v704_v59  ;;  %v812_v23 = vadd.f32 %v7816_v22, %v707_v60  ;;  %v792_v45 = vsel %vm576_vm1, %v7817_v29, %v7819_v30  ;;  %v810_v35 = vadd.f32 %v789_v54, %v705_v11  ;;  %v7825_v59 = vld [vmem:[#allocation32_spill] sm:$0xff]  ;;  %v7826_v11 = vld [vmem:[#allocation34_spill] sm:$0xff] }
 0xf5c   : > { %v793_v37 = vsel %vm576_vm1, %v7821_v41, %v7820_v38  ;;  %v794_v32 = vsel %vm576_vm1, %v7820_v38, %v7822_v20  ;;  %v3274_v14 = vmul.f32 %v7823_v56, %v4445_v12  ;;  %v811_v5 = vadd.f32 %v790_v61, %v706_v49  ;;  %v7827_v49 = vld [vmem:[#allocation36_spill] sm:$0xff]  ;;  %v7831_v53 = vld [vmem:[#allocation38_spill] sm:$0xff]  ;;  %v7834_v61 = vld [vmem:[#allocation41_spill] sm:$0xff] }
 0xf5d   : > { %3398 = vrot.lane.b32.xlu1 %v3372_v36, %s4167_s22  ;;  %3400 = vrot.lane.b32.xlu0 %v3373_v1, %s4167_s22  ;;  %v813_v36 = vadd.f32 %v791_v28, %v708_v52  ;;  %v892_v50 = vsel %vm576_vm1, %v7825_v59, %v7824_v47  ;;  %v3275_v58 = vmul.f32 %v7823_v56, %v4448_v13  ;;  %v7828_v52 = vld [vmem:[#allocation35_spill] sm:$0xff]  ;;  %v7833_v22 = vld [vmem:[#allocation42_spill] sm:$0xff]  ;;  %v7841_v59 = vld [vmem:[#allocation49_spill] sm:$0xff] }
 0xf5e   : > { %v6187_v44 = vpop.permute.xlu1 %3367  ;;  %v6189_v0 = vpop.permute.xlu0 %3462  ;;  %v814_v1 = vadd.f32 %v792_v45, %v709_v33  ;;  %v815_v7 = vadd.f32 %v7819_v30, %v710_v57  ;;  %v818_v60 = vadd.f32 %v7822_v20, %v713_v18  ;;  %v893_v51 = vsel %vm576_vm1, %v7824_v47, %v7826_v11  ;;  %v7830_v57 = vld [vmem:[#allocation39_spill] sm:$0xff]  ;;  %v7836_v30 = vld [vmem:[#allocation45_spill] sm:$0xff]  ;;  %v7837_v45 = vld [vmem:[#allocation44_spill] sm:$0xff] }
 0xf5f   : > { %v816_v17 = vadd.f32 %v793_v37, %v711_v10  ;;  %v817_v15 = vadd.f32 %v794_v32, %v712_v27  ;;  %v894_v63 = vsel %vm576_vm1, %v7828_v52, %v7827_v49  ;;  %v895_v8 = vsel %vm576_vm1, %v7827_v49, %v7829_v40  ;;  %v7838_v20 = vld [vmem:[#allocation46_spill] sm:$0xff] }
 0xf60   : > { %v912_v33 = vadd.f32 %v892_v50, %v807_v3  ;;  %v896_v42 = vsel %vm576_vm1, %v7831_v53, %v7830_v57  ;;  %v913_v18 = vadd.f32 %v893_v51, %v808_v46  ;;  %v914_v10 = vadd.f32 %v7826_v11, %v809_v6  ;;  %v7835_v46 = vld [vmem:[#allocation43_spill] sm:$0xff]  ;;  %v7843_v51 = vld [vmem:[#allocation50_spill] sm:$0xff] }
 0xf61   : > { %3402 = vrot.lane.b32.xlu1 %v3374_v2, %s4167_s22  ;;  %3404 = vrot.lane.b32.xlu0 %v3375_v21, %s4167_s22  ;;  %v3276_v2 = vmul.f32 %v7823_v56, %v4455_v19  ;;  %v897_v48 = vsel %vm576_vm1, %v7830_v57, %v7832_v16  ;;  %v3376_v54 = vmul.f32 %v6161_v43, %v4261_v24  ;;  %v7842_v11 = vld [vmem:[#allocation51_spill] sm:$0xff]  ;;  %v7846_v57 = vld [vmem:[#allocation53_spill] sm:$0xff] }
 0xf62   : > { %v6214_v39 = vpop.permute.xlu1 %3563  ;;  %v6216_v55 = vpop.permute.xlu0 %3467  ;;  %v917_v21 = vadd.f32 %v7829_v40, %v812_v23  ;;  %v915_v27 = vadd.f32 %v894_v63, %v810_v35  ;;  %v916_v3 = vadd.f32 %v895_v8, %v811_v5  ;;  %v898_v29 = vsel %vm576_vm1, %v7834_v61, %v7833_v22  ;;  %v7839_v5 = vld [vmem:[#allocation48_spill] sm:$0xff]  ;;  %v7845_v8 = vld [vmem:[#allocation54_spill] sm:$0xff] }
 0xf63   : > { %v918_v4 = vadd.f32 %v896_v42, %v813_v36  ;;  %v920_v28 = vadd.f32 %v7832_v16, %v815_v7  ;;  %v899_v6 = vsel %vm576_vm1, %v7833_v22, %v7835_v46  ;;  %v998_v38 = vsel %vm997_vm2, %v7837_v45, %v7836_v30  ;;  %v7840_v36 = vld [vmem:[#allocation47_spill] sm:$0xff]  ;;  %v7844_v63 = vld [vmem:[#allocation52_spill] sm:$0xff] }
 0xf64   : > { %v919_v41 = vadd.f32 %v897_v48, %v814_v1  ;;  %v923_v37 = vadd.f32 %v7835_v46, %v818_v60  ;;  %v999_v32 = vsel %vm997_vm2, %v7836_v30, %v7838_v20  ;;  %v3377_v56 = vmul.f32 %v6161_v43, %v4263_v25  ;;  %v7850_v22 = vld [vmem:[#allocation56_spill] sm:$0xff]  ;;  %v7852_v30 = vld [vmem:[#allocation58_spill] sm:$0xff] }
 0xf65   : > { %3307 = vrot.lane.b32.xlu1 %v3274_v14, %s4167_s22  ;;  %3309 = vrot.lane.b32.xlu0 %v3275_v58, %s4167_s22  ;;  %v921_v14 = vadd.f32 %v898_v29, %v816_v17  ;;  %v1000_v47 = vsel %vm997_vm2, %v7840_v36, %v7839_v5  ;;  %v1001_v50 = vsel %vm997_vm2, %v7839_v5, %v7841_v59  ;;  %v7851_v29 = vld [vmem:[#allocation4_spill] sm:$0xff]  ;;  %v7857_v5 = vld [vmem:[#allocation62_spill] sm:$0xff] }
 0xf66   : > { %v6244_v34 = vpop.permute.xlu1 %3472  ;;  %v6246_v9 = vpop.permute.xlu0 %3568  ;;  %v3378_v58 = vmul.f32 %v6161_v43, %v4265_v26  ;;  %v922_v1 = vadd.f32 %v899_v6, %v817_v15  ;;  %v1018_v7 = vadd.f32 %v998_v38, %v912_v33  ;;  %v1020_v60 = vadd.f32 %v7838_v20, %v914_v10  ;;  %v7848_v10 = vld [vmem:[#allocation3_spill] sm:$0xff] }
 0xf67   : > { %v1002_v49 = vsel %vm997_vm2, %v7843_v51, %v7842_v11  ;;  %v1019_v17 = vadd.f32 %v999_v32, %v913_v18  ;;  %v1023_v52 = vadd.f32 %v7841_v59, %v917_v21  ;;  %v1003_v40 = vsel %vm997_vm2, %v7842_v11, %v7844_v63  ;;  %v7849_v21 = vld [vmem:[#allocation57_spill] sm:$0xff]  ;;  %v7854_v38 = vld [vmem:[#allocation59_spill] sm:$0xff] }
 0xf68   : > { %v1004_v43 = vsel %vm997_vm2, %v7846_v57, %v7845_v8  ;;  %v1021_v53 = vadd.f32 %v1000_v47, %v915_v27  ;;  %v1022_v42 = vadd.f32 %v1001_v50, %v916_v3  ;;  %v3475_v16 = vmul.f32 %v6159_v31, %v7848_v10  ;;  %v7855_v32 = vld [vmem:[#allocation61_spill] sm:$0xff]  ;;  %v7858_v50 = vld [vmem:[#allocation64_spill] sm:$0xff] }
 0xf69   : > { %3311 = vrot.lane.b32.xlu1 %v3276_v2, %s4167_s22  ;;  %3406 = vrot.lane.b32.xlu0 %v3376_v54, %s4167_s22  ;;  %v7847_v2 = vld [vmem:[#allocation55_spill] sm:$0xff]  ;;  %v1024_v48 = vadd.f32 %v1002_v49, %v918_v4  ;;  %v1026_v54 = vadd.f32 %v7844_v63, %v920_v28  ;;  %v1103_v61 = vsel %vm997_vm2, %v7850_v22, %v7849_v21  ;;  %v7853_v28 = vld [vmem:[#allocation60_spill] sm:$0xff]  ;;  %v7860_v49 = vld [vmem:[#allocation66_spill] sm:$0xff] }
 0xf6a   : > { %v6272_v23 = vpop.permute.xlu1 %3668  ;;  %v6274_v35 = vpop.permute.xlu0 %3573  ;;  %v1005_v18 = vsel %vm997_vm2, %v7845_v8, %v7847_v2  ;;  %v3476_v46 = vmul.f32 %v6159_v31, %v7851_v29  ;;  %v1025_v6 = vadd.f32 %v1003_v40, %v919_v41  ;;  %v1029_v27 = vadd.f32 %v7847_v2, %v923_v37  ;;  %v7856_v41 = vld [vmem:[#allocation63_spill] sm:$0xff]  ;;  %v7861_v63 = vld [vmem:[#allocation65_spill] sm:$0xff] }
 0xf6b   : > { %v1027_v3 = vadd.f32 %v1004_v43, %v921_v14  ;;  %v1104_v45 = vsel %vm997_vm2, %v7849_v21, %v7852_v30  ;;  %v1028_v4 = vadd.f32 %v1005_v18, %v922_v1  ;;  %v1105_v20 = vsel %vm997_vm2, %v7854_v38, %v7853_v28  ;;  %v7859_v1 = vld [vmem:[#allocation5_spill] sm:$0xff]  ;;  %v7862_v8 = vld [vmem:[#allocation67_spill] sm:$0xff]  ;;  %v7864_v21 = vld [vmem:[#allocation68_spill] sm:$0xff] }
 0xf6c   : > { %v1107_v37 = vsel %vm997_vm2, %v7857_v5, %v7856_v41  ;;  %v1123_v47 = vadd.f32 %v1103_v61, %v1018_v7  ;;  %v1125_v59 = vadd.f32 %v7852_v30, %v1020_v60  ;;  %v3477_v11 = vmul.f32 %v6159_v31, %v7859_v1  ;;  %v7865_v61 = vld [vmem:[#allocation70_spill] sm:$0xff]  ;;  %v7868_v38 = vld [vmem:[#allocation73_spill] sm:$0xff] }
 0xf6d   : > { %3408 = vrot.lane.b32.xlu1 %v3377_v56, %s4167_s22  ;;  %3410 = vrot.lane.b32.xlu0 %v3378_v58, %s4167_s22  ;;  %v1106_v56 = vsel %vm997_vm2, %v7853_v28, %v7855_v32  ;;  %v1108_v58 = vsel %vm997_vm2, %v7856_v41, %v7858_v50  ;;  %v1124_v51 = vadd.f32 %v1104_v45, %v1019_v17  ;;  %v7867_v45 = vld [vmem:[#allocation71_spill] sm:$0xff] }
 0xf6e   : > { %v6303_v15 = vpop.permute.xlu1 %3578  ;;  %v6305_v33 = vpop.permute.xlu0 %3673  ;;  %v1109_v40 = vsel %vm997_vm2, %v7861_v63, %v7860_v49  ;;  %v1110_v57 = vsel %vm997_vm2, %v7860_v49, %v7862_v8  ;;  %v3478_v7 = vmul.f32 %v6189_v0, %v7848_v10  ;;  %v1128_v60 = vadd.f32 %v7855_v32, %v1023_v52  ;;  %v7869_v32 = vld [vmem:[#allocation75_spill] sm:$0xff]  ;;  %v7873_v49 = vld [vmem:[#allocation77_spill] sm:$0xff] }
 0xf6f   : > { %v1126_v43 = vadd.f32 %v1105_v20, %v1021_v53  ;;  %v1127_v2 = vadd.f32 %v1106_v56, %v1022_v42  ;;  %v1129_v18 = vadd.f32 %v1107_v37, %v1024_v48  ;;  %v1130_v31 = vadd.f32 %v1108_v58, %v1025_v6  ;;  %v7866_v6 = vld [vmem:[#allocation72_spill] sm:$0xff]  ;;  %v7870_v56 = vld [vmem:[#allocation74_spill] sm:$0xff] }
 0xf70   : > { %v1131_v17 = vadd.f32 %v7858_v50, %v1026_v54  ;;  %v1134_v53 = vadd.f32 %v7862_v8, %v1029_v27  ;;  %v1132_v42 = vadd.f32 %v1109_v40, %v1027_v3  ;;  %v1133_v48 = vadd.f32 %v1110_v57, %v1028_v4  ;;  %v7871_v37 = vld [vmem:[#allocation76_spill] sm:$0xff]  ;;  %v7874_v40 = vld [vmem:[#allocation79_spill] sm:$0xff] }
 0xf71   : > { %3499 = vrot.lane.b32.xlu1 %v3475_v16, %s4168_s6  ;;  %3501 = vrot.lane.b32.xlu0 %v3476_v46, %s4168_s6  ;;  %v7863_v16 = vld [vmem:[#allocation69_spill] sm:$0xff]  ;;  %v3479_v54 = vmul.f32 %v6189_v0, %v7851_v29  ;;  %v1210_v28 = vsel %vm997_vm2, %v7867_v45, %v7866_v6  ;;  %v1211_v20 = vsel %vm997_vm2, %v7866_v6, %v7868_v38 }
 0xf72   : > { %v6333_v14 = vpop.permute.xlu1 %3773  ;;  %v6335_v36 = vpop.permute.xlu0 %3678  ;;  %v1208_v22 = vsel %vm997_vm2, %v7864_v21, %v7863_v16  ;;  %v1209_v46 = vsel %vm997_vm2, %v7863_v16, %v7865_v61  ;;  %v1212_v41 = vsel %vm997_vm2, %v7870_v56, %v7869_v32  ;;  %v3480_v27 = vmul.f32 %v6189_v0, %v7859_v1 }
 0xf73   : > { %v1228_v3 = vadd.f32 %v1208_v22, %v1123_v47  ;;  %v1229_v4 = vadd.f32 %v1209_v46, %v1124_v51  ;;  %v1230_v5 = vadd.f32 %v7865_v61, %v1125_v59  ;;  %v1213_v50 = vsel %vm997_vm2, %v7869_v32, %v7871_v37  ;;  %v7875_v47 = vld [vmem:[#allocation81_spill] sm:$0xff]  ;;  %v7876_v51 = vld [vmem:[#allocation80_spill] sm:$0xff]  ;;  %v7877_v32 = vld [vmem:[#allocation82_spill] sm:$0xff] }
 0xf74   : > { %v1233_v58 = vadd.f32 %v7868_v38, %v1128_v60  ;;  %v1313_v59 = vsel %vm997_vm2, %v7876_v51, %v7875_v47  ;;  %v1232_v60 = vadd.f32 %v1211_v20, %v1127_v2  ;;  %v1234_v16 = vadd.f32 %v1212_v41, %v1129_v18  ;;  %v7878_v18 = vld [vmem:[#allocation84_spill] sm:$0xff]  ;;  %v7881_v20 = vld [vmem:[#allocation87_spill] sm:$0xff] }
 0xf75   : > { %3503 = vrot.lane.b32.xlu1 %v3477_v11, %s4168_s6  ;;  %3505 = vrot.lane.b32.xlu0 %v3478_v7, %s4168_s6  ;;  %v7872_v11 = vld [vmem:[#allocation78_spill] sm:$0xff]  ;;  %v1231_v7 = vadd.f32 %v1210_v28, %v1126_v43  ;;  %v3379_v21 = vmul.f32 %v6187_v44, %v4261_v24  ;;  %v1235_v22 = vadd.f32 %v1213_v50, %v1130_v31  ;;  %v7879_v31 = vld [vmem:[#allocation83_spill] sm:$0xff]  ;;  %v7880_v28 = vld [vmem:[#allocation85_spill] sm:$0xff] }
 0xf76   : > { %v6361_v30 = vpop.permute.xlu1 %3683  ;;  %v6363_v52 = vpop.permute.xlu0 %3778  ;;  %v1214_v63 = vsel %vm997_vm2, %v7873_v49, %v7872_v11  ;;  %v1215_v0 = vsel %vm997_vm2, %v7872_v11, %v7874_v40  ;;  %v1236_v61 = vadd.f32 %v7871_v37, %v1131_v17  ;;  %v1239_v46 = vadd.f32 %v7874_v40, %v1134_v53  ;;  %v7883_v50 = vld [vmem:[#allocation88_spill] sm:$0xff]  ;;  %v7884_v49 = vld [vmem:[#allocation90_spill] sm:$0xff]  ;;  %v7886_v51 = vld [vmem:[#allocation91_spill] sm:$0xff] }
 0xf77   : > { %v1237_v6 = vadd.f32 %v1214_v63, %v1132_v42  ;;  %v1238_v45 = vadd.f32 %v1215_v0, %v1133_v48  ;;  %v1333_v38 = vadd.f32 %v1313_v59, %v1228_v3  ;;  %v1314_v43 = vsel %vm997_vm2, %v7875_v47, %v7877_v32  ;;  %v7882_v42 = vld [vmem:[#allocation86_spill] sm:$0xff]  ;;  %v7885_v63 = vld [vmem:[#allocation89_spill] sm:$0xff] }
 0xf78   : > { %v1335_v2 = vadd.f32 %v7877_v32, %v1230_v5  ;;  %v1315_v17 = vsel %vm997_vm2, %v7879_v31, %v7878_v18  ;;  %v1316_v53 = vsel %vm997_vm2, %v7878_v18, %v7880_v28  ;;  %v1317_v48 = vsel %vm997_vm2, %v7882_v42, %v7881_v20  ;;  %v7888_v32 = vld [vmem:[#allocation92_spill] sm:$0xff]  ;;  %v7889_v18 = vld [vmem:[#allocation94_spill] sm:$0xff] }
 0xf79   : > { %3507 = vrot.lane.b32.xlu1 %v3479_v54, %s4168_s6  ;;  %3509 = vrot.lane.b32.xlu0 %v3480_v27, %s4168_s6  ;;  %v3380_v54 = vmul.f32 %v6187_v44, %v4263_v25  ;;  %v3381_v27 = vmul.f32 %v6187_v44, %v4265_v26  ;;  %v1334_v37 = vadd.f32 %v1314_v43, %v1229_v4 }
 0xf7a   : > { %v6395_v8 = vpop.permute.xlu1 %3788  ;;  %v6397_v57 = vpop.permute.xlu0 %3783  ;;  %v1318_v11 = vsel %vm997_vm2, %v7881_v20, %v7883_v50  ;;  %v1319_v40 = vsel %vm997_vm2, %v7885_v63, %v7884_v49  ;;  %v3481_v44 = vmul.f32 %v6216_v55, %v7848_v10  ;;  %v1338_v0 = vadd.f32 %v7880_v28, %v1233_v58  ;;  %v7890_v28 = vld [vmem:[#allocation96_spill] sm:$0xff]  ;;  %v7892_v20 = vld [vmem:[#allocation97_spill] sm:$0xff]  ;;  %v7896_v63 = vld [vmem:[#allocation102_spill] sm:$0xff] }
 0xf7b   : > { %v1337_v47 = vadd.f32 %v1316_v53, %v1232_v60  ;;  %v1320_v59 = vsel %vm997_vm2, %v7884_v49, %v7886_v51  ;;  %v1339_v4 = vadd.f32 %v1317_v48, %v1234_v16  ;;  %v1340_v58 = vadd.f32 %v1318_v11, %v1235_v22  ;;  %v7895_v11 = vld [vmem:[#allocation100_spill] sm:$0xff] }
 0xf7c   : > { %v1342_v60 = vadd.f32 %v1319_v40, %v1237_v6  ;;  %v1343_v16 = vadd.f32 %v1320_v59, %v1238_v45  ;;  %v1422_v42 = vsel %vm1418_vm3, %v7890_v28, %v7892_v20  ;;  %v3483_v48 = vmul.f32 %v6216_v55, %v7859_v1  ;;  %v7893_v6 = vld [vmem:[#allocation99_spill] sm:$0xff]  ;;  %v7897_v40 = vld [vmem:[#allocation101_spill] sm:$0xff]  ;;  %v7900_v59 = vld [vmem:[#allocation104_spill] sm:$0xff] }
 0xf7d   : > { %3412 = vrot.lane.b32.xlu1 %v3379_v21, %s4167_s22  ;;  %3414 = vrot.lane.b32.xlu0 %v3380_v54, %s4167_s22  ;;  %v1341_v21 = vadd.f32 %v7883_v50, %v1236_v61  ;;  %v7887_v54 = vld [vmem:[#allocation93_spill] sm:$0xff]  ;;  %v7891_v61 = vld [vmem:[#allocation95_spill] sm:$0xff]  ;;  %v1444_v45 = vadd.f32 %v7892_v20, %v1338_v0  ;;  %v1424_v49 = vsel %vm1418_vm3, %v7893_v6, %v7895_v11 }
 0xf7e   : > { %v6420_v56 = vpop.permute.xlu1 %3299  ;;  %v3298_v41 = vpop.permute.xlu0 %3297  ;;  %v1419_v43 = vsel %vm1418_vm3, %v7888_v32, %v7887_v54  ;;  %v1420_v31 = vsel %vm1418_vm3, %v7887_v54, %v7889_v18  ;;  %v1421_v53 = vsel %vm1418_vm3, %v7891_v61, %v7890_v28  ;;  %v7901_v54 = vld [vmem:[#allocation7_spill] sm:$0xff]  ;;  %v7903_v28 = vld [vmem:[#allocation8_spill] sm:$0xff]  ;;  %v1446_v20 = vadd.f32 %v1424_v49, %v1340_v58 }
 0xf7f   : > { %v6426_v3 = vsel %vm3102_vm0, %v6116_v62, %v3298_v41  ;;  %v6430_v5 = vsel %vm3102_vm0, %v3298_v41, %v6420_v56  ;;  %v1336_v62 = vadd.f32 %v1315_v17, %v1231_v7  ;;  %v1344_v7 = vadd.f32 %v7886_v51, %v1239_v46  ;;  %v7899_v51 = vld [vmem:[#allocation105_spill] sm:$0xff] }
 0xf80   : > { %v3482_v17 = vmul.f32 %v6216_v55, %v7851_v29  ;;  %v1439_v41 = vadd.f32 %v1419_v43, %v1333_v38  ;;  %v1440_v22 = vadd.f32 %v1420_v31, %v1334_v37  ;;  %v1441_v46 = vadd.f32 %v7889_v18, %v1335_v2  ;;  %v7898_v38 = vld [vmem:[#allocation103_spill] sm:$0xff]  ;;  %v7902_v31 = vld [vmem:[#allocation106_spill] sm:$0xff] }
 0xf81   : > { %3416 = vrot.lane.b32.xlu1 %v3381_v27, %s4167_s22  ;;  %3511 = vrot.lane.b32.xlu0 %v3481_v44, %s4168_s6  ;;  %v7894_v27 = vld [vmem:[#allocation98_spill] sm:$0xff]  ;;  %v1425_v55 = vsel %vm1418_vm3, %v7897_v40, %v7896_v63  ;;  %v1426_v2 = vsel %vm1418_vm3, %v7896_v63, %v7898_v38  ;;  %v1442_v37 = vadd.f32 %v1421_v53, %v1336_v62 }
 0xf82   : > { %v1423_v50 = vsel %vm1418_vm3, %v7894_v27, %v7893_v6  ;;  %v1443_v44 = vadd.f32 %v1422_v42, %v1337_v47  ;;  %v1524_v0 = vsel %vm1418_vm3, %v7900_v59, %v7899_v51  ;;  %v3581_v32 = vmul.f32 %v6214_v39, %v7901_v54  ;;  %v7905_v6 = vld [vmem:[#allocation107_spill] sm:$0xff] }
 0xf83   : > { %v1445_v43 = vadd.f32 %v1423_v50, %v1339_v4  ;;  %v1447_v18 = vadd.f32 %v7895_v11, %v1341_v21  ;;  %v3582_v61 = vmul.f32 %v6214_v39, %v7903_v28  ;;  %v1450_v62 = vadd.f32 %v7898_v38, %v1344_v7  ;;  %v7906_v21 = vld [vmem:[#allocation109_spill] sm:$0xff]  ;;  %v7907_v50 = vld [vmem:[#allocation111_spill] sm:$0xff]  ;;  %v7908_v11 = vld [vmem:[#allocation110_spill] sm:$0xff] }
 0xf84   : > { %v1448_v47 = vadd.f32 %v1425_v55, %v1342_v60  ;;  %v1449_v53 = vadd.f32 %v1426_v2, %v1343_v16  ;;  %v1544_v42 = vadd.f32 %v1524_v0, %v1439_v41  ;;  %v1528_v63 = vsel %vm1418_vm3, %v7908_v11, %v7907_v50  ;;  %v7909_v60 = vld [vmem:[#allocation112_spill] sm:$0xff]  ;;  %v7910_v41 = vld [vmem:[#allocation9_spill] sm:$0xff]  ;;  %v7911_v55 = vld [vmem:[#allocation114_spill] sm:$0xff] }
 0xf85   : > { %3513 = vrot.lane.b32.xlu1 %v3482_v17, %s4168_s6  ;;  %3515 = vrot.lane.b32.xlu0 %v3483_v48, %s4168_s6  ;;  %v1525_v17 = vsel %vm1418_vm3, %v7899_v51, %v7902_v31  ;;  %v7904_v48 = vld [vmem:[#allocation108_spill] sm:$0xff]  ;;  %v1546_v7 = vadd.f32 %v7902_v31, %v1441_v46  ;;  %v1529_v16 = vsel %vm1418_vm3, %v7907_v50, %v7909_v60  ;;  %v7912_v38 = vld [vmem:[#allocation113_spill] sm:$0xff]  ;;  %v7913_v51 = vld [vmem:[#allocation115_spill] sm:$0xff] }
 0xf86   : > { %v1526_v4 = vsel %vm1418_vm3, %v7905_v6, %v7904_v48  ;;  %v1527_v27 = vsel %vm1418_vm3, %v7904_v48, %v7906_v21  ;;  %v1545_v58 = vadd.f32 %v1525_v17, %v1440_v22  ;;  %v3583_v49 = vmul.f32 %v6214_v39, %v7910_v41  ;;  %v7914_v31 = vld [vmem:[#allocation117_spill] sm:$0xff]  ;;  %v7915_v17 = vld [vmem:[#allocation116_spill] sm:$0xff]  ;;  %v7916_v6 = vld [vmem:[#allocation118_spill] sm:$0xff] }
 0xf87   : > { %v1549_v40 = vadd.f32 %v7906_v21, %v1444_v45  ;;  %v1530_v2 = vsel %vm1418_vm3, %v7912_v38, %v7911_v55  ;;  %v1531_v59 = vsel %vm1418_vm3, %v7911_v55, %v7913_v51  ;;  %v3584_v22 = vmul.f32 %v6246_v9, %v7901_v54  ;;  %v7919_v11 = vld [vmem:[#allocation121_spill] sm:$0xff]  ;;  %v7922_v55 = vld [vmem:[#allocation124_spill] sm:$0xff] }
 0xf88   : > { %v1547_v46 = vadd.f32 %v1526_v4, %v1442_v37  ;;  %v1548_v0 = vadd.f32 %v1527_v27, %v1443_v44  ;;  %v1629_v39 = vsel %vm1418_vm3, %v7915_v17, %v7914_v31  ;;  %v1551_v45 = vadd.f32 %v1529_v16, %v1446_v20  ;;  %v7918_v4 = vld [vmem:[#allocation119_spill] sm:$0xff] }
 0xf89   : > { %3605 = vrot.lane.b32.xlu1 %v3581_v32, %s4168_s6  ;;  %3607 = vrot.lane.b32.xlu0 %v3582_v61, %s4168_s6  ;;  %v1550_v32 = vadd.f32 %v1528_v63, %v1445_v43  ;;  %v1552_v61 = vadd.f32 %v7909_v60, %v1447_v18  ;;  %v1555_v48 = vadd.f32 %v7913_v51, %v1450_v62  ;;  %v7917_v43 = vld [vmem:[#allocation120_spill] sm:$0xff]  ;;  %v7920_v62 = vld [vmem:[#allocation123_spill] sm:$0xff]  ;;  %v7921_v63 = vld [vmem:[#allocation122_spill] sm:$0xff] }
 0xf8a   : > { %v1630_v21 = vsel %vm1418_vm3, %v7914_v31, %v7916_v6  ;;  %v1553_v37 = vadd.f32 %v1530_v2, %v1448_v47  ;;  %v1554_v44 = vadd.f32 %v1531_v59, %v1449_v53  ;;  %v1631_v27 = vsel %vm1418_vm3, %v7918_v4, %v7917_v43  ;;  %v7923_v2 = vld [vmem:[#allocation126_spill] sm:$0xff]  ;;  %v7924_v51 = vld [vmem:[#allocation125_spill] sm:$0xff]  ;;  %v7927_v31 = vld [vmem:[#allocation128_spill] sm:$0xff] }
 0xf8b   : > { %v3585_v50 = vmul.f32 %v6246_v9, %v7903_v28  ;;  %v1649_v20 = vadd.f32 %v1629_v39, %v1544_v42  ;;  %v1632_v18 = vsel %vm1418_vm3, %v7917_v43, %v7919_v11  ;;  %v1633_v60 = vsel %vm1418_vm3, %v7921_v63, %v7920_v62  ;;  %v7928_v43 = vld [vmem:[#allocation130_spill] sm:$0xff] }
 0xf8c   : > { %v3586_v47 = vmul.f32 %v6246_v9, %v7910_v41  ;;  %v1650_v53 = vadd.f32 %v1630_v21, %v1545_v58  ;;  %v1651_v16 = vadd.f32 %v7916_v6, %v1546_v7  ;;  %v1634_v42 = vsel %vm1418_vm3, %v7920_v62, %v7922_v55  ;;  %v7926_v58 = vld [vmem:[#allocation129_spill] sm:$0xff]  ;;  %v7933_v63 = vld [vmem:[#allocation134_spill] sm:$0xff] }
 0xf8d   : > { %3609 = vrot.lane.b32.xlu1 %v3583_v49, %s4168_s6  ;;  %3611 = vrot.lane.b32.xlu0 %v3584_v22, %s4168_s6  ;;  %v1654_v49 = vadd.f32 %v7919_v11, %v1549_v40  ;;  %v1652_v38 = vadd.f32 %v1631_v27, %v1547_v46  ;;  %v1635_v59 = vsel %vm1418_vm3, %v7924_v51, %v7923_v2  ;;  %v7925_v22 = vld [vmem:[#allocation127_spill] sm:$0xff] }
 0xf8e   : > { %v1636_v9 = vsel %vm1418_vm3, %v7923_v2, %v7925_v22  ;;  %v1734_v7 = vsel %vm1418_vm3, %v7927_v31, %v7926_v58  ;;  %v1653_v40 = vadd.f32 %v1632_v18, %v1548_v0  ;;  %v1655_v17 = vadd.f32 %v1633_v60, %v1550_v32  ;;  %v7929_v0 = vld [vmem:[#allocation132_spill] sm:$0xff]  ;;  %v7930_v32 = vld [vmem:[#allocation131_spill] sm:$0xff] }
 0xf8f   : > { %v1657_v39 = vadd.f32 %v7922_v55, %v1552_v61  ;;  %v3484_v46 = vmul.f32 %v6244_v34, %v7848_v10  ;;  %v1656_v6 = vadd.f32 %v1634_v42, %v1551_v45  ;;  %v1660_v21 = vadd.f32 %v7925_v22, %v1555_v48  ;;  %v7931_v45 = vld [vmem:[#allocation133_spill] sm:$0xff]  ;;  %v7932_v18 = vld [vmem:[#allocation135_spill] sm:$0xff]  ;;  %v7935_v55 = vld [vmem:[#allocation138_spill] sm:$0xff] }
 0xf90   : > { %v1735_v4 = vsel %vm1418_vm3, %v7926_v58, %v7928_v43  ;;  %v3485_v27 = vmul.f32 %v6244_v34, %v7851_v29  ;;  %v1659_v11 = vadd.f32 %v1636_v9, %v1554_v44  ;;  %v1754_v62 = vadd.f32 %v1734_v7, %v1649_v20  ;;  %v7934_v44 = vld [vmem:[#allocation136_spill] sm:$0xff]  ;;  %v7936_v42 = vld [vmem:[#allocation137_spill] sm:$0xff]  ;;  %v7937_v51 = vld [vmem:[#allocation139_spill] sm:$0xff] }
 0xf91   : > { %3613 = vrot.lane.b32.xlu1 %v3585_v50, %s4168_s6  ;;  %3615 = vrot.lane.b32.xlu0 %v3586_v47, %s4168_s6  ;;  %v1658_v50 = vadd.f32 %v1635_v59, %v1553_v37  ;;  %v1736_v61 = vsel %vm1418_vm3, %v7930_v32, %v7929_v0  ;;  %v1756_v10 = vadd.f32 %v7928_v43, %v1651_v16  ;;  %v7938_v58 = vld [vmem:[#allocation141_spill] sm:$0xff]  ;;  %v7939_v31 = vld [vmem:[#allocation140_spill] sm:$0xff]  ;;  %v7940_v7 = vld [vmem:[#allocation142_spill] sm:$0xff] }
 0xf92   : > { %v1737_v48 = vsel %vm1418_vm3, %v7929_v0, %v7931_v45  ;;  %v1738_v60 = vsel %vm1418_vm3, %v7933_v63, %v7932_v18  ;;  %v1755_v29 = vadd.f32 %v1735_v4, %v1650_v53  ;;  %v1759_v37 = vadd.f32 %v7931_v45, %v1654_v49  ;;  %v7941_v43 = vld [vmem:[#allocation144_spill] sm:$0xff]  ;;  %v7942_v4 = vld [vmem:[#allocation143_spill] sm:$0xff]  ;;  %v7945_v45 = vld [vmem:[#allocation146_spill] sm:$0xff] }
 0xf93   : > { %v1739_v20 = vsel %vm1418_vm3, %v7932_v18, %v7934_v44  ;;  %v3486_v47 = vmul.f32 %v6244_v34, %v7859_v1  ;;  %v1757_v16 = vadd.f32 %v1736_v61, %v1652_v38  ;;  %v1740_v2 = vsel %vm1418_vm3, %v7936_v42, %v7935_v55  ;;  %v7944_v61 = vld [vmem:[#allocation147_spill] sm:$0xff] }
 0xf94   : > { %v1741_v59 = vsel %vm1418_vm3, %v7935_v55, %v7937_v51  ;;  %v3587_v53 = vmul.f32 %v6274_v35, %v7901_v54  ;;  %v1758_v49 = vadd.f32 %v1737_v48, %v1653_v40  ;;  %v1760_v22 = vadd.f32 %v1738_v60, %v1655_v17  ;;  %v7946_v60 = vld [vmem:[#allocation148_spill] sm:$0xff]  ;;  %v7949_v55 = vld [vmem:[#allocation151_spill] sm:$0xff] }
 0xf95   : > { %3517 = vrot.lane.b32.xlu1 %v3484_v46, %s4168_s6  ;;  %3519 = vrot.lane.b32.xlu0 %v3485_v27, %s4168_s6  ;;  %v1762_v9 = vadd.f32 %v7934_v44, %v1657_v39  ;;  %v1840_v34 = vsel %vm1839_vm4, %v7939_v31, %v7938_v58  ;;  %v1761_v1 = vadd.f32 %v1739_v20, %v1656_v6  ;;  %v7943_v27 = vld [vmem:[#allocation145_spill] sm:$0xff]  ;;  %v7947_v20 = vld [vmem:[#allocation150_spill] sm:$0xff]  ;;  %v7953_v31 = vld [vmem:[#allocation156_spill] sm:$0xff] }
 0xf96   : > { %v1765_v38 = vadd.f32 %v7937_v51, %v1660_v21  ;;  %v1841_v46 = vsel %vm1839_vm4, %v7938_v58, %v7940_v7  ;;  %v1842_v40 = vsel %vm1839_vm4, %v7942_v4, %v7941_v43  ;;  %v1763_v17 = vadd.f32 %v1740_v2, %v1658_v50  ;;  %v7952_v51 = vld [vmem:[#allocation154_spill] sm:$0xff]  ;;  %v7955_v4 = vld [vmem:[#allocation157_spill] sm:$0xff] }
 0xf97   : > { %v1764_v39 = vadd.f32 %v1741_v59, %v1659_v11  ;;  %v1843_v0 = vsel %vm1839_vm4, %v7941_v43, %v7943_v27  ;;  %v3588_v6 = vmul.f32 %v6274_v35, %v7903_v28  ;;  %v1860_v21 = vadd.f32 %v1840_v34, %v1754_v62  ;;  %v7954_v34 = vld [vmem:[#allocation155_spill] sm:$0xff] }
 0xf98   : > { %v1862_v32 = vadd.f32 %v7940_v7, %v1756_v10  ;;  %v1844_v48 = vsel %vm1839_vm4, %v7945_v45, %v7944_v61  ;;  %v3589_v18 = vmul.f32 %v6274_v35, %v7910_v41  ;;  %v1861_v63 = vadd.f32 %v1841_v46, %v1755_v29  ;;  %v7948_v10 = vld [vmem:[#allocation149_spill] sm:$0xff]  ;;  %v7951_v29 = vld [vmem:[#allocation152_spill] sm:$0xff] }
 0xf99   : > { %3521 = vrot.lane.b32.xlu1 %v3486_v47, %s4168_s6  ;;  %3617 = vrot.lane.b32.xlu0 %v3587_v53, %s4168_s6  ;;  %v1865_v50 = vadd.f32 %v7943_v27, %v1759_v37  ;;  %v1863_v11 = vadd.f32 %v1842_v40, %v1757_v16  ;;  %v1845_v44 = vsel %vm1839_vm4, %v7944_v61, %v7946_v60  ;;  %v7950_v35 = vld [vmem:[#allocation153_spill] sm:$0xff]  ;;  %v7958_v61 = vld [vmem:[#allocation160_spill] sm:$0xff] }
 0xf9a   : > { %v1864_v62 = vadd.f32 %v1843_v0, %v1758_v49  ;;  %v1846_v47 = vsel %vm1839_vm4, %v7948_v10, %v7947_v20  ;;  %v1847_v42 = vsel %vm1839_vm4, %v7947_v20, %v7949_v55  ;;  %v1945_v37 = vsel %vm1839_vm4, %v7951_v29, %v7950_v35  ;;  %v7957_v0 = vld [vmem:[#allocation158_spill] sm:$0xff]  ;;  %v7962_v20 = vld [vmem:[#allocation165_spill] sm:$0xff]  ;;  %v7963_v10 = vld [vmem:[#allocation164_spill] sm:$0xff] }
 0xf9b   : > { %v1866_v16 = vadd.f32 %v1844_v48, %v1760_v22  ;;  %v1868_v2 = vadd.f32 %v7946_v60, %v1762_v9  ;;  %v1946_v59 = vsel %vm1839_vm4, %v7950_v35, %v7952_v51  ;;  %v3686_v53 = vmul.f32 %v6272_v23, %v4445_v12  ;;  %v7960_v48 = vld [vmem:[#allocation161_spill] sm:$0xff]  ;;  %v7961_v60 = vld [vmem:[#allocation163_spill] sm:$0xff]  ;;  %v7964_v35 = vld [vmem:[#allocation166_spill] sm:$0xff] }
 0xf9c   : > { %v1867_v49 = vadd.f32 %v1845_v44, %v1761_v1  ;;  %v1871_v58 = vadd.f32 %v7949_v55, %v1765_v38  ;;  %v1947_v7 = vsel %vm1839_vm4, %v7954_v34, %v7953_v31  ;;  %v3687_v46 = vmul.f32 %v6272_v23, %v4448_v13  ;;  %v7956_v38 = vld [vmem:[#allocation159_spill] sm:$0xff]  ;;  %v7969_v34 = vld [vmem:[#allocation170_spill] sm:$0xff] }
 0xf9d   : > { %3619 = vrot.lane.b32.xlu1 %v3588_v6, %s4168_s6  ;;  %3621 = vrot.lane.b32.xlu0 %v3589_v18, %s4168_s6  ;;  %v1869_v22 = vadd.f32 %v1846_v47, %v1763_v17  ;;  %v1870_v43 = vadd.f32 %v1847_v42, %v1764_v39  ;;  %v1965_v9 = vadd.f32 %v1945_v37, %v1860_v21  ;;  %v7959_v21 = vld [vmem:[#allocation162_spill] sm:$0xff]  ;;  %v7965_v37 = vld [vmem:[#allocation168_spill] sm:$0xff] }
 0xf9e   : > { %v1948_v40 = vsel %vm1839_vm4, %v7953_v31, %v7955_v4  ;;  %v1966_v27 = vadd.f32 %v1946_v59, %v1861_v63  ;;  %v1967_v1 = vadd.f32 %v7952_v51, %v1862_v32  ;;  %v1949_v6 = vsel %vm1839_vm4, %v7957_v0, %v7956_v38  ;;  %v7966_v51 = vld [vmem:[#allocation167_spill] sm:$0xff] }
 0xf9f   : > { %v1950_v45 = vsel %vm1839_vm4, %v7956_v38, %v7958_v61  ;;  %v1970_v17 = vadd.f32 %v7955_v4, %v1865_v50  ;;  %v1968_v39 = vadd.f32 %v1947_v7, %v1863_v11  ;;  %v1951_v18 = vsel %vm1839_vm4, %v7960_v48, %v7959_v21  ;;  %v7968_v31 = vld [vmem:[#allocation171_spill] sm:$0xff]  ;;  %v7970_v4 = vld [vmem:[#allocation172_spill] sm:$0xff] }
 0xfa0   : > { %v3688_v32 = vmul.f32 %v6272_v23, %v4455_v19  ;;  %v1969_v63 = vadd.f32 %v1948_v40, %v1864_v62  ;;  %v1952_v44 = vsel %vm1839_vm4, %v7959_v21, %v7961_v60  ;;  %v2050_v47 = vsel %vm1839_vm4, %v7963_v10, %v7962_v20  ;;  %v7973_v21 = vld [vmem:[#allocation175_spill] sm:$0xff]  ;;  %v7977_v10 = vld [vmem:[#allocation180_spill] sm:$0xff] }
 0xfa1   : > { %3710 = vrot.lane.b32.xlu1 %v3686_v53, %s4168_s6  ;;  %3712 = vrot.lane.b32.xlu0 %v3687_v46, %s4168_s6  ;;  %v3689_v50 = vmul.f32 %v6305_v33, %v4445_v12  ;;  %v1971_v11 = vadd.f32 %v1949_v6, %v1866_v16  ;;  %v1972_v55 = vadd.f32 %v1950_v45, %v1867_v49  ;;  %v7967_v53 = vld [vmem:[#allocation169_spill] sm:$0xff]  ;;  %v7971_v6 = vld [vmem:[#allocation174_spill] sm:$0xff] }
 0xfa2   : > { %v1973_v42 = vadd.f32 %v7958_v61, %v1868_v2  ;;  %v2051_v23 = vsel %vm1839_vm4, %v7962_v20, %v7964_v35  ;;  %v1976_v62 = vadd.f32 %v7961_v60, %v1871_v58  ;;  %v1974_v29 = vadd.f32 %v1951_v18, %v1869_v22  ;;  %v7972_v61 = vld [vmem:[#allocation173_spill] sm:$0xff] }
 0xfa3   : > { %v2052_v59 = vsel %vm1839_vm4, %v7966_v51, %v7965_v37  ;;  %v2053_v16 = vsel %vm1839_vm4, %v7965_v37, %v7967_v53  ;;  %v1975_v2 = vadd.f32 %v1952_v44, %v1870_v43  ;;  %v2070_v49 = vadd.f32 %v2050_v47, %v1965_v9  ;;  %v7974_v18 = vld [vmem:[#allocation177_spill] sm:$0xff]  ;;  %v7978_v47 = vld [vmem:[#allocation179_spill] sm:$0xff]  ;;  %v7981_v37 = vld [vmem:[#allocation182_spill] sm:$0xff] }
 0xfa4   : > { %v2054_v7 = vsel %vm1839_vm4, %v7969_v34, %v7968_v31  ;;  %v3690_v58 = vmul.f32 %v6305_v33, %v4448_v13  ;;  %v2071_v46 = vadd.f32 %v2051_v23, %v1966_v27  ;;  %v2072_v22 = vadd.f32 %v7964_v35, %v1967_v1  ;;  %v7979_v35 = vld [vmem:[#allocation181_spill] sm:$0xff]  ;;  %v7985_v34 = vld [vmem:[#allocation190_spill] sm:$0xff] }
 0xfa5   : > { %3714 = vrot.lane.b32.xlu1 %v3688_v32, %s4168_s6  ;;  %3716 = vrot.lane.b32.xlu0 %v3689_v50, %s4168_s6  ;;  %v2055_v40 = vsel %vm1839_vm4, %v7968_v31, %v7970_v4  ;;  %v3691_v38 = vmul.f32 %v6305_v33, %v4455_v19  ;;  %v2075_v43 = vadd.f32 %v7967_v53, %v1970_v17  ;;  %v7975_v32 = vld [vmem:[#allocation176_spill] sm:$0xff]  ;;  %v7983_v53 = vld [vmem:[#allocation189_spill] sm:$0xff] }
 0xfa6   : > { %v2073_v9 = vadd.f32 %v2052_v59, %v1968_v39  ;;  %v2074_v0 = vadd.f32 %v2053_v16, %v1969_v63  ;;  %v2056_v45 = vsel %vm1839_vm4, %v7972_v61, %v7971_v6  ;;  %v2076_v27 = vadd.f32 %v2054_v7, %v1971_v11  ;;  %v7976_v39 = vld [vmem:[#allocation178_spill] sm:$0xff]  ;;  %v7982_v59 = vld [vmem:[#allocation184_spill] sm:$0xff] }
 0xfa7   : > { %v2078_v1 = vadd.f32 %v7970_v4, %v1973_v42  ;;  %v2057_v48 = vsel %vm1839_vm4, %v7971_v6, %v7973_v21  ;;  %v2155_v33 = vsel %vm1839_vm4, %v7975_v32, %v7974_v18  ;;  %v2077_v17 = vadd.f32 %v2055_v40, %v1972_v55  ;;  %v7984_v16 = vld [vmem:[#allocation188_spill] sm:$0xff]  ;;  %v7986_v6 = vld [vmem:[#allocation186_spill] sm:$0xff] }
 0xfa8   : > { %v2156_v63 = vsel %vm1839_vm4, %v7974_v18, %v7976_v39  ;;  %v3590_v60 = vmul.f32 %v6303_v15, %v7901_v54  ;;  %v6712_v44 = vadd.f32 %v7973_v21, %v1976_v62  ;;  %v6714_v20 = vadd.f32 %v2056_v45, %v1974_v29  ;;  %v7980_v54 = vld [vmem:[#allocation183_spill] sm:$0xff]  ;;  %v7988_v45 = vld [vmem:[#allocation192_spill] sm:$0xff]  ;;  %v7992_v18 = vld [vmem:[#allocation194_spill] sm:$0xff] }
 0xfa9   : > { %3718 = vrot.lane.b32.xlu1 %v3690_v58, %s4168_s6  ;;  %3720 = vrot.lane.b32.xlu0 %v3691_v38, %s4168_s6  ;;  %v2157_v50 = vsel %vm1839_vm4, %v7978_v47, %v7977_v10  ;;  %v3591_v11 = vmul.f32 %v6303_v15, %v7903_v28  ;;  %v6721_v55 = vadd.f32 %v2057_v48, %v1975_v2  ;;  %v7989_v21 = vld [vmem:[#allocation191_spill] sm:$0xff] }
 0xfaa   : > { %v2175_v42 = vadd.f32 %v2155_v33, %v2070_v49  ;;  %v2158_v23 = vsel %vm1839_vm4, %v7977_v10, %v7979_v35  ;;  %v2159_v62 = vsel %vm1839_vm4, %v7981_v37, %v7980_v54  ;;  %v2176_v29 = vadd.f32 %v2156_v63, %v2071_v46  ;;  %v7991_v48 = vld [vmem:[#allocation195_spill] sm:$0xff] }
 0xfab   : > { %v2177_v51 = vadd.f32 %v7976_v39, %v2072_v22  ;;  %v2160_v28 = vsel %vm1839_vm4, %v7980_v54, %v7982_v59  ;;  %v2261_v2 = vsel %vm2260_vm5, %v7984_v16, %v7983_v53  ;;  %v2180_v49 = vadd.f32 %v7979_v35, %v2075_v43  ;;  %v7987_v43 = vld [vmem:[#allocation185_spill] sm:$0xff]  ;;  %v7994_v39 = vld [vmem:[#allocation200_spill] sm:$0xff] }
 0xfac   : > { %v2178_v31 = vadd.f32 %v2157_v50, %v2073_v9  ;;  %v2262_v7 = vsel %vm2260_vm5, %v7983_v53, %v7985_v34  ;;  %v3592_v58 = vmul.f32 %v6303_v15, %v7910_v41  ;;  %v2179_v46 = vadd.f32 %v2158_v23, %v2074_v0  ;;  %v7998_v23 = vld [vmem:[#allocation205_spill] sm:$0xff]  ;;  %v8002_v16 = vld [vmem:[#allocation212_spill] sm:$0xff] }
 0xfad   : > { %3623 = vrot.lane.b32.xlu1 %v3590_v60, %s4168_s6  ;;  %3625 = vrot.lane.b32.xlu0 %v3591_v11, %s4168_s6  ;;  %v2181_v22 = vadd.f32 %v2159_v62, %v2076_v27  ;;  %v6745_v4 = vadd.f32 %v7982_v59, %v2078_v1  ;;  %v3692_v40 = vmul.f32 %v6335_v36, %v4445_v12  ;;  %v7990_v27 = vld [vmem:[#allocation193_spill] sm:$0xff]  ;;  %v7995_v60 = vld [vmem:[#allocation202_spill] sm:$0xff]  ;;  %v7996_v11 = vld [vmem:[#allocation204_spill] sm:$0xff] }
 0xfae   : > { %v6749_v38 = vadd.f32 %v2160_v28, %v2077_v17  ;;  %v6754_v9 = vsel %vm1839_vm4, %v7987_v43, %v7986_v6  ;;  %v2281_v61 = vadd.f32 %v2261_v2, %v2175_v42  ;;  %v2263_v15 = vsel %vm2260_vm5, %v7989_v21, %v7988_v45  ;;  %v7993_v17 = vld [vmem:[#allocation201_spill] sm:$0xff]  ;;  %v7997_v42 = vld [vmem:[#allocation203_spill] sm:$0xff]  ;;  %v8000_v59 = vld [vmem:[#allocation206_spill] sm:$0xff] }
 0xfaf   : > { %v2282_v41 = vadd.f32 %v2262_v7, %v2176_v29  ;;  %v2283_v0 = vadd.f32 %v7985_v34, %v2177_v51  ;;  %v2264_v1 = vsel %vm2260_vm5, %v7988_v45, %v7990_v27  ;;  %v2265_v32 = vsel %vm2260_vm5, %v7992_v18, %v7991_v48  ;;  %v7999_v51 = vld [vmem:[#allocation207_spill] sm:$0xff]  ;;  %v8001_v53 = vld [vmem:[#allocation213_spill] sm:$0xff]  ;;  %v8004_v21 = vld [vmem:[#allocation216_spill] sm:$0xff] }
 0xfb0   : > { %v2286_v33 = vadd.f32 %v7990_v27, %v2180_v49  ;;  %v2366_v63 = vsel %vm2260_vm5, %v7994_v39, %v7993_v17  ;;  %v2367_v10 = vsel %vm2260_vm5, %v7993_v17, %v7995_v60  ;;  %v3693_v47 = vmul.f32 %v6335_v36, %v4448_v13  ;;  %v8006_v27 = vld [vmem:[#allocation217_spill] sm:$0xff]  ;;  %v8007_v18 = vld [vmem:[#allocation219_spill] sm:$0xff]  ;;  %v8010_v39 = vld [vmem:[#allocation224_spill] sm:$0xff] }
 0xfb1   : > { %3627 = vrot.lane.b32.xlu1 %v3592_v58, %s4168_s6  ;;  %3722 = vrot.lane.b32.xlu0 %v3692_v40, %s4168_s6  ;;  %v2284_v50 = vadd.f32 %v2263_v15, %v2178_v31  ;;  %v2368_v35 = vsel %vm2260_vm5, %v7997_v42, %v7996_v11  ;;  %v2369_v54 = vsel %vm2260_vm5, %v7996_v11, %v7998_v23  ;;  %v8009_v17 = vld [vmem:[#allocation225_spill] sm:$0xff]  ;;  %v8012_v42 = vld [vmem:[#allocation228_spill] sm:$0xff] }
 0xfb2   : > { %v3694_v37 = vmul.f32 %v6335_v36, %v4455_v19  ;;  %v2285_v62 = vadd.f32 %v2264_v1, %v2179_v46  ;;  %v2287_v29 = vadd.f32 %v2265_v32, %v2181_v22  ;;  %v2370_v28 = vsel %vm2260_vm5, %v8000_v59, %v7999_v51  ;;  %v8003_v46 = vld [vmem:[#allocation214_spill] sm:$0xff] }
 0xfb3   : > { %v2471_v2 = vsel %vm2260_vm5, %v8002_v16, %v8001_v53  ;;  %v2386_v49 = vadd.f32 %v2366_v63, %v2281_v61  ;;  %v2387_v31 = vadd.f32 %v2367_v10, %v2282_v41  ;;  %v2388_v34 = vadd.f32 %v7995_v60, %v2283_v0  ;;  %v8005_v61 = vld [vmem:[#allocation215_spill] sm:$0xff]  ;;  %v8008_v32 = vld [vmem:[#allocation218_spill] sm:$0xff] }
 0xfb4   : > { %v2391_v7 = vadd.f32 %v7998_v23, %v2286_v33  ;;  %v2389_v36 = vadd.f32 %v2368_v35, %v2284_v50  ;;  %v2390_v58 = vadd.f32 %v2369_v54, %v2285_v62  ;;  %v2472_v22 = vsel %vm2260_vm5, %v8001_v53, %v8003_v46  ;;  %v8013_v35 = vld [vmem:[#allocation227_spill] sm:$0xff]  ;;  %v8014_v54 = vld [vmem:[#allocation229_spill] sm:$0xff] }
 0xfb5   : > { %3724 = vrot.lane.b32.xlu1 %v3693_v47, %s4168_s6  ;;  %3726 = vrot.lane.b32.xlu0 %v3694_v37, %s4168_s6  ;;  %v3791_v40 = vmul.f32 %v6333_v14, %v4261_v24  ;;  %v2392_v43 = vadd.f32 %v2370_v28, %v2287_v29  ;;  %v2491_v45 = vadd.f32 %v2471_v2, %v2386_v49  ;;  %v8011_v47 = vld [vmem:[#allocation226_spill] sm:$0xff] }
 0xfb6   : > { %v2473_v15 = vsel %vm2260_vm5, %v8005_v61, %v8004_v21  ;;  %v3792_v41 = vmul.f32 %v6333_v14, %v4263_v25  ;;  %v2493_v0 = vadd.f32 %v8003_v46, %v2388_v34  ;;  %v2474_v1 = vsel %vm2260_vm5, %v8004_v21, %v8006_v27  ;;  %v8016_v34 = vld [vmem:[#allocation236_spill] sm:$0xff]  ;;  %v8021_v21 = vld [vmem:[#allocation230_spill] sm:$0xff] }
 0xfb7   : > { %v2475_v33 = vsel %vm2260_vm5, %v8008_v32, %v8007_v18  ;;  %v2576_v63 = vsel %vm2260_vm5, %v8010_v39, %v8009_v17  ;;  %v2492_v60 = vadd.f32 %v2472_v22, %v2387_v31  ;;  %v2496_v10 = vadd.f32 %v8006_v27, %v2391_v7  ;;  %v8015_v31 = vld [vmem:[#allocation237_spill] sm:$0xff]  ;;  %v8018_v22 = vld [vmem:[#allocation240_spill] sm:$0xff]  ;;  %v8025_v39 = vld [vmem:[#allocation250_spill] sm:$0xff] }
 0xfb8   : > { %v2577_v50 = vsel %vm2260_vm5, %v8009_v17, %v8011_v47  ;;  %v2494_v11 = vadd.f32 %v2473_v15, %v2389_v36  ;;  %v2578_v23 = vsel %vm2260_vm5, %v8013_v35, %v8012_v42  ;;  %v2579_v37 = vsel %vm2260_vm5, %v8012_v42, %v8014_v54  ;;  %v8022_v15 = vld [vmem:[#allocation241_spill] sm:$0xff]  ;;  %v8024_v27 = vld [vmem:[#allocation248_spill] sm:$0xff] }
 0xfb9   : > { %3815 = vrot.lane.b32.xlu1 %v3791_v40, %s4168_s6  ;;  %3817 = vrot.lane.b32.xlu0 %v3792_v41, %s4168_s6  ;;  %v3793_v62 = vmul.f32 %v6333_v14, %v4265_v26  ;;  %v2495_v29 = vadd.f32 %v2474_v1, %v2390_v58  ;;  %v6829_v59 = vadd.f32 %v2475_v33, %v2392_v43  ;;  %v8017_v58 = vld [vmem:[#allocation238_spill] sm:$0xff]  ;;  %v8019_v40 = vld [vmem:[#allocation239_spill] sm:$0xff]  ;;  %v8027_v42 = vld [vmem:[#allocation260_spill] sm:$0xff] }
 0xfba   : > { %v2596_v28 = vadd.f32 %v2576_v63, %v2491_v45  ;;  %v3794_v53 = vmul.f32 %v6363_v52, %v4261_v24  ;;  %v2597_v16 = vadd.f32 %v2577_v50, %v2492_v60  ;;  %v2598_v2 = vadd.f32 %v8011_v47, %v2493_v0  ;;  %v8020_v45 = vld [vmem:[#allocation231_spill] sm:$0xff]  ;;  %v8023_v0 = vld [vmem:[#allocation249_spill] sm:$0xff] }
 0xfbb   : > { %v2601_v49 = vadd.f32 %v8014_v54, %v2496_v10  ;;  %v2682_v7 = vsel %vm2681_vm6, %v8016_v34, %v8015_v31  ;;  %v2599_v36 = vadd.f32 %v2578_v23, %v2494_v11  ;;  %v2600_v14 = vadd.f32 %v2579_v37, %v2495_v29  ;;  %v8026_v11 = vld [vmem:[#allocation261_spill] sm:$0xff]  ;;  %v8028_v54 = vld [vmem:[#allocation243_spill] sm:$0xff]  ;;  %v8029_v37 = vld [vmem:[#allocation242_spill] sm:$0xff] }
 0xfbc   : > { %v2683_v46 = vsel %vm2681_vm6, %v8015_v31, %v8017_v58  ;;  %v2684_v43 = vsel %vm2681_vm6, %v8019_v40, %v8018_v22  ;;  %v6849_v61 = vsel %vm2260_vm5, %v8021_v21, %v8020_v45  ;;  %v2685_v41 = vsel %vm2681_vm6, %v8018_v22, %v8022_v15  ;;  %v8032_v31 = vld [vmem:[#allocation273_spill] sm:$0xff]  ;;  %v8033_v34 = vld [vmem:[#allocation272_spill] sm:$0xff]  ;;  %v8035_v22 = vld [vmem:[#allocation262_spill] sm:$0xff] }
 0xfbd   : > { %3819 = vrot.lane.b32.xlu1 %v3793_v62, %s4168_s6  ;;  %3821 = vrot.lane.b32.xlu0 %v3794_v53, %s4168_s6  ;;  %v2787_v1 = vsel %vm2681_vm6, %v8024_v27, %v8023_v0  ;;  %v3795_v32 = vmul.f32 %v6363_v52, %v4263_v25  ;;  %v2702_v33 = vadd.f32 %v2682_v7, %v2596_v28  ;;  %v8030_v28 = vld [vmem:[#allocation252_spill] sm:$0xff]  ;;  %v8031_v53 = vld [vmem:[#allocation251_spill] sm:$0xff] }
 0xfbe   : > { %v2704_v17 = vadd.f32 %v8017_v58, %v2598_v2  ;;  %v2788_v63 = vsel %vm2681_vm6, %v8023_v0, %v8025_v39  ;;  %v3796_v60 = vmul.f32 %v6363_v52, %v4265_v26  ;;  %v2703_v10 = vadd.f32 %v2683_v46, %v2597_v16  ;;  %v6878_v16 = vpop.permute.xlu0 %3301  ;;  %v8036_v0 = vld [vmem:[#allocation285_spill] sm:$0xff]  ;;  %v8037_v27 = vld [vmem:[#allocation284_spill] sm:$0xff] }
 0xfbf   : > { %v2707_v47 = vadd.f32 %v8022_v15, %v2601_v49  ;;  %v2705_v50 = vadd.f32 %v2684_v43, %v2599_v36  ;;  %v2892_v35 = vsel %vm2681_vm6, %v8027_v42, %v8026_v11  ;;  %v2706_v23 = vadd.f32 %v2685_v41, %v2600_v14  ;;  %v8034_v14 = vld [vmem:[#allocation253_spill] sm:$0xff] }
 0xfc0   : > { %v6873_v62 = vsel %vm2681_vm6, %v8029_v37, %v8028_v54  ;;  %v2807_v29 = vadd.f32 %v2787_v1, %v2702_v33  ;;  %v2789_v52 = vsel %vm2681_vm6, %v8031_v53, %v8030_v28  ;;  %v2808_v2 = vadd.f32 %v2788_v63, %v2703_v10  ;;  %v8038_v1 = vld [vmem:[#allocation264_spill] sm:$0xff]  ;;  %v8041_v63 = vld [vmem:[#allocation274_spill] sm:$0xff]  ;;  %v6916_v37 = vpop.permute.xlu1 %3303 }
 0xfc1   : > { %3823 = vrot.lane.b32.xlu1 %v3795_v32, %s4168_s6  ;;  %3825 = vrot.lane.b32.xlu0 %v3796_v60, %s4168_s6  ;;  %v2809_v49 = vadd.f32 %v8025_v39, %v2704_v17  ;;  %v2997_v7 = vsel %vm2681_vm6, %v8033_v34, %v8032_v31  ;;  %v3695_v36 = vmul.f32 %v6361_v30, %v4445_v12  ;;  %v8039_v32 = vld [vmem:[#allocation263_spill] sm:$0xff]  ;;  %v8040_v17 = vld [vmem:[#allocation265_spill] sm:$0xff]  ;;  %v8044_v53 = vld [vmem:[#allocation286_spill] sm:$0xff] }
 0xfc2   : > { %v2790_v58 = vsel %vm2681_vm6, %v8030_v28, %v8034_v14  ;;  %v2912_v46 = vadd.f32 %v2892_v35, %v2807_v29  ;;  %v2893_v40 = vsel %vm2681_vm6, %v8026_v11, %v8035_v22  ;;  %v3696_v43 = vmul.f32 %v6361_v30, %v4448_v13  ;;  %v8043_v11 = vld [vmem:[#allocation296_spill] sm:$0xff] }
 0xfc3   : > { %v2812_v21 = vadd.f32 %v8034_v14, %v2707_v47  ;;  %v2810_v15 = vadd.f32 %v2789_v52, %v2705_v50  ;;  %v2914_v41 = vadd.f32 %v8035_v22, %v2809_v49  ;;  %v3103_v12 = vsel %vm3102_vm0, %v8037_v27, %v8036_v0  ;;  %v8042_v50 = vld [vmem:[#allocation297_spill] sm:$0xff]  ;;  %v8049_v27 = vld [vmem:[#allocation288_spill] sm:$0xff] }
 0xfc4   : > { %v2894_v33 = vsel %vm2681_vm6, %v8039_v32, %v8038_v1  ;;  %v2895_v39 = vsel %vm2681_vm6, %v8038_v1, %v8040_v17  ;;  %v3017_v13 = vadd.f32 %v2997_v7, %v2912_v46  ;;  %v2998_v60 = vsel %vm2681_vm6, %v8032_v31, %v8041_v63  ;;  %v8047_v46 = vld [vmem:[#allocation298_spill] sm:$0xff] }
 0xfc5   : > { %3728 = vrot.lane.b32.xlu1 %v3695_v36, %s4168_s6  ;;  %3730 = vrot.lane.b32.xlu0 %v3696_v43, %s4168_s6  ;;  %v2811_v10 = vadd.f32 %v2790_v58, %v2706_v23  ;;  %v2913_v47 = vadd.f32 %v2893_v40, %v2808_v2  ;;  %v3208_v42 = vsel %vm3102_vm0, %v8043_v11, %v8042_v50  ;;  %v6924_v2 = vpop.permute.xlu0 %3305  ;;  %v8048_v40 = vld [vmem:[#allocation277_spill] sm:$0xff] }
 0xfc6   : > { %v3697_v35 = vmul.f32 %v6361_v30, %v4455_v19  ;;  %v3019_v29 = vadd.f32 %v8041_v63, %v2914_v41  ;;  %v3123_v28 = vadd.f32 %v3103_v12, %v3017_v13  ;;  %v3104_v52 = vsel %vm3102_vm0, %v8036_v0, %v8044_v53  ;;  %v8045_v19 = vld [vmem:[#allocation276_spill] sm:$0xff]  ;;  %v8046_v30 = vld [vmem:[#allocation275_spill] sm:$0xff] }
 0xfc7   : > { %v3797_v23 = vmul.f32 %v6397_v57, %v4261_v24  ;;  %v2917_v49 = vadd.f32 %v8040_v17, %v2812_v21  ;;  %v2915_v31 = vadd.f32 %v2894_v33, %v2810_v15  ;;  %v2916_v34 = vadd.f32 %v2895_v39, %v2811_v10  ;;  %v8050_v12 = vld [vmem:[#allocation287_spill] sm:$0xff]  ;;  %v8051_v33 = vld [vmem:[#allocation309_spill] sm:$0xff] }
 0xfc8   : > { %v3018_v7 = vadd.f32 %v2998_v60, %v2913_v47  ;;  %v2999_v36 = vsel %vm2681_vm6, %v8046_v30, %v8045_v19  ;;  %v3125_v14 = vadd.f32 %v8044_v53, %v3019_v29  ;;  %v3228_v58 = vadd.f32 %v3208_v42, %v3123_v28  ;;  %v8052_v60 = vld [vmem:[#allocation289_spill] sm:$0xff]  ;;  %v8053_v42 = vld [vmem:[#allocation300_spill] sm:$0xff]  ;;  %v8055_v28 = vld [vmem:[#allocation310_spill] sm:$0xff] }
 0xfc9   : > { %3732 = vrot.lane.b32.xlu1 %v3697_v35, %s4168_s6  ;;  %v3209_v22 = vsel %vm3102_vm0, %v8042_v50, %v8047_v46  ;;  %3827 = vrot.lane.b32.xlu0 %v3797_v23, %s4168_s6  ;;  %v3022_v43 = vadd.f32 %v8048_v40, %v2917_v49  ;;  %v3000_v21 = vsel %vm2681_vm6, %v8045_v19, %v8048_v40  ;;  %v8054_v35 = vld [vmem:[#allocation299_spill] sm:$0xff] }
 0xfca   : > { %v3124_v15 = vadd.f32 %v3104_v52, %v3018_v7  ;;  %v3798_v41 = vmul.f32 %v6397_v57, %v4263_v25  ;;  %v3105_v1 = vsel %vm3102_vm0, %v8050_v12, %v8049_v27  ;;  %v3230_v32 = vadd.f32 %v8047_v46, %v3125_v14  ;;  %v8057_v7 = vld [vmem:[#allocation311_spill] sm:$0xff] }
 0xfcb   : > { %v3395_v0 = vpop.permute.xlu1 %3394  ;;  %v3333_v17 = vadd.f32 %v8051_v33, %v3228_v58  ;;  %v3799_v39 = vmul.f32 %v6397_v57, %v4265_v26  ;;  %v3397_v13 = vpop.permute.xlu0 %3396  ;;  %v3020_v63 = vadd.f32 %v2999_v36, %v2915_v31  ;;  %v3106_v10 = vsel %vm3102_vm0, %v8049_v27, %v8052_v60  ;;  %v3880_v57 = vld [vmem:[%s7274_s2] sm:$0xff]  ;;  %v8056_v31 = vld [vmem:[#allocation301_spill] sm:$0xff]  ;;  %v8059_v27 = vld [vmem:[#allocation196_spill] sm:$0xff] }
 0xfcc   : > { %v3229_v47 = vadd.f32 %v3209_v22, %v3124_v15  ;;  %v3418_v50 = vsel %vm3102_vm0, %v3395_v0, %v3397_v13  ;;  %v3021_v11 = vadd.f32 %v3000_v21, %v2916_v34  ;;  %v3210_v29 = vsel %vm3102_vm0, %v8054_v35, %v8053_v42  ;;  %v8060_v12 = vld [vmem:[#allocation255_spill] sm:$0xff]  ;;  %v8065_v35 = vld [vmem:[#allocation197_spill] sm:$0xff] }
 0xfcd   : > { %3829 = vrot.lane.b32.xlu1 %v3798_v41, %s4168_s6  ;;  %v3335_v53 = vadd.f32 %v8055_v28, %v3230_v32  ;;  %v6958_v52 = vadd.f32 %v3418_v50, %v3333_v17  ;;  %3831 = vrot.lane.b32.xlu0 %v3799_v39, %s4168_s6  ;;  %v3128_v23 = vadd.f32 %v8052_v60, %v3022_v43  ;;  %v8058_v41 = vld [vmem:[#allocation187_spill] sm:$0xff] }
 0xfce   : > { %v3126_v49 = vadd.f32 %v3105_v1, %v3020_v63  ;;  %v3211_v34 = vsel %vm3102_vm0, %v8053_v42, %v8056_v31  ;;  %v3334_v19 = vadd.f32 %v8057_v7, %v3229_v47  ;;  %v3127_v36 = vadd.f32 %v3106_v10, %v3021_v11  ;;  %v8061_v1 = vld [vmem:[#allocation254_spill] sm:$0xff] }
 0xfcf   : > { %v3399_v30 = vpop.permute.xlu1 %3398  ;;  %v3800_v14 = vmul.f32 %v6395_v8, %v4261_v24  ;;  %v3401_v22 = vpop.permute.xlu0 %3400  ;;  %v2602_v40 = vadd.f32 %v6849_v61, %v6829_v59  ;;  %v3233_v43 = vadd.f32 %v8056_v31, %v3128_v23  ;;  %v2162_v0 = vsel %vm1839_vm4, %v7986_v6, %v8058_v41  ;;  %v8063_v63 = vld [vmem:[#allocation266_spill] sm:$0xff]  ;;  %v8068_v23 = vld [vmem:[#allocation199_spill] sm:$0xff] }
 0xfd0   : > { %v3419_v58 = vsel %vm3102_vm0, %v3397_v13, %v3399_v30  ;;  %v6972_v46 = vadd.f32 %v3399_v30, %v3335_v53  ;;  %v3231_v21 = vadd.f32 %v3210_v29, %v3126_v49  ;;  %v2266_v24 = vsel %vm2260_vm5, %v7991_v48, %v8059_v27  ;;  %v8062_v13 = vld [vmem:[#allocation267_spill] sm:$0xff]  ;;  %v8064_v42 = vld [vmem:[#allocation198_spill] sm:$0xff] }
 0xfd1   : > { %v6977_v15 = vadd.f32 %v3419_v58, %v3334_v19  ;;  %3883 = vperm.xlu1 %4149, %v3880_v57   ;;  %v2791_v32 = vsel %vm2681_vm6, %v8061_v1, %v8060_v12  ;;  %v3232_v33 = vadd.f32 %v3211_v34, %v3127_v36  ;;  %3833 = vrot.lane.b32.xlu0 %v3800_v14, %s4168_s6  ;;  %v8069_v19 = vld [vmem:[#allocation208_spill] sm:$0xff]  ;;  %v8070_v36 = vld [vmem:[#allocation291_spill] sm:$0xff]  ;;  %v8071_v14 = vld [vmem:[#allocation290_spill] sm:$0xff] }
 0xfd2   : > { %v2708_v59 = vadd.f32 %v6873_v62, %v2602_v40  ;;  %v3801_v61 = vmul.f32 %v6395_v8, %v4263_v25  ;;  %v3338_v17 = vadd.f32 %v6420_v56, %v3233_v43  ;;  %v3336_v6 = vadd.f32 %v6426_v3, %v3231_v21  ;;  %v8073_v21 = vld [vmem:[#allocation209_spill] sm:$0xff]  ;;  %v8076_v1 = vld [vmem:[#allocation211_spill] sm:$0xff] }
 0xfd3   : > { %v3403_v39 = vpop.permute.xlu1 %3402  ;;  %v2896_v48 = vsel %vm2681_vm6, %v8063_v63, %v8062_v13  ;;  %v3802_v60 = vmul.f32 %v6395_v8, %v4265_v26  ;;  %v3337_v10 = vadd.f32 %v6430_v5, %v3232_v33  ;;  %v3405_v62 = vpop.permute.xlu0 %3404  ;;  %v2186_v3 = vadd.f32 %v8058_v41, %v6712_v44  ;;  %v8066_v8 = vld [vmem:[#allocation279_spill] sm:$0xff]  ;;  %v8067_v5 = vld [vmem:[#allocation278_spill] sm:$0xff]  ;;  %v8077_v33 = vld [vmem:[#allocation220_spill] sm:$0xff] }
 0xfd4   : > { %v3420_v47 = vsel %vm3102_vm0, %v3401_v22, %v3403_v39  ;;  %v2813_v50 = vadd.f32 %v2791_v32, %v2708_v59  ;;  %v3421_v25 = vsel %vm3102_vm0, %v3403_v39, %v3405_v62  ;;  %v7004_v56 = vadd.f32 %v3405_v62, %v3338_v17  ;;  %v8078_v39 = vld [vmem:[#allocation222_spill] sm:$0xff]  ;;  %v8079_v63 = vld [vmem:[#allocation221_spill] sm:$0xff] }
 0xfd5   : > { %v7001_v11 = vadd.f32 %v3420_v47, %v3336_v6  ;;  %3835 = vrot.lane.b32.xlu1 %v3801_v61, %s4168_s6  ;;  %v2267_v26 = vsel %vm2260_vm5, %v8065_v35, %v8064_v42  ;;  %v3001_v29 = vsel %vm2681_vm6, %v8067_v5, %v8066_v8  ;;  %v7015_v28 = vadd.f32 %v3421_v25, %v3337_v10 }
 0xfd6   : > { %3837 = vrot.lane.b32.xlu0 %v3802_v60, %s4168_s6  ;;  %v2184_v53 = vadd.f32 %v6754_v9, %v6714_v20  ;;  %v2185_v57 = vadd.f32 %v2162_v0, %v6721_v55  ;;  %v2268_v44 = vsel %vm2260_vm5, %v8064_v42, %v8068_v23  ;;  %v2918_v49 = vadd.f32 %v2896_v48, %v2813_v50  ;;  %v8075_v0 = vld [vmem:[#allocation302_spill] sm:$0xff] }
 0xfd7   : > { %v3308_v31 = vpop.permute.xlu1 %3307  ;;  %v2288_v34 = vadd.f32 %v2266_v24, %v6749_v38  ;;  %v2289_v7 = vadd.f32 %v8059_v27, %v6745_v4  ;;  %v2371_v30 = vsel %vm2260_vm5, %v7999_v51, %v8069_v19  ;;  %v3107_v20 = vsel %vm3102_vm0, %v8071_v14, %v8070_v36  ;;  %v3310_v55 = vpop.permute.xlu0 %3309  ;;  %v8072_v4 = vld [vmem:[#allocation210_spill] sm:$0xff]  ;;  %v8074_v51 = vld [vmem:[#allocation303_spill] sm:$0xff] }
 0xfd8   : > { %v2292_v9 = vadd.f32 %v8068_v23, %v2186_v3  ;;  %v2290_v58 = vadd.f32 %v2267_v26, %v2184_v53  ;;  %v3023_v22 = vadd.f32 %v3001_v29, %v2918_v49  ;;  %v7035_v40 = vsel %vm3102_vm0, %v3308_v31, %v3310_v55  ;;  %v8081_v29 = vld [vmem:[#allocation232_spill] sm:$0xff]  ;;  %v8082_v53 = vld [vmem:[#allocation234_spill] sm:$0xff] }
 0xfd9   : > { %v2291_v38 = vadd.f32 %v2268_v44, %v2185_v57  ;;  %v2394_v43 = vadd.f32 %v8069_v19, %v2289_v7  ;;  %v2372_v41 = vsel %vm2260_vm5, %v8073_v21, %v8072_v4  ;;  %v3212_v27 = vsel %vm3102_vm0, %v8075_v0, %v8074_v51  ;;  %v8083_v57 = vld [vmem:[#allocation233_spill] sm:$0xff]  ;;  %v8084_v7 = vld [vmem:[#allocation235_spill] sm:$0xff] }
 0xfda   : > { %v2393_v24 = vadd.f32 %v2371_v30, %v2288_v34  ;;  %v2373_v32 = vsel %vm2260_vm5, %v8072_v4, %v8076_v1  ;;  %v2476_v59 = vsel %vm2260_vm5, %v8007_v18, %v8077_v33  ;;  %v3129_v61 = vadd.f32 %v3107_v20, %v3023_v22  ;;  %v8080_v18 = vld [vmem:[#allocation223_spill] sm:$0xff]  ;;  %v8085_v20 = vld [vmem:[#allocation244_spill] sm:$0xff] }
 0xfdb   : > { %v7050_v17 = vpop.permute.xlu1 %3311  ;;  %v2397_v6 = vadd.f32 %v8076_v1, %v2292_v9  ;;  %v2477_v48 = vsel %vm2260_vm5, %v8079_v63, %v8078_v39  ;;  %v3317_v60 = vsel %vm3102_vm0, %v6878_v16, %v6916_v37  ;;  %v3407_v47 = vpop.permute.xlu0 %3406  ;;  %v2395_v62 = vadd.f32 %v2372_v41, %v2290_v58  ;;  %v8087_v9 = vld [vmem:[#allocation245_spill] sm:$0xff]  ;;  %v8088_v21 = vld [vmem:[#allocation247_spill] sm:$0xff] }
 0xfdc   : > { %v7061_v10 = vsel %vm3102_vm0, %v3310_v55, %v7050_v17  ;;  %v2478_v50 = vsel %vm2260_vm5, %v8078_v39, %v8080_v18  ;;  %v3234_v25 = vadd.f32 %v3212_v27, %v3129_v61  ;;  %v2396_v3 = vadd.f32 %v2373_v32, %v2291_v38  ;;  %v8086_v55 = vld [vmem:[#allocation246_spill] sm:$0xff] }
 0xfdd   : > { %v2498_v42 = vadd.f32 %v2476_v59, %v2393_v24  ;;  %v2499_v35 = vadd.f32 %v8077_v33, %v2394_v43  ;;  %v2502_v26 = vadd.f32 %v8080_v18, %v2397_v6  ;;  %v2500_v5 = vadd.f32 %v2477_v48, %v2395_v62  ;;  %v8089_v27 = vld [vmem:[#allocation258_spill] sm:$0xff]  ;;  %v8090_v24 = vld [vmem:[#allocation257_spill] sm:$0xff]  ;;  %v8093_v18 = vld [vmem:[#allocation256_spill] sm:$0xff] }
 0xfde   : > { %v2581_v16 = vsel %vm2260_vm5, %v8020_v45, %v8081_v29  ;;  %v2582_v23 = vsel %vm2260_vm5, %v8083_v57, %v8082_v53  ;;  %v3339_v44 = vadd.f32 %v3317_v60, %v3234_v25  ;;  %v2501_v31 = vadd.f32 %v2478_v50, %v2396_v3  ;;  %v8091_v48 = vld [vmem:[#allocation270_spill] sm:$0xff]  ;;  %v8092_v60 = vld [vmem:[#allocation269_spill] sm:$0xff]  ;;  %v8094_v25 = vld [vmem:[#allocation259_spill] sm:$0xff] }
 0xfdf   : > { %v3409_v49 = vpop.permute.xlu1 %3408  ;;  %v2604_v34 = vadd.f32 %v8081_v29, %v2499_v35  ;;  %v2583_v19 = vsel %vm2260_vm5, %v8082_v53, %v8084_v7  ;;  %v7079_v14 = vpop.permute.xlu0 %3410  ;;  %v2687_v45 = vsel %vm2681_vm6, %v8028_v54, %v8085_v20  ;;  %v2688_v58 = vsel %vm2681_vm6, %v8087_v9, %v8086_v55  ;;  %v8095_v29 = vld [vmem:[#allocation268_spill] sm:$0xff]  ;;  %v8096_v53 = vld [vmem:[#allocation282_spill] sm:$0xff]  ;;  %v8097_v57 = vld [vmem:[#allocation281_spill] sm:$0xff] }
 0xfe0   : > { %v3422_v30 = vsel %vm3102_vm0, %v3407_v47, %v3409_v49  ;;  %v7091_v38 = vsel %vm3102_vm0, %v3409_v49, %v7079_v14  ;;  %v2603_v43 = vadd.f32 %v2581_v16, %v2498_v42  ;;  %v2605_v4 = vadd.f32 %v2582_v23, %v2500_v5 }
 0xfe1   : > { %v7087_v22 = vadd.f32 %v3422_v30, %v3339_v44  ;;  %v2689_v41 = vsel %vm2681_vm6, %v8086_v55, %v8088_v21  ;;  %v2607_v0 = vadd.f32 %v8084_v7, %v2502_v26  ;;  %v2606_v54 = vadd.f32 %v2583_v19, %v2501_v31  ;;  %v8098_v44 = vld [vmem:[#allocation271_spill] sm:$0xff] }
 0xfe2   : > { %v2793_v1 = vsel %vm2681_vm6, %v8090_v24, %v8089_v27  ;;  %v2709_v33 = vadd.f32 %v2687_v45, %v2603_v43  ;;  %v2710_v59 = vadd.f32 %v8085_v20, %v2604_v34  ;;  %v2711_v61 = vadd.f32 %v2688_v58, %v2605_v4  ;;  %v8099_v20 = vld [vmem:[#allocation294_spill] sm:$0xff]  ;;  %v8101_v43 = vld [vmem:[#allocation283_spill] sm:$0xff]  ;;  %v8104_v24 = vld [vmem:[#allocation305_spill] sm:$0xff] }
 0xfe3   : > { %v3500_v32 = vpop.permute.xlu1 %3499  ;;  %v3502_v6 = vpop.permute.xlu0 %3501  ;;  %v2713_v39 = vadd.f32 %v8088_v21, %v2607_v0  ;;  %v2712_v63 = vadd.f32 %v2689_v41, %v2606_v54  ;;  %v2898_v47 = vsel %vm2681_vm6, %v8092_v60, %v8091_v48  ;;  %v2792_v50 = vsel %vm2681_vm6, %v8060_v12, %v8093_v18  ;;  %v8102_v0 = vld [vmem:[#allocation280_spill] sm:$0xff] }
 0xfe4   : > { %v3524_v62 = vsel %vm3523_vm7, %v3500_v32, %v3502_v6  ;;  %v2794_v3 = vsel %vm2681_vm6, %v8089_v27, %v8094_v25  ;;  %v2816_v42 = vadd.f32 %v2793_v1, %v2711_v61  ;;  %v2815_v26 = vadd.f32 %v8093_v18, %v2710_v59  ;;  %v8103_v27 = vld [vmem:[#allocation306_spill] sm:$0xff] }
 0xfe5   : > { %v7113_v35 = vadd.f32 %v3524_v62, %v6958_v52  ;;  %v2818_v5 = vadd.f32 %v8094_v25, %v2713_v39  ;;  %v2897_v16 = vsel %vm2681_vm6, %v8062_v13, %v8095_v29  ;;  %v3003_v12 = vsel %vm2681_vm6, %v8097_v57, %v8096_v53  ;;  %v8100_v13 = vld [vmem:[#allocation293_spill] sm:$0xff]  ;;  %v8106_v62 = vld [vmem:[#allocation307_spill] sm:$0xff] }
 0xfe6   : > { %v2899_v49 = vsel %vm2681_vm6, %v8091_v48, %v8098_v44  ;;  %v2921_v31 = vadd.f32 %v2898_v47, %v2816_v42  ;;  %v2814_v19 = vadd.f32 %v2792_v50, %v2709_v33  ;;  %v2817_v30 = vadd.f32 %v2794_v3, %v2712_v63  ;;  %v8105_v33 = vld [vmem:[#allocation295_spill] sm:$0xff]  ;;  %v8107_v42 = vld [vmem:[#allocation292_spill] sm:$0xff] }
 0xfe7   : > { %v3504_v23 = vpop.permute.xlu1 %3503  ;;  %v3506_v7 = vpop.permute.xlu0 %3505  ;;  %v3109_v45 = vsel %vm3102_vm0, %v8100_v13, %v8099_v20  ;;  %v2920_v9 = vadd.f32 %v8095_v29, %v2815_v26  ;;  %v2923_v58 = vadd.f32 %v8098_v44, %v2818_v5  ;;  %v3004_v4 = vsel %vm2681_vm6, %v8096_v53, %v8101_v43 }
 0xfe8   : > { %v3525_v52 = vsel %vm3523_vm7, %v3502_v6, %v3504_v23  ;;  %v7128_v34 = vadd.f32 %v3504_v23, %v6972_v46  ;;  %v3026_v46 = vadd.f32 %v3003_v12, %v2921_v31  ;;  %v2919_v21 = vadd.f32 %v2897_v16, %v2814_v19  ;;  %v8108_v12 = vld [vmem:[#allocation304_spill] sm:$0xff] }
 0xfe9   : > { %v7134_v55 = vadd.f32 %v3525_v52, %v6977_v15  ;;  %v2922_v41 = vadd.f32 %v2899_v49, %v2817_v30  ;;  %v3002_v54 = vsel %vm2681_vm6, %v8066_v8, %v8102_v0  ;;  %v3214_v15 = vsel %vm3102_vm0, %v8104_v24, %v8103_v27 }
 0xfea   : > { %v3028_v32 = vadd.f32 %v8101_v43, %v2923_v58  ;;  %v3110_v59 = vsel %vm3102_vm0, %v8099_v20, %v8105_v33  ;;  %v3132_v61 = vadd.f32 %v3109_v45, %v3026_v46  ;;  %v3215_v18 = vsel %vm3102_vm0, %v8103_v27, %v8106_v62 }
 0xfeb   : > { %v3508_v1 = vpop.permute.xlu1 %3507  ;;  %v3510_v39 = vpop.permute.xlu0 %3509  ;;  %v3027_v63 = vadd.f32 %v3004_v4, %v2922_v41  ;;  %v3025_v3 = vadd.f32 %v8102_v0, %v2920_v9 }
 0xfec   : > { %v3526_v6 = vsel %vm3523_vm7, %v3506_v7, %v3508_v1  ;;  %v3527_v8 = vsel %vm3523_vm7, %v3508_v1, %v3510_v39  ;;  %v7155_v60 = vadd.f32 %v3510_v39, %v7004_v56  ;;  %v3134_v47 = vadd.f32 %v8105_v33, %v3028_v32 }
 0xfed   : > { %v3547_v48 = vadd.f32 %v3526_v6, %v7001_v11  ;;  %v3237_v50 = vadd.f32 %v3214_v15, %v3132_v61  ;;  %v7162_v25 = vadd.f32 %v3527_v8, %v7015_v28  ;;  %v3108_v11 = vsel %vm3102_vm0, %v8070_v36, %v8107_v42 }
 0xfee   : > { %v3133_v26 = vadd.f32 %v3110_v59, %v3027_v63  ;;  %v3024_v56 = vadd.f32 %v3002_v54, %v2919_v21  ;;  %v3239_v29 = vadd.f32 %v8106_v62, %v3134_v47  ;;  %v3131_v57 = vadd.f32 %v8107_v42, %v3025_v3 }
 0xfef   : > { %v3413_v5 = vpop.permute.xlu1 %3412  ;;  %v3342_v16 = vadd.f32 %v7035_v40, %v3237_v50  ;;  %v3415_v53 = vpop.permute.xlu0 %3414  ;;  %v3213_v28 = vsel %vm3102_vm0, %v8074_v51, %v8108_v12  ;;  %v3318_v40 = vsel %vm3102_vm0, %v6916_v37, %v6924_v2 }
 0xff0   : > { %v3238_v23 = vadd.f32 %v3215_v18, %v3133_v26  ;;  %v3424_v44 = vsel %vm3102_vm0, %v3413_v5, %v3415_v53  ;;  %v3130_v49 = vadd.f32 %v3108_v11, %v3024_v56  ;;  %v3344_v36 = vadd.f32 %v7050_v17, %v3239_v29 }
 0xff1   : > { %v7176_v31 = vadd.f32 %v3424_v44, %v3342_v16  ;;  %v3236_v52 = vadd.f32 %v8108_v12, %v3131_v57 }
 0xff2   : > { %v3343_v7 = vadd.f32 %v7061_v10, %v3238_v23  ;;  %v3235_v30 = vadd.f32 %v3213_v28, %v3130_v49 }
 0xff3   : > { %v3417_v19 = vpop.permute.xlu1 %3416  ;;  %v3512_v13 = vpop.permute.xlu0 %3511  ;;  %v3341_v45 = vadd.f32 %v6924_v2, %v3236_v52 }
 0xff4   : > { %v3425_v51 = vsel %vm3102_vm0, %v3415_v53, %v3417_v19  ;;  %v7184_v20 = vadd.f32 %v3417_v19, %v3344_v36  ;;  %v3340_v9 = vadd.f32 %v3318_v40, %v3235_v30 }
 0xff5   : > { %v7187_v17 = vadd.f32 %v3425_v51, %v3343_v7  ;;  %v3446_v58 = vadd.f32 %v7079_v14, %v3341_v45 }
 0xff6   : > { %v3445_v4 = vadd.f32 %v7091_v38, %v3340_v9 }
 0xff7   : > { %v3514_v43 = vpop.permute.xlu1 %3513  ;;  %v3516_v10 = vpop.permute.xlu0 %3515 }
 0xff8   : > { %v3528_v37 = vsel %vm3523_vm7, %v3512_v13, %v3514_v43  ;;  %v3529_v21 = vsel %vm3523_vm7, %v3514_v43, %v3516_v10  ;;  %v7196_v41 = vadd.f32 %v3516_v10, %v3446_v58 }
 0xff9   : > { %v7193_v46 = vadd.f32 %v3528_v37, %v7087_v22  ;;  %v7198_v0 = vadd.f32 %v3529_v21, %v3445_v4 }
 0xffb   : > { %v3606_v2 = vpop.permute.xlu1 %3605  ;;  %v3608_v54 = vpop.permute.xlu0 %3607 }
 0xffc   : > { %v3629_v27 = vsel %vm3523_vm7, %v3606_v2, %v3608_v54 }
 0xffd   : > { %v3649_v14 = vadd.f32 %v3629_v27, %v7113_v35 }
 0xfff   : > { %v3610_v24 = vpop.permute.xlu1 %3609  ;;  %v3612_v1 = vpop.permute.xlu0 %3611 }
0x1000   : > { %v3630_v38 = vsel %vm3523_vm7, %v3608_v54, %v3610_v24  ;;  %v3651_v15 = vadd.f32 %v3610_v24, %v7128_v34 }
0x1001   : > { %v3650_v22 = vadd.f32 %v3630_v38, %v7134_v55 }
0x1003   : > { %v3614_v32 = vpop.permute.xlu1 %3613  ;;  %v3616_v59 = vpop.permute.xlu0 %3615 }
0x1004   : > { %v3631_v33 = vsel %vm3523_vm7, %v3612_v1, %v3614_v32  ;;  %v3632_v53 = vsel %vm3523_vm7, %v3614_v32, %v3616_v59  ;;  %v3654_v44 = vadd.f32 %v3616_v59, %v7155_v60 }
0x1005   : > { %v3652_v61 = vadd.f32 %v3631_v33, %v3547_v48  ;;  %v3653_v40 = vadd.f32 %v3632_v53, %v7162_v25 }
0x1007   : > { %v7206_v6 = vpop.permute.xlu1 %3517  ;;  %v7208_v39 = vpop.permute.xlu0 %3519 }
0x100b   : > { %v7210_v63 = vpop.permute.xlu1 %3521  ;;  %v3618_v35 = vpop.permute.xlu0 %3617 }
0x100f   : > { %v3620_v8 = vpop.permute.xlu1 %3619  ;;  %v3622_v47 = vpop.permute.xlu0 %3621 }
0x1010   : > { %v3633_v1 = vsel %vm3523_vm7, %v3618_v35, %v3620_v8 }
0x1013   : > { %v3711_v62 = vpop.permute.xlu1 %3710  ;;  %v3713_v18 = vpop.permute.xlu0 %3712 }
0x1014   : > { %v3734_v57 = vsel %vm3523_vm7, %v3711_v62, %v3713_v18  ;;  %v3657_v62 = vadd.f32 %v3622_v47, %v7196_v41 }
0x1015   : > { %v3754_v7 = vadd.f32 %v3734_v57, %v3649_v14 }
0x1017   : > { %v3715_v34 = vpop.permute.xlu1 %3714  ;;  %v3717_v50 = vpop.permute.xlu0 %3716 }
0x1018   : > { %v3735_v49 = vsel %vm3523_vm7, %v3713_v18, %v3715_v34  ;;  %v3756_v19 = vadd.f32 %v3715_v34, %v3651_v15 }
0x1019   : > { %v3755_v9 = vadd.f32 %v3735_v49, %v3650_v22  ;;  %v3634_v22 = vsel %vm3523_vm7, %v3620_v8, %v3622_v47  ;;  %v3530_v49 = vsel %vm3523_vm7, %v7206_v6, %v7208_v39 }
0x101a   : > { %v3656_v34 = vadd.f32 %v3634_v22, %v7198_v0 }
0x101b   : > { %v3719_v3 = vpop.permute.xlu1 %3718  ;;  %v3721_v55 = vpop.permute.xlu0 %3720 }
0x101c   : > { %v3736_v28 = vsel %vm3523_vm7, %v3717_v50, %v3719_v3  ;;  %v3737_v36 = vsel %vm3523_vm7, %v3719_v3, %v3721_v55  ;;  %v3759_v51 = vadd.f32 %v3721_v55, %v3654_v44 }
0x101d   : > { %v3757_v30 = vadd.f32 %v3736_v28, %v3652_v61  ;;  %v3758_v58 = vadd.f32 %v3737_v36, %v3653_v40  ;;  %v3655_v61 = vadd.f32 %v3633_v1, %v7193_v46  ;;  %v3555_v46 = vadd.f32 %v7210_v63, %v7184_v20 }
0x101e   : > { %v3531_v36 = vsel %vm3523_vm7, %v7208_v39, %v7210_v63  ;;  %v3553_v40 = vadd.f32 %v3530_v49, %v7176_v31  ;;  %v3895_v31 = vld [vmem:[%s7275_s3] sm:$0x7] }
0x101f   : > { %v7212_v42 = vpop.permute.xlu1 %3623  ;;  %v7214_v11 = vpop.permute.xlu0 %3625 }
0x1020   : > { %v3635_v20 = vsel %vm3523_vm7, %v7212_v42, %v7214_v11 }
0x1023   : > { %v7216_v48 = vpop.permute.xlu1 %3627  ;;  %v3723_v26 = vpop.permute.xlu0 %3722 }
0x1024   : > { %v3660_v0 = vadd.f32 %v7216_v48, %v3555_v46 }
0x1027   : > { %v3725_v5 = vpop.permute.xlu1 %3724  ;;  %v3727_v56 = vpop.permute.xlu0 %3726 }
0x1028   : > { %v3738_v33 = vsel %vm3523_vm7, %v3723_v26, %v3725_v5  ;;  %v3739_v18 = vsel %vm3523_vm7, %v3725_v5, %v3727_v56  ;;  %v3762_v3 = vadd.f32 %v3727_v56, %v3657_v62 }
0x1029   : > { %v3760_v50 = vadd.f32 %v3738_v33, %v3655_v61 }
0x102b   : > { %v3816_v29 = vpop.permute.xlu1 %3815  ;;  %v3818_v16 = vpop.permute.xlu0 %3817 }
0x102c   : > { %v3839_v52 = vsel %vm3523_vm7, %v3816_v29, %v3818_v16  ;;  %v3761_v29 = vadd.f32 %v3739_v18, %v3656_v34 }
0x102d   : > { %v3859_v43 = vadd.f32 %v3839_v52, %v3754_v7  ;;  %v3636_v52 = vsel %vm3523_vm7, %v7214_v11, %v7216_v48  ;;  %v3554_v7 = vadd.f32 %v3531_v36, %v7187_v17 }
0x102f   : > { %v3820_v12 = vpop.permute.xlu1 %3819  ;;  %v3822_v23 = vpop.permute.xlu0 %3821 }
0x1030   : > { %v3840_v13 = vsel %vm3523_vm7, %v3818_v16, %v3820_v12  ;;  %v3861_v37 = vadd.f32 %v3820_v12, %v3756_v19 }
0x1031   : > { %v3860_v54 = vadd.f32 %v3840_v13, %v3755_v9  ;;  %v3659_v13 = vadd.f32 %v3636_v52, %v3554_v7 }
0x1033   : > { %v3824_v45 = vpop.permute.xlu1 %3823  ;;  %v3826_v4 = vpop.permute.xlu0 %3825 }
0x1034   : > { %v3841_v60 = vsel %vm3523_vm7, %v3822_v23, %v3824_v45  ;;  %v3842_v21 = vsel %vm3523_vm7, %v3824_v45, %v3826_v4  ;;  %v3864_v2 = vadd.f32 %v3826_v4, %v3759_v51  ;;  %v3658_v51 = vadd.f32 %v3635_v20, %v3553_v40 }
0x1035   : > { %v3862_v10 = vadd.f32 %v3841_v60, %v3757_v30  ;;  %v3863_v25 = vadd.f32 %v3842_v21, %v3758_v58  ;;  %v8109_v60 = vld [vmem:[#allocation10_spill] sm:$0xff] }
0x1036   : > { %v3873_v14 = vmax.f32 %v3861_v37, %v3864_v2  ;;  %v3908_v4 = vrot.slane %v3895_v31, %v8109_v60  ;;  %v8110_v2 = vld [vmem:[#allocation2_spill] sm:$0xff] }
0x1037   : > { %v3871_v27 = vmax.f32 %v3859_v43, %v3862_v10  ;;  %v3729_v24 = vpop.permute.xlu1 %3728  ;;  %v3872_v38 = vmax.f32 %v3860_v54, %v3863_v25  ;;  %v3731_v15 = vpop.permute.xlu0 %3730  ;;  %v3900_v54 = vrot.slane %v3895_v31, %v8110_v2  ;;  %v8111_v25 = vld [vmem:[#allocation6_spill] sm:$0xff] }
0x1038   : > { %v3740_v30 = vsel %vm3523_vm7, %v3729_v24, %v3731_v15 }
0x1039   : > { %v3763_v39 = vadd.f32 %v3740_v30, %v3658_v51 }
0x103b   : > { %v3733_v32 = vpop.permute.xlu1 %3732  ;;  %v3828_v59 = vpop.permute.xlu0 %3827 }
0x103c   : > { %v3765_v56 = vadd.f32 %v3733_v32, %v3660_v0  ;;  %v3741_v6 = vsel %vm3523_vm7, %v3731_v15, %v3733_v32 }
0x103d   : > { %v3764_v63 = vadd.f32 %v3741_v6, %v3659_v13 }
0x103f   : > { %v3830_v55 = vpop.permute.xlu1 %3829  ;;  %v3832_v16 = vpop.permute.xlu0 %3831 }
0x1040   : > { %v3843_v35 = vsel %vm3523_vm7, %v3828_v59, %v3830_v55  ;;  %v3844_v53 = vsel %vm3523_vm7, %v3830_v55, %v3832_v16  ;;  %v3867_v26 = vadd.f32 %v3832_v16, %v3762_v3 }
0x1041   : > { %v3865_v8 = vadd.f32 %v3843_v35, %v3760_v50  ;;  %v3866_v57 = vadd.f32 %v3844_v53, %v3761_v29 }
0x1042   : > { %v3876_v47 = vmax.f32 %v3873_v14, %v3867_v26 }
0x1043   : > { %v3874_v41 = vmax.f32 %v3871_v27, %v3865_v8  ;;  %v3875_v5 = vmax.f32 %v3872_v38, %v3866_v57  ;;  %v3834_v12 = vpop.permute.xlu0 %3833  ;;  %v3904_v27 = vrot.slane %v3895_v31, %v8111_v25 }
0x1048   : > { %v3838_v28 = vpop.permute.xlu0 %3837 }
0x1049   : > { %v3870_v23 = vadd.f32 %v3838_v28, %v3765_v56 }
0x104b   : > { %v3879_v44 = vmax.f32 %v3876_v47, %v3870_v23 }
0x1050   : > { %v3884_v19 = vpop.permute.xlu1 %3883 }
0x1051   : > { %v3888_v9 = vadd.f32 %v3884_v19, %v3879_v44 }
0x1053   : > { %v4127_v37 = vclamps-f32 %v3888_v9, 1.0 }
0x1054   : > { %v3836_v45 = vpop.permute.xlu1 %3835 }
0x1055   : > { %v3845_v42 = vsel %vm3523_vm7, %v3834_v12, %v3836_v45  ;;  %v3846_v58 = vsel %vm3523_vm7, %v3836_v45, %v3838_v28  ;;  %v3914_v38 = vmul.f32 %v4127_v37, %v3908_v4 }
0x1056   : > { %v3868_v17 = vadd.f32 %v3845_v42, %v3763_v39  ;;  %v3869_v11 = vadd.f32 %v3846_v58, %v3764_v63 }
0x1057   : > { %v3917_v32 = vsel %vm3916_vm8, %v3914_v38, 0.0 }
0x1058   : > { %v3877_v48 = vmax.f32 %v3874_v41, %v3868_v17  ;;  %v3878_v43 = vmax.f32 %v3875_v5, %v3869_v11 }
0x105a   : > { %v3886_v10 = vadd.f32 %v3884_v19, %v3877_v48  ;;  %v3887_v21 = vadd.f32 %v3884_v19, %v3878_v43 }
0x105c   : > { %v4125_v14 = vclamps-f32 %v3886_v10, 1.0  ;;  %v4126_v24 = vclamps-f32 %v3887_v21, 1.0 }
0x105e   : > { %v3912_v15 = vmul.f32 %v4125_v14, %v3900_v54  ;;  %v3913_v1 = vmul.f32 %v4126_v24, %v3904_v27 }
0x1060   : > { %v3915_v22 = vadd.f32 %v3913_v1, %v3912_v15 }
0x1062   : > { %v3918_v33 = vadd.f32 %v3917_v32, %v3915_v22 }
0x1064   : > { %3919 = vadd.xlane.f32.xlu1 %v3918_v33 }
0x10f1   : > { %v3920_v59 = vpop.xlane.xlu1 %3919 }
0x10f2   : > { %v3921_v61 = vmul.f32 0.00390625, %v3920_v59 }
0x10f4   : > { %4150 = vtanh.f32 %v3921_v61 }
0x10fe   : > { %v4151_v62 = vpop.eup %4150 }
0x10ff   : > { %3924 = vst.msk [vmem:[%s195_s13] sm:$0xff] %vm3923_vm9, %v4151_v62 }
0x1100 PF: > { %s14_s15 = sadd.s32 1, %s4158_s15  }
0x1101   : > { %p11_p4 = scmp.ge.s32.totalorder %s14_s15, 4  }
0x1103   :  { %13 = sbr.rel (!%p11_p4) target bundleno = 1 (0x1), region = 101 }

</bundles_post_ra>
